<compile_context>
chip_gen: v7x
topology: tpu7x:2x2x1
jax: 0.10.0
libtpu: 0.0.40
codegen_flags: <defaults>
</compile_context>

<pallas_src>
import functools
import math

import jax
import jax.numpy as jnp
from jax import lax
from jax.experimental import pallas as pl
from jax.experimental.pallas import tpu as pltpu

# TODO(synk): BertTokenizer (string -> ids) has no Pallas equivalent; input_ids/attention_mask
#             are taken as tensor inputs instead.


# -----------------------------------------------------------------------------
# Generation-aware VMEM budget
# -----------------------------------------------------------------------------

@functools.lru_cache(maxsize=None)
def _vmem_limit():
    cap = None
    try:
        cap = getattr(pltpu.get_tpu_info(), "vmem_capacity_bytes", None)
    except Exception:
        cap = None
    if not cap:
        cap = 64 * 1024 * 1024  # conservative default (v7x-sized)
    # ~90 MiB on 128 MiB parts (v5e/v6e), ~45 MiB on 64 MiB parts (v7x)
    return int(max(32 * 1024 * 1024, min(cap * 0.7, 100 * 1024 * 1024)))


# -----------------------------------------------------------------------------
# Tile selection (hardened: (8,128)-legal tiles, pad-and-slice for awkward dims)
# -----------------------------------------------------------------------------

def _round_up(x, m):
    return ((x + m - 1) // m) * m


def _tile_for(dim, cap, lane=False):
    """Return (tile, padded_dim) with tile dividing padded_dim.

    lane=True  -> tile must be a multiple of 128 (or == dim when dim <= cap).
    lane=False -> tile must be a multiple of 8   (or == dim when dim <= cap).
    """
    if dim <= cap:
        return dim, dim
    steps = (128,) if lane else (128, 8)
    for step in steps:
        t = (cap // step) * step
        while t >= step:
            if dim % t == 0:
                return t, dim
            t -= step
    step = 128 if lane else 8
    t = max((cap // step) * step, step)
    return t, _round_up(dim, t)


# -----------------------------------------------------------------------------
# Tiled linear (optional activation epilogue)
# -----------------------------------------------------------------------------

def _matmul_kernel(x_ref, w_ref, b_ref, o_ref, acc_ref, *, activation):
    k = pl.program_id(2)

    @pl.when(k == 0)
    def _():
        acc_ref[...] = jnp.zeros_like(acc_ref)

    acc_ref[...] += jnp.dot(x_ref[...], w_ref[...], preferred_element_type=jnp.float32)

    @pl.when(k == pl.num_programs(2) - 1)
    def _():
        y = acc_ref[...] + b_ref[...].astype(jnp.float32)
        if activation == "gelu":
            # exact (erf-based) GELU, as used by BERT; f32 math
            y = 0.5 * y * (1.0 + lax.erf(y * (1.0 / math.sqrt(2.0))))
        elif activation == "tanh":
            y = jnp.tanh(y)
        o_ref[...] = y.astype(o_ref.dtype)


def linear_pallas(x, w, b, activation=None, out_dtype=None):
    """y = act(x @ w + b).  x: [M, K] (bf16), w: [K, N] (bf16), b: [N] (f32)."""
    M, K = x.shape
    _, N = w.shape
    out_dtype = out_dtype or x.dtype

    tm_cap = int(min(1024, max(512, M // 2)))      # >=2 M-blocks when M is large (v7x megacore)
    tm, Mp = _tile_for(M, tm_cap, lane=False)
    tk, Kp = _tile_for(K, 512, lane=True)
    tn, Np = _tile_for(N, 768, lane=True)

    if Mp != M or Kp != K:
        x = jnp.pad(x, ((0, Mp - M), (0, Kp - K)))
    if Kp != K or Np != N:
        w = jnp.pad(w, ((0, Kp - K), (0, Np - N)))
    b2 = b.reshape(1, N)
    if Np != N:
        b2 = jnp.pad(b2, ((0, 0), (0, Np - N)))

    kern = functools.partial(_matmul_kernel, activation=activation)
    out = pl.pallas_call(
        kern,
        out_shape=jax.ShapeDtypeStruct((Mp, Np), out_dtype),
        grid=(Mp // tm, Np // tn, Kp // tk),
        in_specs=[
            pl.BlockSpec((tm, tk), lambda i, j, k: (i, k)),
            pl.BlockSpec((tk, tn), lambda i, j, k: (k, j)),
            pl.BlockSpec((1, tn), lambda i, j, k: (0, j)),
        ],
        out_specs=pl.BlockSpec((tm, tn), lambda i, j, k: (i, j)),
        scratch_shapes=[pltpu.VMEM((tm, tn), jnp.float32)],
        compiler_params=pltpu.CompilerParams(
            dimension_semantics=("parallel", "parallel", "arbitrary"),
            vmem_limit_bytes=_vmem_limit(),
        ),
    )(x, w, b2)
    if Mp != M or Np != N:
        out = out[:M, :N]
    return out


# -----------------------------------------------------------------------------
# Tiled linear with fused residual-add + LayerNorm epilogue (full N per block)
# -----------------------------------------------------------------------------

def _matmul_add_ln_kernel(x_ref, w_ref, b_ref, r_ref, g_ref, be_ref, o_ref, acc_ref, *, eps):
    k = pl.program_id(1)

    @pl.when(k == 0)
    def _():
        acc_ref[...] = jnp.zeros_like(acc_ref)

    acc_ref[...] += jnp.dot(x_ref[...], w_ref[...], preferred_element_type=jnp.float32)

    @pl.when(k == pl.num_programs(1) - 1)
    def _():
        y = acc_ref[...] + b_ref[...].astype(jnp.float32) + r_ref[...].astype(jnp.float32)
        mu = jnp.mean(y, axis=-1, keepdims=True)
        var = jnp.mean(jnp.square(y - mu), axis=-1, keepdims=True)
        o_ref[...] = (
            (y - mu) * lax.rsqrt(var + eps) * g_ref[...].astype(jnp.float32)
            + be_ref[...].astype(jnp.float32)
        ).astype(o_ref.dtype)


def linear_add_ln_pallas(x, w, b, residual, gamma, beta, eps=1e-12, out_dtype=None):
    """LayerNorm(x @ w + b + residual).  x: [M, K], w: [K, N], residual: [M, N]."""
    M, K = x.shape
    _, N = w.shape
    out_dtype = out_dtype or x.dtype

    tm_cap = int(min(1024, max(512, M // 2)))
    tm, Mp = _tile_for(M, tm_cap, lane=False)
    tk, Kp = _tile_for(K, 512, lane=True)

    if Mp != M or Kp != K:
        x = jnp.pad(x, ((0, Mp - M), (0, Kp - K)))
    if Kp != K:
        w = jnp.pad(w, ((0, Kp - K), (0, 0)))
    r = residual
    if Mp != M:
        r = jnp.pad(r, ((0, Mp - M), (0, 0)))

    kern = functools.partial(_matmul_add_ln_kernel, eps=eps)
    out = pl.pallas_call(
        kern,
        out_shape=jax.ShapeDtypeStruct((Mp, N), out_dtype),
        grid=(Mp // tm, Kp // tk),
        in_specs=[
            pl.BlockSpec((tm, tk), lambda i, k: (i, k)),
            pl.BlockSpec((tk, N), lambda i, k: (k, 0)),
            pl.BlockSpec((1, N), lambda i, k: (0, 0)),
            pl.BlockSpec((tm, N), lambda i, k: (i, 0)),
            pl.BlockSpec((1, N), lambda i, k: (0, 0)),
            pl.BlockSpec((1, N), lambda i, k: (0, 0)),
        ],
        out_specs=pl.BlockSpec((tm, N), lambda i, k: (i, 0)),
        scratch_shapes=[pltpu.VMEM((tm, N), jnp.float32)],
        compiler_params=pltpu.CompilerParams(
            dimension_semantics=("parallel", "arbitrary"),
            vmem_limit_bytes=_vmem_limit(),
        ),
    )(x, w, b.reshape(1, N), r, gamma.reshape(1, N), beta.reshape(1, N))
    if Mp != M:
        out = out[:M]
    return out


# -----------------------------------------------------------------------------
# LayerNorm (no residual) for the embedding output
# -----------------------------------------------------------------------------

def _ln_kernel(x_ref, g_ref, b_ref, o_ref, *, eps):
    x = x_ref[...].astype(jnp.float32)
    mu = jnp.mean(x, axis=-1, keepdims=True)
    var = jnp.mean(jnp.square(x - mu), axis=-1, keepdims=True)
    o_ref[...] = (
        (x - mu) * lax.rsqrt(var + eps) * g_ref[...].astype(jnp.float32)
        + b_ref[...].astype(jnp.float32)
    ).astype(o_ref.dtype)


def layernorm_pallas(x, gamma, beta, eps=1e-12, out_dtype=None):
    M, H = x.shape
    out_dtype = out_dtype or x.dtype
    tm, Mp = _tile_for(M, 1024, lane=False)
    if Mp != M:
        x = jnp.pad(x, ((0, Mp - M), (0, 0)))
    kern = functools.partial(_ln_kernel, eps=eps)
    out = pl.pallas_call(
        kern,
        out_shape=jax.ShapeDtypeStruct((Mp, H), out_dtype),
        grid=(Mp // tm,),
        in_specs=[
            pl.BlockSpec((tm, H), lambda i: (i, 0)),
            pl.BlockSpec((1, H), lambda i: (0, 0)),
            pl.BlockSpec((1, H), lambda i: (0, 0)),
        ],
        out_specs=pl.BlockSpec((tm, H), lambda i: (i, 0)),
        compiler_params=pltpu.CompilerParams(
            dimension_semantics=("parallel",), vmem_limit_bytes=_vmem_limit()
        ),
    )(x, gamma.reshape(1, H), beta.reshape(1, H))
    if Mp != M:
        out = out[:M]
    return out


# -----------------------------------------------------------------------------
# Self-attention: grid over (batch, head-group); per-head lane-slice stores
# -----------------------------------------------------------------------------

def _attention_kernel(q_ref, k_ref, v_ref, m_ref, o_ref, *,
                      group_heads, dh, scale, q_off, k_off, v_off):
    bias = m_ref[0].astype(jnp.float32)        # [1, S] additive mask, broadcast over rows
    q_all = q_ref[0]                           # [S, W] storage dtype (bf16)
    k_all = k_ref[0]
    v_all = v_ref[0]
    for h in range(group_heads):
        # scale folded into Q (S*dh muls) instead of the S*S score matrix
        qh = q_all[:, q_off + h * dh: q_off + (h + 1) * dh] * scale
        kh = k_all[:, k_off + h * dh: k_off + (h + 1) * dh]
        vh = v_all[:, v_off + h * dh: v_off + (h + 1) * dh]
        # contract last dims directly (no explicit K transpose)
        s = lax.dot_general(qh, kh, (((1,), (1,)), ((), ())),
                            preferred_element_type=jnp.float32)
        s = s + bias
        s = s - jnp.max(s, axis=-1, keepdims=True)
        p = jnp.exp(s)
        inv = pl.reciprocal(jnp.sum(p, axis=-1, keepdims=True), approx=True)
        p = (p * inv).astype(v_all.dtype)
        ctx = jnp.dot(p, vh, preferred_element_type=jnp.float32)
        # store this head's context directly into its output lane slice (no concat)
        o_ref[0, :, h * dh:(h + 1) * dh] = ctx.astype(o_ref.dtype)


def attention_pallas(qkv, mask_bias, *, heads, out_dtype):
    """qkv: [B, S, 3H] fused projections (layout [Q|K|V]); mask_bias: [B, 1, S] additive bias."""
    B, S, H3 = qkv.shape
    H = H3 // 3
    dh = H // heads
    scale = 1.0 / math.sqrt(dh)

    # smallest head-group size G dividing `heads` with G*dh a multiple of 128
    group = None
    for g in range(1, heads + 1):
        if heads % g == 0 and (g * dh) % 128 == 0:
            group = g
            break

    if group is not None:
        n_groups = heads // group
        gdh = group * dh
        kern = functools.partial(_attention_kernel, group_heads=group, dh=dh, scale=scale,
                                 q_off=0, k_off=0, v_off=0)
        grid = (B, n_groups)
        in_specs = [
            pl.BlockSpec((1, S, gdh), lambda b, g: (b, 0, g)),
            pl.BlockSpec((1, S, gdh), lambda b, g, ng=n_groups: (b, 0, ng + g)),
            pl.BlockSpec((1, S, gdh), lambda b, g, ng=n_groups: (b, 0, 2 * ng + g)),
            pl.BlockSpec((1, 1, S), lambda b, g: (b, 0, 0)),
        ]
        out_spec = pl.BlockSpec((1, S, gdh), lambda b, g: (b, 0, g))
    else:
        # fallback for tiny models where no 128-lane head-group exists: one full-3H block
        kern = functools.partial(_attention_kernel, group_heads=heads, dh=dh, scale=scale,
                                 q_off=0, k_off=H, v_off=2 * H)
        grid = (B, 1)
        in_specs = [
            pl.BlockSpec((1, S, H3), lambda b, g: (b, 0, 0)),
            pl.BlockSpec((1, S, H3), lambda b, g: (b, 0, 0)),
            pl.BlockSpec((1, S, H3), lambda b, g: (b, 0, 0)),
            pl.BlockSpec((1, 1, S), lambda b, g: (b, 0, 0)),
        ]
        out_spec = pl.BlockSpec((1, S, H), lambda b, g: (b, 0, 0))

    return pl.pallas_call(
        kern,
        out_shape=jax.ShapeDtypeStruct((B, S, H), out_dtype),
        grid=grid,
        in_specs=in_specs,
        out_specs=out_spec,
        compiler_params=pltpu.CompilerParams(
            dimension_semantics=("parallel", "parallel"),
            vmem_limit_bytes=_vmem_limit(),
        ),
    )(qkv, qkv, qkv, mask_bias)


# -----------------------------------------------------------------------------
# Fused pooler (tanh on [CLS]) + classifier head
# -----------------------------------------------------------------------------

def _pool_cls_kernel(x_ref, pw_ref, pb_ref, cw_ref, cb_ref, o_ref):
    pooled = jnp.tanh(
        jnp.dot(x_ref[...], pw_ref[...], preferred_element_type=jnp.float32)
        + pb_ref[...].astype(jnp.float32)
    )
    logits = (
        jnp.dot(pooled.astype(cw_ref.dtype), cw_ref[...], preferred_element_type=jnp.float32)
        + cb_ref[...].astype(jnp.float32)
    )
    o_ref[...] = logits


def pooler_classifier_pallas(cls, pool_w, pool_b, cls_w, cls_b):
    B, H = cls.shape
    C = cls_w.shape[1]
    return pl.pallas_call(
        _pool_cls_kernel,
        out_shape=jax.ShapeDtypeStruct((B, C), jnp.float32),
        in_specs=[
            pl.BlockSpec((B, H), lambda: (0, 0)),
            pl.BlockSpec((H, H), lambda: (0, 0)),
            pl.BlockSpec((1, H), lambda: (0, 0)),
            pl.BlockSpec((H, C), lambda: (0, 0)),
            pl.BlockSpec((1, C), lambda: (0, 0)),
        ],
        out_specs=pl.BlockSpec((B, C), lambda: (0, 0)),
        compiler_params=pltpu.CompilerParams(vmem_limit_bytes=_vmem_limit()),
    )(cls, pool_w, pool_b.reshape(1, H), cls_w, cls_b.reshape(1, C))


# -----------------------------------------------------------------------------
# Model (small BERT encoder + pooler + classifier head)
# -----------------------------------------------------------------------------

def init_params(key, *, vocab, max_pos, type_vocab, hidden, heads, inter, layers, class_num,
                dtype=jnp.bfloat16):
    def nrm(k, shape, scale=0.02):
        return (scale * jax.random.normal(k, shape, dtype=jnp.float32)).astype(dtype)

    keys = iter(jax.random.split(key, 8 + layers * 8))
    p = {
        "word_emb": nrm(next(keys), (vocab, hidden)),
        "pos_emb": nrm(next(keys), (max_pos, hidden)),
        "type_emb": nrm(next(keys), (type_vocab, hidden)),
        "emb_ln_g": jnp.ones((hidden,), jnp.float32),
        "emb_ln_b": jnp.zeros((hidden,), jnp.float32),
        "pool_w": nrm(next(keys), (hidden, hidden)),
        "pool_b": jnp.zeros((hidden,), jnp.float32),
        "cls_w": nrm(next(keys), (hidden, class_num)),
        "cls_b": jnp.zeros((class_num,), jnp.float32),
        "layers": [],
    }
    for _ in range(layers):
        lp = {
            # fused Q/K/V projection: one [H, 3H] weight, column layout [Q | K | V]
            "wqkv": nrm(next(keys), (hidden, 3 * hidden)),
            "bqkv": jnp.zeros((3 * hidden,), jnp.float32),
            "wo": nrm(next(keys), (hidden, hidden)),
            "bo": jnp.zeros((hidden,), jnp.float32),
            "attn_ln_g": jnp.ones((hidden,), jnp.float32),
            "attn_ln_b": jnp.zeros((hidden,), jnp.float32),
            "w1": nrm(next(keys), (hidden, inter)),
            "b1": jnp.zeros((inter,), jnp.float32),
            "w2": nrm(next(keys), (inter, hidden)),
            "b2": jnp.zeros((hidden,), jnp.float32),
            "ffn_ln_g": jnp.ones((hidden,), jnp.float32),
            "ffn_ln_b": jnp.zeros((hidden,), jnp.float32),
        }
        p["layers"].append(lp)
    return p


def bert_classifier_forward(params, input_ids, attention_mask, *, heads):
    B, S = input_ids.shape
    H = params["word_emb"].shape[1]
    dt = params["word_emb"].dtype

    # --- embeddings (gather is glue; LayerNorm is a Pallas kernel, no zero residual) ---
    word = jnp.take(params["word_emb"], input_ids, axis=0)              # [B, S, H]
    pos = params["pos_emb"][:S][None, :, :]                             # [1, S, H]
    # TODO(synk): token_type embeddings hard-wired to type id 0 (single-segment inputs).
    tok_type = params["type_emb"][0][None, None, :]                     # [1, 1, H]
    emb = (word + pos + tok_type).reshape(B * S, H)
    x = layernorm_pallas(emb, params["emb_ln_g"], params["emb_ln_b"], out_dtype=dt)

    # --- extended attention mask: (1 - mask) * -10000, additive over key positions ---
    bias = (1.0 - attention_mask.astype(jnp.float32)) * -10000.0        # [B, S]
    bias = bias[:, None, :]                                             # [B, 1, S]

    for lp in params["layers"]:
        # fused QKV projection, one matmul per layer
        qkv = linear_pallas(x, lp["wqkv"], lp["bqkv"], out_dtype=dt)    # [B*S, 3H]
        ctx = attention_pallas(qkv.reshape(B, S, 3 * H), bias, heads=heads, out_dtype=dt)
        ctx = ctx.reshape(B * S, H)
        # output projection with fused residual-add + LayerNorm epilogue
        x = linear_add_ln_pallas(ctx, lp["wo"], lp["bo"], x,
                                 lp["attn_ln_g"], lp["attn_ln_b"], out_dtype=dt)

        # feed-forward: GELU matmul, then second matmul with fused add+LN epilogue
        inter = linear_pallas(x, lp["w1"], lp["b1"], activation="gelu", out_dtype=dt)
        x = linear_add_ln_pallas(inter, lp["w2"], lp["b2"], x,
                                 lp["ffn_ln_g"], lp["ffn_ln_b"], out_dtype=dt)

    # --- fused pooler (tanh on [CLS]) + classifier head ---
    cls = x.reshape(B, S, H)[:, 0, :]                                   # [B, H]
    logits = pooler_classifier_pallas(cls, params["pool_w"], params["pool_b"],
                                      params["cls_w"], params["cls_b"])  # [B, class_num]
    return logits


# -----------------------------------------------------------------------------
# Main
# -----------------------------------------------------------------------------

if __name__ == "__main__":
    B, S = 2, 16
    HIDDEN, HEADS, INTER, LAYERS = 256, 4, 512, 2   # dh=64 -> grouped attention path (2 groups)
    VOCAB, MAX_POS, TYPE_VOCAB, CLASS_NUM = 128, 32, 2, 2

    key = jax.random.PRNGKey(0)
    k_param, k_ids = jax.random.split(key)

    params = init_params(
        k_param, vocab=VOCAB, max_pos=MAX_POS, type_vocab=TYPE_VOCAB,
        hidden=HIDDEN, heads=HEADS, inter=INTER, layers=LAYERS, class_num=CLASS_NUM,
    )

    input_ids = jax.random.randint(k_ids, (B, S), 0, VOCAB, dtype=jnp.int32)
    # second sequence has 3 padding positions at the end
    attention_mask = jnp.array(
        [[1] * S, [1] * (S - 3) + [0] * 3], dtype=jnp.int32
    )

    fwd = jax.jit(functools.partial(bert_classifier_forward, heads=HEADS))
    logits = fwd(params, input_ids, attention_mask)
    jax.block_until_ready(logits)

    assert logits.shape == (B, CLASS_NUM)
    assert jnp.all(jnp.isfinite(logits))
    print("KERNEL_OK")
</pallas_src>

<mosaic_0001>
module attributes {stable_mosaic.version = 11 : i64} {
  func.func @_ln_kernel(%arg0: i32, %arg1: memref<32x256xbf16, #tpu.memory_space<vmem>>, %arg2: memref<1x256xf32, #tpu.memory_space<vmem>>, %arg3: memref<1x256xf32, #tpu.memory_space<vmem>>, %arg4: memref<32x256xbf16, #tpu.memory_space<vmem>>) attributes {dimension_semantics = [#tpu.dimension_semantics<parallel>], iteration_bounds = array<i64: 1>, scalar_prefetch = 0 : i64, scratch_operands = 0 : i64, tpu.core_type = #tpu.core_type<tc>, window_params = [{transform_indices = @transform_0, window_bounds = array<i64: 32, 256>}, {pipeline_mode = #tpu.pipeline_mode<synchronous>, transform_indices = @transform_1, window_bounds = array<i64: 1, 256>}, {pipeline_mode = #tpu.pipeline_mode<synchronous>, transform_indices = @transform_2, window_bounds = array<i64: 1, 256>}, {transform_indices = @transform_3, window_bounds = array<i64: 32, 256>}]} {
    %c0 = arith.constant 0 : index
    %c0_0 = arith.constant 0 : index
    %0 = vector.load %arg1[%c0, %c0_0] : memref<32x256xbf16, #tpu.memory_space<vmem>>, vector<32x256xbf16>
    %1 = arith.extf %0 : vector<32x256xbf16> to vector<32x256xf32>
    %cst = arith.constant dense<0.000000e+00> : vector<32xf32>
    %2 = vector.multi_reduction <add>, %1, %cst [1] : vector<32x256xf32> to vector<32xf32>
    %3 = vector.shape_cast %2 : vector<32xf32> to vector<32x1xf32>
    %cst_1 = arith.constant 2.560000e+02 : f32
    %4 = vector.broadcast %cst_1 : f32 to vector<32x1xf32>
    %5 = arith.divf %3, %4 : vector<32x1xf32>
    %6 = vector.broadcast %5 : vector<32x1xf32> to vector<32x256xf32>
    %7 = arith.subf %1, %6 : vector<32x256xf32>
    %8 = arith.mulf %7, %7 : vector<32x256xf32>
    %cst_2 = arith.constant dense<0.000000e+00> : vector<32xf32>
    %9 = vector.multi_reduction <add>, %8, %cst_2 [1] : vector<32x256xf32> to vector<32xf32>
    %10 = vector.shape_cast %9 : vector<32xf32> to vector<32x1xf32>
    %cst_3 = arith.constant 2.560000e+02 : f32
    %11 = vector.broadcast %cst_3 : f32 to vector<32x1xf32>
    %12 = arith.divf %10, %11 : vector<32x1xf32>
    %13 = vector.broadcast %5 : vector<32x1xf32> to vector<32x256xf32>
    %14 = arith.subf %1, %13 : vector<32x256xf32>
    %cst_4 = arith.constant 9.99999996E-13 : f32
    %15 = vector.broadcast %cst_4 : f32 to vector<32x1xf32>
    %16 = arith.addf %12, %15 : vector<32x1xf32>
    %17 = math.rsqrt %16 : vector<32x1xf32>
    %18 = vector.broadcast %17 : vector<32x1xf32> to vector<32x256xf32>
    %19 = arith.mulf %14, %18 : vector<32x256xf32>
    %c0_5 = arith.constant 0 : index
    %c0_6 = arith.constant 0 : index
    %20 = vector.load %arg2[%c0_5, %c0_6] : memref<1x256xf32, #tpu.memory_space<vmem>>, vector<1x256xf32>
    %21 = vector.broadcast %20 : vector<1x256xf32> to vector<32x256xf32>
    %22 = arith.mulf %19, %21 : vector<32x256xf32>
    %c0_7 = arith.constant 0 : index
    %c0_8 = arith.constant 0 : index
    %23 = vector.load %arg3[%c0_7, %c0_8] : memref<1x256xf32, #tpu.memory_space<vmem>>, vector<1x256xf32>
    %24 = vector.broadcast %23 : vector<1x256xf32> to vector<32x256xf32>
    %25 = arith.addf %22, %24 : vector<32x256xf32>
    %26 = arith.truncf %25 : vector<32x256xf32> to vector<32x256xbf16>
    %c0_9 = arith.constant 0 : index
    %c0_10 = arith.constant 0 : index
    %27 = vector.load %arg4[%c0_9, %c0_10] : memref<32x256xbf16, #tpu.memory_space<vmem>>, vector<32x256xbf16>
    tpu.vector_store %arg4[%c0_9, %c0_10], %26 {strides = array<i32>} : memref<32x256xbf16, #tpu.memory_space<vmem>>, vector<32x256xbf16>,
    return
  }
  func.func @transform_0(%arg0: i32) -> (i32, i32) {
    %c0_i32 = arith.constant 0 : i32
    %c0_i32_0 = arith.constant 0 : i32
    return %arg0, %c0_i32 : i32, i32
  }
  func.func @transform_1(%arg0: i32) -> (i32, i32) {
    %c0_i32 = arith.constant 0 : i32
    %c0_i32_0 = arith.constant 0 : i32
    %c0_i32_1 = arith.constant 0 : i32
    return %c0_i32, %c0_i32_0 : i32, i32
  }
  func.func @transform_2(%arg0: i32) -> (i32, i32) {
    %c0_i32 = arith.constant 0 : i32
    %c0_i32_0 = arith.constant 0 : i32
    %c0_i32_1 = arith.constant 0 : i32
    return %c0_i32, %c0_i32_0 : i32, i32
  }
  func.func @transform_3(%arg0: i32) -> (i32, i32) {
    %c0_i32 = arith.constant 0 : i32
    %c0_i32_0 = arith.constant 0 : i32
    return %arg0, %c0_i32 : i32, i32
  }
}

module attributes {stable_mosaic.version = 11 : i64} {
  func.func @_matmul_kernel(%arg0: i32, %arg1: i32, %arg2: i32, %arg3: memref<32x256xbf16, #tpu.memory_space<vmem>>, %arg4: memref<256x768xbf16, #tpu.memory_space<vmem>>, %arg5: memref<1x768xf32, #tpu.memory_space<vmem>>, %arg6: memref<32x768xbf16, #tpu.memory_space<vmem>>, %arg7: memref<32x768xf32, #tpu.memory_space<vmem>>) attributes {dimension_semantics = [#tpu.dimension_semantics<parallel>, #tpu.dimension_semantics<parallel>, #tpu.dimension_semantics<arbitrary>], iteration_bounds = array<i64: 1, 1, 1>, scalar_prefetch = 0 : i64, scratch_operands = 1 : i64, tpu.core_type = #tpu.core_type<tc>, window_params = [{transform_indices = @transform_0, window_bounds = array<i64: 32, 256>}, {transform_indices = @transform_1, window_bounds = array<i64: 256, 768>}, {transform_indices = @transform_2, window_bounds = array<i64: 1, 768>}, {transform_indices = @transform_3, window_bounds = array<i64: 32, 768>}]} {
    %c0_i32 = arith.constant 0 : i32
    %0 = arith.cmpi eq, %arg2, %c0_i32 : i32
    %1 = arith.extui %0 : i1 to i32
    %c0_i32_0 = arith.constant 0 : i32
    %2 = arith.cmpi ne, %1, %c0_i32_0 : i32
    scf.if %2 {
      %cst_10 = arith.constant 0.000000e+00 : f32
      %12 = vector.broadcast %cst_10 : f32 to vector<32x768xf32>
      %c0_11 = arith.constant 0 : index
      %c0_12 = arith.constant 0 : index
      %13 = vector.load %arg7[%c0_11, %c0_12] : memref<32x768xf32, #tpu.memory_space<vmem>>, vector<32x768xf32>
      tpu.vector_store %arg7[%c0_11, %c0_12], %12 {strides = array<i32>} : memref<32x768xf32, #tpu.memory_space<vmem>>, vector<32x768xf32>,
    } else {
    }
    %c0 = arith.constant 0 : index
    %c0_1 = arith.constant 0 : index
    %3 = vector.load %arg7[%c0, %c0_1] : memref<32x768xf32, #tpu.memory_space<vmem>>, vector<32x768xf32>
    %c0_2 = arith.constant 0 : index
    %c0_3 = arith.constant 0 : index
    %4 = vector.load %arg3[%c0_2, %c0_3] : memref<32x256xbf16, #tpu.memory_space<vmem>>, vector<32x256xbf16>
    %c0_4 = arith.constant 0 : index
    %c0_5 = arith.constant 0 : index
    %5 = vector.load %arg4[%c0_4, %c0_5] : memref<256x768xbf16, #tpu.memory_space<vmem>>, vector<256x768xbf16>
    %cst = arith.constant dense<0.000000e+00> : vector<32x768xf32>
    %6 = tpu.matmul %4, %5, %cst {dimension_numbers = #tpu.dot_dimension_numbers<[1], [0], [0], [1], [0, 0, 1, 1], [], []>} : vector<32x256xbf16>, vector<256x768xbf16>, vector<32x768xf32> -> vector<32x768xf32>
    %7 = arith.addf %3, %6 : vector<32x768xf32>
    %c0_6 = arith.constant 0 : index
    %c0_7 = arith.constant 0 : index
    %8 = vector.load %arg7[%c0_6, %c0_7] : memref<32x768xf32, #tpu.memory_space<vmem>>, vector<32x768xf32>
    tpu.vector_store %arg7[%c0_6, %c0_7], %7 {strides = array<i32>} : memref<32x768xf32, #tpu.memory_space<vmem>>, vector<32x768xf32>,
    %c0_i32_8 = arith.constant 0 : i32
    %9 = arith.cmpi eq, %arg2, %c0_i32_8 : i32
    %10 = arith.extui %9 : i1 to i32
    %c0_i32_9 = arith.constant 0 : i32
    %11 = arith.cmpi ne, %10, %c0_i32_9 : i32
    scf.if %11 {
      %c0_10 = arith.constant 0 : index
      %c0_11 = arith.constant 0 : index
      %12 = vector.load %arg7[%c0_10, %c0_11] : memref<32x768xf32, #tpu.memory_space<vmem>>, vector<32x768xf32>
      %c0_12 = arith.constant 0 : index
      %c0_13 = arith.constant 0 : index
      %13 = vector.load %arg5[%c0_12, %c0_13] : memref<1x768xf32, #tpu.memory_space<vmem>>, vector<1x768xf32>
      %14 = vector.broadcast %13 : vector<1x768xf32> to vector<32x768xf32>
      %15 = arith.addf %12, %14 : vector<32x768xf32>
      %16 = arith.truncf %15 : vector<32x768xf32> to vector<32x768xbf16>
      %c0_14 = arith.constant 0 : index
      %c0_15 = arith.constant 0 : index
      %17 = vector.load %arg6[%c0_14, %c0_15] : memref<32x768xbf16, #tpu.memory_space<vmem>>, vector<32x768xbf16>
      tpu.vector_store %arg6[%c0_14, %c0_15], %16 {strides = array<i32>} : memref<32x768xbf16, #tpu.memory_space<vmem>>, vector<32x768xbf16>,
    } else {
    }
    return
  }
  func.func @transform_0(%arg0: i32, %arg1: i32, %arg2: i32) -> (i32, i32) {
    %c0_i32 = arith.constant 0 : i32
    return %arg0, %arg2 : i32, i32
  }
  func.func @transform_1(%arg0: i32, %arg1: i32, %arg2: i32) -> (i32, i32) {
    %c0_i32 = arith.constant 0 : i32
    return %arg2, %arg1 : i32, i32
  }
  func.func @transform_2(%arg0: i32, %arg1: i32, %arg2: i32) -> (i32, i32) {
    %c0_i32 = arith.constant 0 : i32
    %c0_i32_0 = arith.constant 0 : i32
    return %c0_i32, %arg1 : i32, i32
  }
  func.func @transform_3(%arg0: i32, %arg1: i32, %arg2: i32) -> (i32, i32) {
    %c0_i32 = arith.constant 0 : i32
    return %arg0, %arg1 : i32, i32
  }
}

module attributes {stable_mosaic.version = 11 : i64} {
  func.func @_attention_kernel(%arg0: i32, %arg1: i32, %arg2: memref<1x16x128xbf16, #tpu.memory_space<vmem>>, %arg3: memref<1x16x128xbf16, #tpu.memory_space<vmem>>, %arg4: memref<1x16x128xbf16, #tpu.memory_space<vmem>>, %arg5: memref<1x1x16xf32, #tpu.memory_space<vmem>>, %arg6: memref<1x16x128xbf16, #tpu.memory_space<vmem>>) attributes {dimension_semantics = [#tpu.dimension_semantics<parallel>, #tpu.dimension_semantics<parallel>], iteration_bounds = array<i64: 2, 2>, scalar_prefetch = 0 : i64, scratch_operands = 0 : i64, tpu.core_type = #tpu.core_type<tc>, window_params = [{transform_indices = @transform_0, window_bounds = array<i64: 1, 16, 128>}, {transform_indices = @transform_1, window_bounds = array<i64: 1, 16, 128>}, {transform_indices = @transform_2, window_bounds = array<i64: 1, 16, 128>}, {transform_indices = @transform_3, window_bounds = array<i64: 1, 1, 16>}, {transform_indices = @transform_4, window_bounds = array<i64: 1, 16, 128>}]} {
    %c0 = arith.constant 0 : index
    %c0_0 = arith.constant 0 : index
    %c0_1 = arith.constant 0 : index
    %0 = vector.load %arg5[%c0, %c0_0, %c0_1] : memref<1x1x16xf32, #tpu.memory_space<vmem>>, vector<1x1x16xf32>
    %1 = vector.shape_cast %0 : vector<1x1x16xf32> to vector<1x16xf32>
    %c0_2 = arith.constant 0 : index
    %c0_3 = arith.constant 0 : index
    %c0_4 = arith.constant 0 : index
    %2 = vector.load %arg2[%c0_2, %c0_3, %c0_4] : memref<1x16x128xbf16, #tpu.memory_space<vmem>>, vector<1x16x128xbf16>
    %3 = vector.shape_cast %2 : vector<1x16x128xbf16> to vector<16x128xbf16>
    %c0_5 = arith.constant 0 : index
    %c0_6 = arith.constant 0 : index
    %c0_7 = arith.constant 0 : index
    %4 = vector.load %arg3[%c0_5, %c0_6, %c0_7] : memref<1x16x128xbf16, #tpu.memory_space<vmem>>, vector<1x16x128xbf16>
    %5 = vector.shape_cast %4 : vector<1x16x128xbf16> to vector<16x128xbf16>
    %c0_8 = arith.constant 0 : index
    %c0_9 = arith.constant 0 : index
    %c0_10 = arith.constant 0 : index
    %6 = vector.load %arg4[%c0_8, %c0_9, %c0_10] : memref<1x16x128xbf16, #tpu.memory_space<vmem>>, vector<1x16x128xbf16>
    %7 = vector.shape_cast %6 : vector<1x16x128xbf16> to vector<16x128xbf16>
    %8 = vector.extract_strided_slice %3 {offsets = [0, 0], sizes = [16, 64], strides = [1, 1]} : vector<16x128xbf16> to vector<16x64xbf16>
    %cst = arith.constant 1.250000e-01 : bf16
    %9 = vector.broadcast %cst : bf16 to vector<16x64xbf16>
    %10 = arith.mulf %8, %9 : vector<16x64xbf16>
    %11 = vector.extract_strided_slice %5 {offsets = [0, 0], sizes = [16, 64], strides = [1, 1]} : vector<16x128xbf16> to vector<16x64xbf16>
    %12 = vector.extract_strided_slice %7 {offsets = [0, 0], sizes = [16, 64], strides = [1, 1]} : vector<16x128xbf16> to vector<16x64xbf16>
    %cst_11 = arith.constant dense<0.000000e+00> : vector<16x16xf32>
    %13 = tpu.matmul %10, %11, %cst_11 {dimension_numbers = #tpu.dot_dimension_numbers<[1], [1], [0], [0], [0, 0, 1, 0], [], []>} : vector<16x64xbf16>, vector<16x64xbf16>, vector<16x16xf32> -> vector<16x16xf32>
    %14 = vector.broadcast %1 : vector<1x16xf32> to vector<16x16xf32>
    %15 = arith.addf %13, %14 : vector<16x16xf32>
    %cst_12 = arith.constant dense<0xFF800000> : vector<16xf32>
    %16 = vector.multi_reduction <maximumf>, %15, %cst_12 [1] : vector<16x16xf32> to vector<16xf32>
    %17 = vector.shape_cast %16 : vector<16xf32> to vector<16x1xf32>
    %18 = vector.broadcast %17 : vector<16x1xf32> to vector<16x16xf32>
    %19 = arith.subf %15, %18 : vector<16x16xf32>
    %20 = math.exp %19 : vector<16x16xf32>
    %cst_13 = arith.constant dense<0.000000e+00> : vector<16xf32>
    %21 = vector.multi_reduction <add>, %20, %cst_13 [1] : vector<16x16xf32> to vector<16xf32>
    %22 = vector.shape_cast %21 : vector<16xf32> to vector<16x1xf32>
    %23 = tpu.reciprocal %22 {approx = true} : vector<16x1xf32> -> vector<16x1xf32>
    %24 = vector.broadcast %23 : vector<16x1xf32> to vector<16x16xf32>
    %25 = arith.mulf %20, %24 : vector<16x16xf32>
    %26 = arith.truncf %25 : vector<16x16xf32> to vector<16x16xbf16>
    %cst_14 = arith.constant dense<0.000000e+00> : vector<16x64xf32>
    %27 = tpu.matmul %26, %12, %cst_14 {dimension_numbers = #tpu.dot_dimension_numbers<[1], [0], [0], [1], [0, 0, 1, 1], [], []>} : vector<16x16xbf16>, vector<16x64xbf16>, vector<16x64xf32> -> vector<16x64xf32>
    %28 = arith.truncf %27 : vector<16x64xf32> to vector<16x64xbf16>
    %c0_15 = arith.constant 0 : index
    %c0_16 = arith.constant 0 : index
    %c0_17 = arith.constant 0 : index
    %29 = vector.load %arg6[%c0_15, %c0_16, %c0_17] : memref<1x16x128xbf16, #tpu.memory_space<vmem>>, vector<1x16x64xbf16>
    %30 = vector.shape_cast %29 : vector<1x16x64xbf16> to vector<16x64xbf16>
    %31 = vector.shape_cast %28 : vector<16x64xbf16> to vector<1x16x64xbf16>
    tpu.vector_store %arg6[%c0_15, %c0_16, %c0_17], %31 {strides = array<i32>} : memref<1x16x128xbf16, #tpu.memory_space<vmem>>, vector<1x16x64xbf16>,
    %32 = vector.extract_strided_slice %3 {offsets = [0, 64], sizes = [16, 64], strides = [1, 1]} : vector<16x128xbf16> to vector<16x64xbf16>
    %cst_18 = arith.constant 1.250000e-01 : bf16
    %33 = vector.broadcast %cst_18 : bf16 to vector<16x64xbf16>
    %34 = arith.mulf %32, %33 : vector<16x64xbf16>
    %35 = vector.extract_strided_slice %5 {offsets = [0, 64], sizes = [16, 64], strides = [1, 1]} : vector<16x128xbf16> to vector<16x64xbf16>
    %36 = vector.extract_strided_slice %7 {offsets = [0, 64], sizes = [16, 64], strides = [1, 1]} : vector<16x128xbf16> to vector<16x64xbf16>
    %cst_19 = arith.constant dense<0.000000e+00> : vector<16x16xf32>
    %37 = tpu.matmul %34, %35, %cst_19 {dimension_numbers = #tpu.dot_dimension_numbers<[1], [1], [0], [0], [0, 0, 1, 0], [], []>} : vector<16x64xbf16>, vector<16x64xbf16>, vector<16x16xf32> -> vector<16x16xf32>
    %38 = vector.broadcast %1 : vector<1x16xf32> to vector<16x16xf32>
    %39 = arith.addf %37, %38 : vector<16x16xf32>
    %cst_20 = arith.constant dense<0xFF800000> : vector<16xf32>
    %40 = vector.multi_reduction <maximumf>, %39, %cst_20 [1] : vector<16x16xf32> to vector<16xf32>
    %41 = vector.shape_cast %40 : vector<16xf32> to vector<16x1xf32>
    %42 = vector.broadcast %41 : vector<16x1xf32> to vector<16x16xf32>
    %43 = arith.subf %39, %42 : vector<16x16xf32>
    %44 = math.exp %43 : vector<16x16xf32>
    %cst_21 = arith.constant dense<0.000000e+00> : vector<16xf32>
    %45 = vector.multi_reduction <add>, %44, %cst_21 [1] : vector<16x16xf32> to vector<16xf32>
    %46 = vector.shape_cast %45 : vector<16xf32> to vector<16x1xf32>
    %47 = tpu.reciprocal %46 {approx = true} : vector<16x1xf32> -> vector<16x1xf32>
    %48 = vector.broadcast %47 : vector<16x1xf32> to vector<16x16xf32>
    %49 = arith.mulf %44, %48 : vector<16x16xf32>
    %50 = arith.truncf %49 : vector<16x16xf32> to vector<16x16xbf16>
    %cst_22 = arith.constant dense<0.000000e+00> : vector<16x64xf32>
    %51 = tpu.matmul %50, %36, %cst_22 {dimension_numbers = #tpu.dot_dimension_numbers<[1], [0], [0], [1], [0, 0, 1, 1], [], []>} : vector<16x16xbf16>, vector<16x64xbf16>, vector<16x64xf32> -> vector<16x64xf32>
    %52 = arith.truncf %51 : vector<16x64xf32> to vector<16x64xbf16>
    %c0_23 = arith.constant 0 : index
    %c0_24 = arith.constant 0 : index
    %c64 = arith.constant 64 : index
    %53 = vector.load %arg6[%c0_23, %c0_24, %c64] : memref<1x16x128xbf16, #tpu.memory_space<vmem>>, vector<1x16x64xbf16>
    %54 = vector.shape_cast %53 : vector<1x16x64xbf16> to vector<16x64xbf16>
    %55 = vector.shape_cast %52 : vector<16x64xbf16> to vector<1x16x64xbf16>
    tpu.vector_store %arg6[%c0_23, %c0_24, %c64], %55 {strides = array<i32>} : memref<1x16x128xbf16, #tpu.memory_space<vmem>>, vector<1x16x64xbf16>,
    return
  }
  func.func @transform_0(%arg0: i32, %arg1: i32) -> (i32, i32, i32) {
    %c0_i32 = arith.constant 0 : i32
    %c0_i32_0 = arith.constant 0 : i32
    return %arg0, %c0_i32, %arg1 : i32, i32, i32
  }
  func.func @transform_1(%arg0: i32, %arg1: i32) -> (i32, i32, i32) {
    %c2_i32 = arith.constant 2 : i32
    %0 = arith.addi %c2_i32, %arg1 : i32
    %c0_i32 = arith.constant 0 : i32
    %c0_i32_0 = arith.constant 0 : i32
    return %arg0, %c0_i32, %0 : i32, i32, i32
  }
  func.func @transform_2(%arg0: i32, %arg1: i32) -> (i32, i32, i32) {
    %c4_i32 = arith.constant 4 : i32
    %0 = arith.addi %c4_i32, %arg1 : i32
    %c0_i32 = arith.constant 0 : i32
    %c0_i32_0 = arith.constant 0 : i32
    return %arg0, %c0_i32, %0 : i32, i32, i32
  }
  func.func @transform_3(%arg0: i32, %arg1: i32) -> (i32, i32, i32) {
    %c0_i32 = arith.constant 0 : i32
    %c0_i32_0 = arith.constant 0 : i32
    %c0_i32_1 = arith.constant 0 : i32
    return %arg0, %c0_i32, %c0_i32_0 : i32, i32, i32
  }
  func.func @transform_4(%arg0: i32, %arg1: i32) -> (i32, i32, i32) {
    %c0_i32 = arith.constant 0 : i32
    %c0_i32_0 = arith.constant 0 : i32
    return %arg0, %c0_i32, %arg1 : i32, i32, i32
  }
}

module attributes {stable_mosaic.version = 11 : i64} {
  func.func @_matmul_add_ln_kernel(%arg0: i32, %arg1: i32, %arg2: memref<32x256xbf16, #tpu.memory_space<vmem>>, %arg3: memref<256x256xbf16, #tpu.memory_space<vmem>>, %arg4: memref<1x256xf32, #tpu.memory_space<vmem>>, %arg5: memref<32x256xbf16, #tpu.memory_space<vmem>>, %arg6: memref<1x256xf32, #tpu.memory_space<vmem>>, %arg7: memref<1x256xf32, #tpu.memory_space<vmem>>, %arg8: memref<32x256xbf16, #tpu.memory_space<vmem>>, %arg9: memref<32x256xf32, #tpu.memory_space<vmem>>) attributes {dimension_semantics = [#tpu.dimension_semantics<parallel>, #tpu.dimension_semantics<arbitrary>], iteration_bounds = array<i64: 1, 1>, scalar_prefetch = 0 : i64, scratch_operands = 1 : i64, tpu.core_type = #tpu.core_type<tc>, window_params = [{transform_indices = @transform_0, window_bounds = array<i64: 32, 256>}, {transform_indices = @transform_1, window_bounds = array<i64: 256, 256>}, {pipeline_mode = #tpu.pipeline_mode<synchronous>, transform_indices = @transform_2, window_bounds = array<i64: 1, 256>}, {transform_indices = @transform_3, window_bounds = array<i64: 32, 256>}, {pipeline_mode = #tpu.pipeline_mode<synchronous>, transform_indices = @transform_4, window_bounds = array<i64: 1, 256>}, {pipeline_mode = #tpu.pipeline_mode<synchronous>, transform_indices = @transform_5, window_bounds = array<i64: 1, 256>}, {transform_indices = @transform_6, window_bounds = array<i64: 32, 256>}]} {
    %c0_i32 = arith.constant 0 : i32
    %0 = arith.cmpi eq, %arg1, %c0_i32 : i32
    %1 = arith.extui %0 : i1 to i32
    %c0_i32_0 = arith.constant 0 : i32
    %2 = arith.cmpi ne, %1, %c0_i32_0 : i32
    scf.if %2 {
      %cst_10 = arith.constant 0.000000e+00 : f32
      %12 = vector.broadcast %cst_10 : f32 to vector<32x256xf32>
      %c0_11 = arith.constant 0 : index
      %c0_12 = arith.constant 0 : index
      %13 = vector.load %arg9[%c0_11, %c0_12] : memref<32x256xf32, #tpu.memory_space<vmem>>, vector<32x256xf32>
      tpu.vector_store %arg9[%c0_11, %c0_12], %12 {strides = array<i32>} : memref<32x256xf32, #tpu.memory_space<vmem>>, vector<32x256xf32>,
    } else {
    }
    %c0 = arith.constant 0 : index
    %c0_1 = arith.constant 0 : index
    %3 = vector.load %arg9[%c0, %c0_1] : memref<32x256xf32, #tpu.memory_space<vmem>>, vector<32x256xf32>
    %c0_2 = arith.constant 0 : index
    %c0_3 = arith.constant 0 : index
    %4 = vector.load %arg2[%c0_2, %c0_3] : memref<32x256xbf16, #tpu.memory_space<vmem>>, vector<32x256xbf16>
    %c0_4 = arith.constant 0 : index
    %c0_5 = arith.constant 0 : index
    %5 = vector.load %arg3[%c0_4, %c0_5] : memref<256x256xbf16, #tpu.memory_space<vmem>>, vector<256x256xbf16>
    %cst = arith.constant dense<0.000000e+00> : vector<32x256xf32>
    %6 = tpu.matmul %4, %5, %cst {dimension_numbers = #tpu.dot_dimension_numbers<[1], [0], [0], [1], [0, 0, 1, 1], [], []>} : vector<32x256xbf16>, vector<256x256xbf16>, vector<32x256xf32> -> vector<32x256xf32>
    %7 = arith.addf %3, %6 : vector<32x256xf32>
    %c0_6 = arith.constant 0 : index
    %c0_7 = arith.constant 0 : index
    %8 = vector.load %arg9[%c0_6, %c0_7] : memref<32x256xf32, #tpu.memory_space<vmem>>, vector<32x256xf32>
    tpu.vector_store %arg9[%c0_6, %c0_7], %7 {strides = array<i32>} : memref<32x256xf32, #tpu.memory_space<vmem>>, vector<32x256xf32>,
    %c0_i32_8 = arith.constant 0 : i32
    %9 = arith.cmpi eq, %arg1, %c0_i32_8 : i32
    %10 = arith.extui %9 : i1 to i32
    %c0_i32_9 = arith.constant 0 : i32
    %11 = arith.cmpi ne, %10, %c0_i32_9 : i32
    scf.if %11 {
      %c0_10 = arith.constant 0 : index
      %c0_11 = arith.constant 0 : index
      %12 = vector.load %arg9[%c0_10, %c0_11] : memref<32x256xf32, #tpu.memory_space<vmem>>, vector<32x256xf32>
      %c0_12 = arith.constant 0 : index
      %c0_13 = arith.constant 0 : index
      %13 = vector.load %arg4[%c0_12, %c0_13] : memref<1x256xf32, #tpu.memory_space<vmem>>, vector<1x256xf32>
      %14 = vector.broadcast %13 : vector<1x256xf32> to vector<32x256xf32>
      %15 = arith.addf %12, %14 : vector<32x256xf32>
      %c0_14 = arith.constant 0 : index
      %c0_15 = arith.constant 0 : index
      %16 = vector.load %arg5[%c0_14, %c0_15] : memref<32x256xbf16, #tpu.memory_space<vmem>>, vector<32x256xbf16>
      %17 = arith.extf %16 : vector<32x256xbf16> to vector<32x256xf32>
      %18 = arith.addf %15, %17 : vector<32x256xf32>
      %cst_16 = arith.constant dense<0.000000e+00> : vector<32xf32>
      %19 = vector.multi_reduction <add>, %18, %cst_16 [1] : vector<32x256xf32> to vector<32xf32>
      %20 = vector.shape_cast %19 : vector<32xf32> to vector<32x1xf32>
      %cst_17 = arith.constant 2.560000e+02 : f32
      %21 = vector.broadcast %cst_17 : f32 to vector<32x1xf32>
      %22 = arith.divf %20, %21 : vector<32x1xf32>
      %23 = vector.broadcast %22 : vector<32x1xf32> to vector<32x256xf32>
      %24 = arith.subf %18, %23 : vector<32x256xf32>
      %25 = arith.mulf %24, %24 : vector<32x256xf32>
      %cst_18 = arith.constant dense<0.000000e+00> : vector<32xf32>
      %26 = vector.multi_reduction <add>, %25, %cst_18 [1] : vector<32x256xf32> to vector<32xf32>
      %27 = vector.shape_cast %26 : vector<32xf32> to vector<32x1xf32>
      %cst_19 = arith.constant 2.560000e+02 : f32
      %28 = vector.broadcast %cst_19 : f32 to vector<32x1xf32>
      %29 = arith.divf %27, %28 : vector<32x1xf32>
      %30 = vector.broadcast %22 : vector<32x1xf32> to vector<32x256xf32>
      %31 = arith.subf %18, %30 : vector<32x256xf32>
      %cst_20 = arith.constant 9.99999996E-13 : f32
      %32 = vector.broadcast %cst_20 : f32 to vector<32x1xf32>
      %33 = arith.addf %29, %32 : vector<32x1xf32>
      %34 = math.rsqrt %33 : vector<32x1xf32>
      %35 = vector.broadcast %34 : vector<32x1xf32> to vector<32x256xf32>
      %36 = arith.mulf %31, %35 : vector<32x256xf32>
      %c0_21 = arith.constant 0 : index
      %c0_22 = arith.constant 0 : index
      %37 = vector.load %arg6[%c0_21, %c0_22] : memref<1x256xf32, #tpu.memory_space<vmem>>, vector<1x256xf32>
      %38 = vector.broadcast %37 : vector<1x256xf32> to vector<32x256xf32>
      %39 = arith.mulf %36, %38 : vector<32x256xf32>
      %c0_23 = arith.constant 0 : index
      %c0_24 = arith.constant 0 : index
      %40 = vector.load %arg7[%c0_23, %c0_24] : memref<1x256xf32, #tpu.memory_space<vmem>>, vector<1x256xf32>
      %41 = vector.broadcast %40 : vector<1x256xf32> to vector<32x256xf32>
      %42 = arith.addf %39, %41 : vector<32x256xf32>
      %43 = arith.truncf %42 : vector<32x256xf32> to vector<32x256xbf16>
      %c0_25 = arith.constant 0 : index
      %c0_26 = arith.constant 0 : index
      %44 = vector.load %arg8[%c0_25, %c0_26] : memref<32x256xbf16, #tpu.memory_space<vmem>>, vector<32x256xbf16>
      tpu.vector_store %arg8[%c0_25, %c0_26], %43 {strides = array<i32>} : memref<32x256xbf16, #tpu.memory_space<vmem>>, vector<32x256xbf16>,
    } else {
    }
    return
  }
  func.func @transform_0(%arg0: i32, %arg1: i32) -> (i32, i32) {
    %c0_i32 = arith.constant 0 : i32
    return %arg0, %arg1 : i32, i32
  }
  func.func @transform_1(%arg0: i32, %arg1: i32) -> (i32, i32) {
    %c0_i32 = arith.constant 0 : i32
    %c0_i32_0 = arith.constant 0 : i32
    return %arg1, %c0_i32 : i32, i32
  }
  func.func @transform_2(%arg0: i32, %arg1: i32) -> (i32, i32) {
    %c0_i32 = arith.constant 0 : i32
    %c0_i32_0 = arith.constant 0 : i32
    %c0_i32_1 = arith.constant 0 : i32
    return %c0_i32, %c0_i32_0 : i32, i32
  }
  func.func @transform_3(%arg0: i32, %arg1: i32) -> (i32, i32) {
    %c0_i32 = arith.constant 0 : i32
    %c0_i32_0 = arith.constant 0 : i32
    return %arg0, %c0_i32 : i32, i32
  }
  func.func @transform_4(%arg0: i32, %arg1: i32) -> (i32, i32) {
    %c0_i32 = arith.constant 0 : i32
    %c0_i32_0 = arith.constant 0 : i32
    %c0_i32_1 = arith.constant 0 : i32
    return %c0_i32, %c0_i32_0 : i32, i32
  }
  func.func @transform_5(%arg0: i32, %arg1: i32) -> (i32, i32) {
    %c0_i32 = arith.constant 0 : i32
    %c0_i32_0 = arith.constant 0 : i32
    %c0_i32_1 = arith.constant 0 : i32
    return %c0_i32, %c0_i32_0 : i32, i32
  }
  func.func @transform_6(%arg0: i32, %arg1: i32) -> (i32, i32) {
    %c0_i32 = arith.constant 0 : i32
    %c0_i32_0 = arith.constant 0 : i32
    return %arg0, %c0_i32 : i32, i32
  }
}

module attributes {stable_mosaic.version = 11 : i64} {
  func.func @_matmul_kernel(%arg0: i32, %arg1: i32, %arg2: i32, %arg3: memref<32x256xbf16, #tpu.memory_space<vmem>>, %arg4: memref<256x512xbf16, #tpu.memory_space<vmem>>, %arg5: memref<1x512xf32, #tpu.memory_space<vmem>>, %arg6: memref<32x512xbf16, #tpu.memory_space<vmem>>, %arg7: memref<32x512xf32, #tpu.memory_space<vmem>>) attributes {dimension_semantics = [#tpu.dimension_semantics<parallel>, #tpu.dimension_semantics<parallel>, #tpu.dimension_semantics<arbitrary>], iteration_bounds = array<i64: 1, 1, 1>, scalar_prefetch = 0 : i64, scratch_operands = 1 : i64, tpu.core_type = #tpu.core_type<tc>, window_params = [{transform_indices = @transform_0, window_bounds = array<i64: 32, 256>}, {transform_indices = @transform_1, window_bounds = array<i64: 256, 512>}, {transform_indices = @transform_2, window_bounds = array<i64: 1, 512>}, {transform_indices = @transform_3, window_bounds = array<i64: 32, 512>}]} {
    %c0_i32 = arith.constant 0 : i32
    %0 = arith.cmpi eq, %arg2, %c0_i32 : i32
    %1 = arith.extui %0 : i1 to i32
    %c0_i32_0 = arith.constant 0 : i32
    %2 = arith.cmpi ne, %1, %c0_i32_0 : i32
    scf.if %2 {
      %cst_10 = arith.constant 0.000000e+00 : f32
      %12 = vector.broadcast %cst_10 : f32 to vector<32x512xf32>
      %c0_11 = arith.constant 0 : index
      %c0_12 = arith.constant 0 : index
      %13 = vector.load %arg7[%c0_11, %c0_12] : memref<32x512xf32, #tpu.memory_space<vmem>>, vector<32x512xf32>
      tpu.vector_store %arg7[%c0_11, %c0_12], %12 {strides = array<i32>} : memref<32x512xf32, #tpu.memory_space<vmem>>, vector<32x512xf32>,
    } else {
    }
    %c0 = arith.constant 0 : index
    %c0_1 = arith.constant 0 : index
    %3 = vector.load %arg7[%c0, %c0_1] : memref<32x512xf32, #tpu.memory_space<vmem>>, vector<32x512xf32>
    %c0_2 = arith.constant 0 : index
    %c0_3 = arith.constant 0 : index
    %4 = vector.load %arg3[%c0_2, %c0_3] : memref<32x256xbf16, #tpu.memory_space<vmem>>, vector<32x256xbf16>
    %c0_4 = arith.constant 0 : index
    %c0_5 = arith.constant 0 : index
    %5 = vector.load %arg4[%c0_4, %c0_5] : memref<256x512xbf16, #tpu.memory_space<vmem>>, vector<256x512xbf16>
    %cst = arith.constant dense<0.000000e+00> : vector<32x512xf32>
    %6 = tpu.matmul %4, %5, %cst {dimension_numbers = #tpu.dot_dimension_numbers<[1], [0], [0], [1], [0, 0, 1, 1], [], []>} : vector<32x256xbf16>, vector<256x512xbf16>, vector<32x512xf32> -> vector<32x512xf32>
    %7 = arith.addf %3, %6 : vector<32x512xf32>
    %c0_6 = arith.constant 0 : index
    %c0_7 = arith.constant 0 : index
    %8 = vector.load %arg7[%c0_6, %c0_7] : memref<32x512xf32, #tpu.memory_space<vmem>>, vector<32x512xf32>
    tpu.vector_store %arg7[%c0_6, %c0_7], %7 {strides = array<i32>} : memref<32x512xf32, #tpu.memory_space<vmem>>, vector<32x512xf32>,
    %c0_i32_8 = arith.constant 0 : i32
    %9 = arith.cmpi eq, %arg2, %c0_i32_8 : i32
    %10 = arith.extui %9 : i1 to i32
    %c0_i32_9 = arith.constant 0 : i32
    %11 = arith.cmpi ne, %10, %c0_i32_9 : i32
    scf.if %11 {
      %c0_10 = arith.constant 0 : index
      %c0_11 = arith.constant 0 : index
      %12 = vector.load %arg7[%c0_10, %c0_11] : memref<32x512xf32, #tpu.memory_space<vmem>>, vector<32x512xf32>
      %c0_12 = arith.constant 0 : index
      %c0_13 = arith.constant 0 : index
      %13 = vector.load %arg5[%c0_12, %c0_13] : memref<1x512xf32, #tpu.memory_space<vmem>>, vector<1x512xf32>
      %14 = vector.broadcast %13 : vector<1x512xf32> to vector<32x512xf32>
      %15 = arith.addf %12, %14 : vector<32x512xf32>
      %cst_14 = arith.constant 5.000000e-01 : f32
      %16 = vector.broadcast %cst_14 : f32 to vector<32x512xf32>
      %17 = arith.mulf %16, %15 : vector<32x512xf32>
      %cst_15 = arith.constant 0.707106769 : f32
      %18 = vector.broadcast %cst_15 : f32 to vector<32x512xf32>
      %19 = arith.mulf %15, %18 : vector<32x512xf32>
      %20 = math.erf %19 : vector<32x512xf32>
      %cst_16 = arith.constant 1.000000e+00 : f32
      %21 = vector.broadcast %cst_16 : f32 to vector<32x512xf32>
      %22 = arith.addf %21, %20 : vector<32x512xf32>
      %23 = arith.mulf %17, %22 : vector<32x512xf32>
      %24 = arith.truncf %23 : vector<32x512xf32> to vector<32x512xbf16>
      %c0_17 = arith.constant 0 : index
      %c0_18 = arith.constant 0 : index
      %25 = vector.load %arg6[%c0_17, %c0_18] : memref<32x512xbf16, #tpu.memory_space<vmem>>, vector<32x512xbf16>
      tpu.vector_store %arg6[%c0_17, %c0_18], %24 {strides = array<i32>} : memref<32x512xbf16, #tpu.memory_space<vmem>>, vector<32x512xbf16>,
    } else {
    }
    return
  }
  func.func @transform_0(%arg0: i32, %arg1: i32, %arg2: i32) -> (i32, i32) {
    %c0_i32 = arith.constant 0 : i32
    return %arg0, %arg2 : i32, i32
  }
  func.func @transform_1(%arg0: i32, %arg1: i32, %arg2: i32) -> (i32, i32) {
    %c0_i32 = arith.constant 0 : i32
    return %arg2, %arg1 : i32, i32
  }
  func.func @transform_2(%arg0: i32, %arg1: i32, %arg2: i32) -> (i32, i32) {
    %c0_i32 = arith.constant 0 : i32
    %c0_i32_0 = arith.constant 0 : i32
    return %c0_i32, %arg1 : i32, i32
  }
  func.func @transform_3(%arg0: i32, %arg1: i32, %arg2: i32) -> (i32, i32) {
    %c0_i32 = arith.constant 0 : i32
    return %arg0, %arg1 : i32, i32
  }
}

module attributes {stable_mosaic.version = 11 : i64} {
  func.func @_matmul_add_ln_kernel(%arg0: i32, %arg1: i32, %arg2: memref<32x512xbf16, #tpu.memory_space<vmem>>, %arg3: memref<512x256xbf16, #tpu.memory_space<vmem>>, %arg4: memref<1x256xf32, #tpu.memory_space<vmem>>, %arg5: memref<32x256xbf16, #tpu.memory_space<vmem>>, %arg6: memref<1x256xf32, #tpu.memory_space<vmem>>, %arg7: memref<1x256xf32, #tpu.memory_space<vmem>>, %arg8: memref<32x256xbf16, #tpu.memory_space<vmem>>, %arg9: memref<32x256xf32, #tpu.memory_space<vmem>>) attributes {dimension_semantics = [#tpu.dimension_semantics<parallel>, #tpu.dimension_semantics<arbitrary>], iteration_bounds = array<i64: 1, 1>, scalar_prefetch = 0 : i64, scratch_operands = 1 : i64, tpu.core_type = #tpu.core_type<tc>, window_params = [{transform_indices = @transform_0, window_bounds = array<i64: 32, 512>}, {transform_indices = @transform_1, window_bounds = array<i64: 512, 256>}, {pipeline_mode = #tpu.pipeline_mode<synchronous>, transform_indices = @transform_2, window_bounds = array<i64: 1, 256>}, {transform_indices = @transform_3, window_bounds = array<i64: 32, 256>}, {pipeline_mode = #tpu.pipeline_mode<synchronous>, transform_indices = @transform_4, window_bounds = array<i64: 1, 256>}, {pipeline_mode = #tpu.pipeline_mode<synchronous>, transform_indices = @transform_5, window_bounds = array<i64: 1, 256>}, {transform_indices = @transform_6, window_bounds = array<i64: 32, 256>}]} {
    %c0_i32 = arith.constant 0 : i32
    %0 = arith.cmpi eq, %arg1, %c0_i32 : i32
    %1 = arith.extui %0 : i1 to i32
    %c0_i32_0 = arith.constant 0 : i32
    %2 = arith.cmpi ne, %1, %c0_i32_0 : i32
    scf.if %2 {
      %cst_10 = arith.constant 0.000000e+00 : f32
      %12 = vector.broadcast %cst_10 : f32 to vector<32x256xf32>
      %c0_11 = arith.constant 0 : index
      %c0_12 = arith.constant 0 : index
      %13 = vector.load %arg9[%c0_11, %c0_12] : memref<32x256xf32, #tpu.memory_space<vmem>>, vector<32x256xf32>
      tpu.vector_store %arg9[%c0_11, %c0_12], %12 {strides = array<i32>} : memref<32x256xf32, #tpu.memory_space<vmem>>, vector<32x256xf32>,
    } else {
    }
    %c0 = arith.constant 0 : index
    %c0_1 = arith.constant 0 : index
    %3 = vector.load %arg9[%c0, %c0_1] : memref<32x256xf32, #tpu.memory_space<vmem>>, vector<32x256xf32>
    %c0_2 = arith.constant 0 : index
    %c0_3 = arith.constant 0 : index
    %4 = vector.load %arg2[%c0_2, %c0_3] : memref<32x512xbf16, #tpu.memory_space<vmem>>, vector<32x512xbf16>
    %c0_4 = arith.constant 0 : index
    %c0_5 = arith.constant 0 : index
    %5 = vector.load %arg3[%c0_4, %c0_5] : memref<512x256xbf16, #tpu.memory_space<vmem>>, vector<512x256xbf16>
    %cst = arith.constant dense<0.000000e+00> : vector<32x256xf32>
    %6 = tpu.matmul %4, %5, %cst {dimension_numbers = #tpu.dot_dimension_numbers<[1], [0], [0], [1], [0, 0, 1, 1], [], []>} : vector<32x512xbf16>, vector<512x256xbf16>, vector<32x256xf32> -> vector<32x256xf32>
    %7 = arith.addf %3, %6 : vector<32x256xf32>
    %c0_6 = arith.constant 0 : index
    %c0_7 = arith.constant 0 : index
    %8 = vector.load %arg9[%c0_6, %c0_7] : memref<32x256xf32, #tpu.memory_space<vmem>>, vector<32x256xf32>
    tpu.vector_store %arg9[%c0_6, %c0_7], %7 {strides = array<i32>} : memref<32x256xf32, #tpu.memory_space<vmem>>, vector<32x256xf32>,
    %c0_i32_8 = arith.constant 0 : i32
    %9 = arith.cmpi eq, %arg1, %c0_i32_8 : i32
    %10 = arith.extui %9 : i1 to i32
    %c0_i32_9 = arith.constant 0 : i32
    %11 = arith.cmpi ne, %10, %c0_i32_9 : i32
    scf.if %11 {
      %c0_10 = arith.constant 0 : index
      %c0_11 = arith.constant 0 : index
      %12 = vector.load %arg9[%c0_10, %c0_11] : memref<32x256xf32, #tpu.memory_space<vmem>>, vector<32x256xf32>
      %c0_12 = arith.constant 0 : index
      %c0_13 = arith.constant 0 : index
      %13 = vector.load %arg4[%c0_12, %c0_13] : memref<1x256xf32, #tpu.memory_space<vmem>>, vector<1x256xf32>
      %14 = vector.broadcast %13 : vector<1x256xf32> to vector<32x256xf32>
      %15 = arith.addf %12, %14 : vector<32x256xf32>
      %c0_14 = arith.constant 0 : index
      %c0_15 = arith.constant 0 : index
      %16 = vector.load %arg5[%c0_14, %c0_15] : memref<32x256xbf16, #tpu.memory_space<vmem>>, vector<32x256xbf16>
      %17 = arith.extf %16 : vector<32x256xbf16> to vector<32x256xf32>
      %18 = arith.addf %15, %17 : vector<32x256xf32>
      %cst_16 = arith.constant dense<0.000000e+00> : vector<32xf32>
      %19 = vector.multi_reduction <add>, %18, %cst_16 [1] : vector<32x256xf32> to vector<32xf32>
      %20 = vector.shape_cast %19 : vector<32xf32> to vector<32x1xf32>
      %cst_17 = arith.constant 2.560000e+02 : f32
      %21 = vector.broadcast %cst_17 : f32 to vector<32x1xf32>
      %22 = arith.divf %20, %21 : vector<32x1xf32>
      %23 = vector.broadcast %22 : vector<32x1xf32> to vector<32x256xf32>
      %24 = arith.subf %18, %23 : vector<32x256xf32>
      %25 = arith.mulf %24, %24 : vector<32x256xf32>
      %cst_18 = arith.constant dense<0.000000e+00> : vector<32xf32>
      %26 = vector.multi_reduction <add>, %25, %cst_18 [1] : vector<32x256xf32> to vector<32xf32>
      %27 = vector.shape_cast %26 : vector<32xf32> to vector<32x1xf32>
      %cst_19 = arith.constant 2.560000e+02 : f32
      %28 = vector.broadcast %cst_19 : f32 to vector<32x1xf32>
      %29 = arith.divf %27, %28 : vector<32x1xf32>
      %30 = vector.broadcast %22 : vector<32x1xf32> to vector<32x256xf32>
      %31 = arith.subf %18, %30 : vector<32x256xf32>
      %cst_20 = arith.constant 9.99999996E-13 : f32
      %32 = vector.broadcast %cst_20 : f32 to vector<32x1xf32>
      %33 = arith.addf %29, %32 : vector<32x1xf32>
      %34 = math.rsqrt %33 : vector<32x1xf32>
      %35 = vector.broadcast %34 : vector<32x1xf32> to vector<32x256xf32>
      %36 = arith.mulf %31, %35 : vector<32x256xf32>
      %c0_21 = arith.constant 0 : index
      %c0_22 = arith.constant 0 : index
      %37 = vector.load %arg6[%c0_21, %c0_22] : memref<1x256xf32, #tpu.memory_space<vmem>>, vector<1x256xf32>
      %38 = vector.broadcast %37 : vector<1x256xf32> to vector<32x256xf32>
      %39 = arith.mulf %36, %38 : vector<32x256xf32>
      %c0_23 = arith.constant 0 : index
      %c0_24 = arith.constant 0 : index
      %40 = vector.load %arg7[%c0_23, %c0_24] : memref<1x256xf32, #tpu.memory_space<vmem>>, vector<1x256xf32>
      %41 = vector.broadcast %40 : vector<1x256xf32> to vector<32x256xf32>
      %42 = arith.addf %39, %41 : vector<32x256xf32>
      %43 = arith.truncf %42 : vector<32x256xf32> to vector<32x256xbf16>
      %c0_25 = arith.constant 0 : index
      %c0_26 = arith.constant 0 : index
      %44 = vector.load %arg8[%c0_25, %c0_26] : memref<32x256xbf16, #tpu.memory_space<vmem>>, vector<32x256xbf16>
      tpu.vector_store %arg8[%c0_25, %c0_26], %43 {strides = array<i32>} : memref<32x256xbf16, #tpu.memory_space<vmem>>, vector<32x256xbf16>,
    } else {
    }
    return
  }
  func.func @transform_0(%arg0: i32, %arg1: i32) -> (i32, i32) {
    %c0_i32 = arith.constant 0 : i32
    return %arg0, %arg1 : i32, i32
  }
  func.func @transform_1(%arg0: i32, %arg1: i32) -> (i32, i32) {
    %c0_i32 = arith.constant 0 : i32
    %c0_i32_0 = arith.constant 0 : i32
    return %arg1, %c0_i32 : i32, i32
  }
  func.func @transform_2(%arg0: i32, %arg1: i32) -> (i32, i32) {
    %c0_i32 = arith.constant 0 : i32
    %c0_i32_0 = arith.constant 0 : i32
    %c0_i32_1 = arith.constant 0 : i32
    return %c0_i32, %c0_i32_0 : i32, i32
  }
  func.func @transform_3(%arg0: i32, %arg1: i32) -> (i32, i32) {
    %c0_i32 = arith.constant 0 : i32
    %c0_i32_0 = arith.constant 0 : i32
    return %arg0, %c0_i32 : i32, i32
  }
  func.func @transform_4(%arg0: i32, %arg1: i32) -> (i32, i32) {
    %c0_i32 = arith.constant 0 : i32
    %c0_i32_0 = arith.constant 0 : i32
    %c0_i32_1 = arith.constant 0 : i32
    return %c0_i32, %c0_i32_0 : i32, i32
  }
  func.func @transform_5(%arg0: i32, %arg1: i32) -> (i32, i32) {
    %c0_i32 = arith.constant 0 : i32
    %c0_i32_0 = arith.constant 0 : i32
    %c0_i32_1 = arith.constant 0 : i32
    return %c0_i32, %c0_i32_0 : i32, i32
  }
  func.func @transform_6(%arg0: i32, %arg1: i32) -> (i32, i32) {
    %c0_i32 = arith.constant 0 : i32
    %c0_i32_0 = arith.constant 0 : i32
    return %arg0, %c0_i32 : i32, i32
  }
}

module attributes {stable_mosaic.version = 11 : i64} {
  func.func @_matmul_kernel(%arg0: i32, %arg1: i32, %arg2: i32, %arg3: memref<32x256xbf16, #tpu.memory_space<vmem>>, %arg4: memref<256x768xbf16, #tpu.memory_space<vmem>>, %arg5: memref<1x768xf32, #tpu.memory_space<vmem>>, %arg6: memref<32x768xbf16, #tpu.memory_space<vmem>>, %arg7: memref<32x768xf32, #tpu.memory_space<vmem>>) attributes {dimension_semantics = [#tpu.dimension_semantics<parallel>, #tpu.dimension_semantics<parallel>, #tpu.dimension_semantics<arbitrary>], iteration_bounds = array<i64: 1, 1, 1>, scalar_prefetch = 0 : i64, scratch_operands = 1 : i64, tpu.core_type = #tpu.core_type<tc>, window_params = [{transform_indices = @transform_0, window_bounds = array<i64: 32, 256>}, {transform_indices = @transform_1, window_bounds = array<i64: 256, 768>}, {transform_indices = @transform_2, window_bounds = array<i64: 1, 768>}, {transform_indices = @transform_3, window_bounds = array<i64: 32, 768>}]} {
    %c0_i32 = arith.constant 0 : i32
    %0 = arith.cmpi eq, %arg2, %c0_i32 : i32
    %1 = arith.extui %0 : i1 to i32
    %c0_i32_0 = arith.constant 0 : i32
    %2 = arith.cmpi ne, %1, %c0_i32_0 : i32
    scf.if %2 {
      %cst_10 = arith.constant 0.000000e+00 : f32
      %12 = vector.broadcast %cst_10 : f32 to vector<32x768xf32>
      %c0_11 = arith.constant 0 : index
      %c0_12 = arith.constant 0 : index
      %13 = vector.load %arg7[%c0_11, %c0_12] : memref<32x768xf32, #tpu.memory_space<vmem>>, vector<32x768xf32>
      tpu.vector_store %arg7[%c0_11, %c0_12], %12 {strides = array<i32>} : memref<32x768xf32, #tpu.memory_space<vmem>>, vector<32x768xf32>,
    } else {
    }
    %c0 = arith.constant 0 : index
    %c0_1 = arith.constant 0 : index
    %3 = vector.load %arg7[%c0, %c0_1] : memref<32x768xf32, #tpu.memory_space<vmem>>, vector<32x768xf32>
    %c0_2 = arith.constant 0 : index
    %c0_3 = arith.constant 0 : index
    %4 = vector.load %arg3[%c0_2, %c0_3] : memref<32x256xbf16, #tpu.memory_space<vmem>>, vector<32x256xbf16>
    %c0_4 = arith.constant 0 : index
    %c0_5 = arith.constant 0 : index
    %5 = vector.load %arg4[%c0_4, %c0_5] : memref<256x768xbf16, #tpu.memory_space<vmem>>, vector<256x768xbf16>
    %cst = arith.constant dense<0.000000e+00> : vector<32x768xf32>
    %6 = tpu.matmul %4, %5, %cst {dimension_numbers = #tpu.dot_dimension_numbers<[1], [0], [0], [1], [0, 0, 1, 1], [], []>} : vector<32x256xbf16>, vector<256x768xbf16>, vector<32x768xf32> -> vector<32x768xf32>
    %7 = arith.addf %3, %6 : vector<32x768xf32>
    %c0_6 = arith.constant 0 : index
    %c0_7 = arith.constant 0 : index
    %8 = vector.load %arg7[%c0_6, %c0_7] : memref<32x768xf32, #tpu.memory_space<vmem>>, vector<32x768xf32>
    tpu.vector_store %arg7[%c0_6, %c0_7], %7 {strides = array<i32>} : memref<32x768xf32, #tpu.memory_space<vmem>>, vector<32x768xf32>,
    %c0_i32_8 = arith.constant 0 : i32
    %9 = arith.cmpi eq, %arg2, %c0_i32_8 : i32
    %10 = arith.extui %9 : i1 to i32
    %c0_i32_9 = arith.constant 0 : i32
    %11 = arith.cmpi ne, %10, %c0_i32_9 : i32
    scf.if %11 {
      %c0_10 = arith.constant 0 : index
      %c0_11 = arith.constant 0 : index
      %12 = vector.load %arg7[%c0_10, %c0_11] : memref<32x768xf32, #tpu.memory_space<vmem>>, vector<32x768xf32>
      %c0_12 = arith.constant 0 : index
      %c0_13 = arith.constant 0 : index
      %13 = vector.load %arg5[%c0_12, %c0_13] : memref<1x768xf32, #tpu.memory_space<vmem>>, vector<1x768xf32>
      %14 = vector.broadcast %13 : vector<1x768xf32> to vector<32x768xf32>
      %15 = arith.addf %12, %14 : vector<32x768xf32>
      %16 = arith.truncf %15 : vector<32x768xf32> to vector<32x768xbf16>
      %c0_14 = arith.constant 0 : index
      %c0_15 = arith.constant 0 : index
      %17 = vector.load %arg6[%c0_14, %c0_15] : memref<32x768xbf16, #tpu.memory_space<vmem>>, vector<32x768xbf16>
      tpu.vector_store %arg6[%c0_14, %c0_15], %16 {strides = array<i32>} : memref<32x768xbf16, #tpu.memory_space<vmem>>, vector<32x768xbf16>,
    } else {
    }
    return
  }
  func.func @transform_0(%arg0: i32, %arg1: i32, %arg2: i32) -> (i32, i32) {
    %c0_i32 = arith.constant 0 : i32
    return %arg0, %arg2 : i32, i32
  }
  func.func @transform_1(%arg0: i32, %arg1: i32, %arg2: i32) -> (i32, i32) {
    %c0_i32 = arith.constant 0 : i32
    return %arg2, %arg1 : i32, i32
  }
  func.func @transform_2(%arg0: i32, %arg1: i32, %arg2: i32) -> (i32, i32) {
    %c0_i32 = arith.constant 0 : i32
    %c0_i32_0 = arith.constant 0 : i32
    return %c0_i32, %arg1 : i32, i32
  }
  func.func @transform_3(%arg0: i32, %arg1: i32, %arg2: i32) -> (i32, i32) {
    %c0_i32 = arith.constant 0 : i32
    return %arg0, %arg1 : i32, i32
  }
}

module attributes {stable_mosaic.version = 11 : i64} {
  func.func @_pool_cls_kernel(%arg0: memref<2x256xbf16, #tpu.memory_space<vmem>>, %arg1: memref<256x256xbf16, #tpu.memory_space<vmem>>, %arg2: memref<1x256xf32, #tpu.memory_space<vmem>>, %arg3: memref<256x2xbf16, #tpu.memory_space<vmem>>, %arg4: memref<1x2xf32, #tpu.memory_space<vmem>>, %arg5: memref<2x2xf32, #tpu.memory_space<vmem>>) attributes {dimension_semantics = [], scalar_prefetch = 0 : i64, scratch_operands = 0 : i64, tpu.core_type = #tpu.core_type<tc>} {
    %c0 = arith.constant 0 : index
    %c0_0 = arith.constant 0 : index
    %0 = vector.load %arg0[%c0, %c0_0] : memref<2x256xbf16, #tpu.memory_space<vmem>>, vector<2x256xbf16>
    %c0_1 = arith.constant 0 : index
    %c0_2 = arith.constant 0 : index
    %1 = vector.load %arg1[%c0_1, %c0_2] : memref<256x256xbf16, #tpu.memory_space<vmem>>, vector<256x256xbf16>
    %cst = arith.constant dense<0.000000e+00> : vector<2x256xf32>
    %2 = tpu.matmul %0, %1, %cst {dimension_numbers = #tpu.dot_dimension_numbers<[1], [0], [0], [1], [0, 0, 1, 1], [], []>} : vector<2x256xbf16>, vector<256x256xbf16>, vector<2x256xf32> -> vector<2x256xf32>
    %c0_3 = arith.constant 0 : index
    %c0_4 = arith.constant 0 : index
    %3 = vector.load %arg2[%c0_3, %c0_4] : memref<1x256xf32, #tpu.memory_space<vmem>>, vector<1x256xf32>
    %4 = vector.broadcast %3 : vector<1x256xf32> to vector<2x256xf32>
    %5 = arith.addf %2, %4 : vector<2x256xf32>
    %6 = math.tanh %5 : vector<2x256xf32>
    %7 = arith.truncf %6 : vector<2x256xf32> to vector<2x256xbf16>
    %c0_5 = arith.constant 0 : index
    %c0_6 = arith.constant 0 : index
    %8 = vector.load %arg3[%c0_5, %c0_6] : memref<256x2xbf16, #tpu.memory_space<vmem>>, vector<256x2xbf16>
    %cst_7 = arith.constant dense<0.000000e+00> : vector<2x2xf32>
    %9 = tpu.matmul %7, %8, %cst_7 {dimension_numbers = #tpu.dot_dimension_numbers<[1], [0], [0], [1], [0, 0, 1, 1], [], []>} : vector<2x256xbf16>, vector<256x2xbf16>, vector<2x2xf32> -> vector<2x2xf32>
    %c0_8 = arith.constant 0 : index
    %c0_9 = arith.constant 0 : index
    %10 = vector.load %arg4[%c0_8, %c0_9] : memref<1x2xf32, #tpu.memory_space<vmem>>, vector<1x2xf32>
    %11 = vector.broadcast %10 : vector<1x2xf32> to vector<2x2xf32>
    %12 = arith.addf %9, %11 : vector<2x2xf32>
    %c0_10 = arith.constant 0 : index
    %c0_11 = arith.constant 0 : index
    %13 = vector.load %arg5[%c0_10, %c0_11] : memref<2x2xf32, #tpu.memory_space<vmem>>, vector<2x2xf32>
    tpu.vector_store %arg5[%c0_10, %c0_11], %12 {strides = array<i32>} : memref<2x2xf32, #tpu.memory_space<vmem>>, vector<2x2xf32>,
    return
  }
}

</mosaic_0001>

<bundles_post_ra>
// kernel: bert_classifier_forward.12
= control target key start
LH: loop header
LB: loop body
LE: loop exit
PB: predicated region body
PF: predicated region fallthrough
CT: control target
= control target key end

     0   :  { %v93_v46 = vlaneseq  ;;  %s249_s0 = inlined_call_operand.vmem [shape: bf16[32,256], index: 0, kind: input, shape index: {}]   ;;  %s250_s1 = inlined_call_operand.vmem [shape: f32[1,256], index: 1, kind: input, shape index: {}]   ;;  %s251_s2 = inlined_call_operand.vmem [shape: f32[1,256], index: 2, kind: input, shape index: {}]   ;;  %s252_s3 = inlined_call_operand.vmem [shape: bf16[32,256], index: 3, kind: output, shape index: {}]  }
   0x1   :  { %v14_v0 = vld [vmem:[%s249_s0] sm:$0xff]  ;;  %v16_v1 = vld [vmem:[%s249_s0 + $0x10] sm:$0xff]  ;;  %v15_v2 = vld [vmem:[%s249_s0 + $0x8] sm:$0xff] }
   0x2   :  { %v18_v3 = vunpack.c.l.bf16 %v14_v0  ;;  %v19_v4 = vunpack.c.h.bf16 %v14_v0  ;;  %v22_v5 = vunpack.c.l.bf16 %v16_v1  ;;  %v23_v6 = vunpack.c.h.bf16 %v16_v1  ;;  %v17_v7 = vld [vmem:[%s249_s0 + $0x18] sm:$0xff]  ;;  %v91_v60 = vld [vmem:[%s250_s1] sm:$0x3] }
   0x3   :  { %v20_v8 = vunpack.c.l.bf16 %v15_v2  ;;  %v21_v9 = vunpack.c.h.bf16 %v15_v2  ;;  %v24_v10 = vunpack.c.l.bf16 %v17_v7  ;;  %v25_v11 = vunpack.c.h.bf16 %v17_v7  ;;  %v111_v61 = vld [vmem:[%s251_s2] sm:$0x3] }
   0x4   :  { %v26_v12 = vadd.f32 %v19_v4, %v18_v3  ;;  %v32_v13 = vadd.f32 %v23_v6, %v22_v5  ;;  %v94_v52 = vshrl.u32 %v93_v46, 7 }
   0x5   :  { %v29_v14 = vadd.f32 %v21_v9, %v20_v8  ;;  %v35_v15 = vadd.f32 %v25_v11, %v24_v10 }
   0x6   :  { %27 = vadd.xlane.f32.xlu0 %v26_v12  ;;  %33 = vadd.xlane.f32.xlu1 %v32_v13  ;;  %v95_v57 = vsub.s32 0, %v94_v52  ;;  %v99_v58 = vsub.s32 1, %v94_v52 }
   0x8   :  { %v96_v62 = vrot.slane %v91_v60, %v95_v57  ;;  %v100_v63 = vrot.slane %v91_v60, %v99_v58  ;;  %v116_v1 = vrot.slane %v111_v61, %v95_v57  ;;  %v120_v2 = vrot.slane %v111_v61, %v99_v58 }
   0xa   :  { %30 = vadd.xlane.f32.xlu0 %v29_v14  ;;  %36 = vadd.xlane.f32.xlu1 %v35_v15 }
  0x93   :  { %v28_v16 = vpop.xlane.xlu0 %27  ;;  %v34_v17 = vpop.xlane.xlu1 %33 }
  0x94   :  { %v39_v18 = vmul.f32 0.00390625, %v28_v16  ;;  %v41_v19 = vmul.f32 0.00390625, %v34_v17 }
  0x96   :  { %v43_v20 = vsub.f32 %v18_v3, %v39_v18  ;;  %v44_v21 = vsub.f32 %v19_v4, %v39_v18  ;;  %v211_v22 = vsub.f32 %v22_v5, %v41_v19  ;;  %v213_v23 = vsub.f32 %v23_v6, %v41_v19 }
  0x97   :  { %v31_v24 = vpop.xlane.xlu0 %30  ;;  %v37_v25 = vpop.xlane.xlu1 %36 }
  0x98   :  { %v40_v26 = vmul.f32 0.00390625, %v31_v24  ;;  %v42_v27 = vmul.f32 0.00390625, %v37_v25  ;;  %v51_v28 = vmul.f32 %v43_v20, %v43_v20  ;;  %v52_v29 = vmul.f32 %v44_v21, %v44_v21 }
  0x99   :  { %v55_v30 = vmul.f32 %v211_v22, %v211_v22  ;;  %v56_v31 = vmul.f32 %v213_v23, %v213_v23 }
  0x9a   :  { %v45_v32 = vsub.f32 %v20_v8, %v40_v26  ;;  %v46_v33 = vsub.f32 %v21_v9, %v40_v26  ;;  %v219_v34 = vsub.f32 %v24_v10, %v42_v27  ;;  %v221_v35 = vsub.f32 %v25_v11, %v42_v27 }
  0x9b   :  { %v59_v36 = vadd.f32 %v52_v29, %v51_v28  ;;  %v65_v41 = vadd.f32 %v56_v31, %v55_v30 }
  0x9c   :  { %v53_v37 = vmul.f32 %v45_v32, %v45_v32  ;;  %v54_v38 = vmul.f32 %v46_v33, %v46_v33  ;;  %v57_v39 = vmul.f32 %v219_v34, %v219_v34  ;;  %v58_v40 = vmul.f32 %v221_v35, %v221_v35 }
  0x9d   :  { %60 = vadd.xlane.f32.xlu0 %v59_v36 }
  0x9e   :  { %v62_v42 = vadd.f32 %v54_v38, %v53_v37  ;;  %v68_v43 = vadd.f32 %v58_v40, %v57_v39 }
  0xa0   :  { %63 = vadd.xlane.f32.xlu1 %v62_v42 }
  0xa1   :  { %66 = vadd.xlane.f32.xlu0 %v65_v41 }
  0xa4   :  { %69 = vadd.xlane.f32.xlu1 %v68_v43 }
 0x12a   :  { %v61_v44 = vpop.xlane.xlu0 %60 }
 0x12b   :  { %v71_v45 = vmul.f32 0.00390625, %v61_v44 }
 0x12d   :  { %v75_v47 = vadd.f32 1e-12, %v71_v45  ;;  %v64_v48 = vpop.xlane.xlu1 %63 }
 0x12e   :  { %v72_v49 = vmul.f32 0.00390625, %v64_v48  ;;  %v67_v50 = vpop.xlane.xlu0 %66 }
 0x12f   :  { %171 = vrsqrt.f32 %v75_v47  ;;  %v73_v51 = vmul.f32 0.00390625, %v67_v50 }
 0x130   :  { %v76_v53 = vadd.f32 1e-12, %v72_v49 }
 0x131   :  { %v77_v54 = vadd.f32 1e-12, %v73_v51  ;;  %v70_v55 = vpop.xlane.xlu1 %69 }
 0x132   :  { %173 = vrsqrt.f32 %v76_v53  ;;  %v74_v56 = vmul.f32 0.00390625, %v70_v55 }
 0x133   :  { %175 = vrsqrt.f32 %v77_v54 }
 0x134   :  { %v78_v59 = vadd.f32 1e-12, %v74_v56 }
 0x136   :  { %177 = vrsqrt.f32 %v78_v59 }
 0x139   :  { %v172_v0 = vpop.eup %171 }
 0x13a   :  { %v83_v3 = vmul.f32 %v172_v0, %v43_v20  ;;  %v84_v4 = vmul.f32 %v172_v0, %v44_v21 }
 0x13c   :  { %v174_v5 = vpop.eup %173  ;;  %v103_v6 = vmul.f32 %v96_v62, %v83_v3  ;;  %v104_v7 = vmul.f32 %v100_v63, %v84_v4 }
 0x13d   :  { %v176_v8 = vpop.eup %175  ;;  %v85_v9 = vmul.f32 %v174_v5, %v45_v32  ;;  %v86_v10 = vmul.f32 %v174_v5, %v46_v33 }
 0x13e   :  { %v123_v11 = vadd.f32 %v116_v1, %v103_v6  ;;  %v124_v12 = vadd.f32 %v120_v2, %v104_v7  ;;  %v87_v13 = vmul.f32 %v176_v8, %v211_v22  ;;  %v88_v14 = vmul.f32 %v176_v8, %v213_v23 }
 0x13f   :  { %v105_v15 = vmul.f32 %v96_v62, %v85_v9  ;;  %v106_v16 = vmul.f32 %v100_v63, %v86_v10 }
 0x140   :  { %v178_v17 = vpop.eup %177  ;;  %v167_v18 = vpack.c.bf16 %v124_v12, %v123_v11  ;;  %v107_v19 = vmul.f32 %v96_v62, %v87_v13  ;;  %v108_v24 = vmul.f32 %v100_v63, %v88_v14 }
 0x141   :  { %v125_v20 = vadd.f32 %v116_v1, %v105_v15  ;;  %v126_v21 = vadd.f32 %v120_v2, %v106_v16  ;;  %v89_v25 = vmul.f32 %v178_v17, %v219_v34  ;;  %v90_v26 = vmul.f32 %v178_v17, %v221_v35 }
 0x142   :  { %155 = vst [vmem:[%s252_s3] sm:$0xff] %v167_v18  ;;  %v127_v27 = vadd.f32 %v116_v1, %v107_v19  ;;  %v128_v22 = vadd.f32 %v120_v2, %v108_v24 }
 0x143   :  { %v168_v28 = vpack.c.bf16 %v126_v21, %v125_v20  ;;  %v109_v23 = vmul.f32 %v96_v62, %v89_v25  ;;  %v110_v29 = vmul.f32 %v100_v63, %v90_v26 }
 0x144   :  { %v169_v30 = vpack.c.bf16 %v128_v22, %v127_v27 }
 0x145   :  { %156 = vst [vmem:[%s252_s3 + $0x8] sm:$0xff] %v168_v28  ;;  %v129_v31 = vadd.f32 %v116_v1, %v109_v23  ;;  %v130_v32 = vadd.f32 %v120_v2, %v110_v29 }
 0x146   :  { %157 = vst [vmem:[%s252_s3 + $0x10] sm:$0xff] %v169_v30 }
 0x147   :  { %v170_v33 = vpack.c.bf16 %v130_v32, %v129_v31 }
 0x149   :  { %158 = vst [vmem:[%s252_s3 + $0x18] sm:$0xff] %v170_v33 }

// kernel: bert_classifier_forward.14
= control target key start
LH: loop header
LB: loop body
LE: loop exit
PB: predicated region body
PF: predicated region fallthrough
CT: control target
= control target key end

     0   :  { %s1430_s0 = inlined_call_operand.vmem [shape: bf16[2,16,768], index: 0, kind: input, shape index: {}, may-alias: {0,1,2}]   ;;  %s1431_s1 = inlined_call_operand.vmem [shape: bf16[2,16,768], index: 1, kind: input, shape index: {}, may-alias: {0,1,2}]   ;;  %s1432_s2 = inlined_call_operand.vmem [shape: bf16[2,16,768], index: 2, kind: input, shape index: {}, may-alias: {0,1,2}]   ;;  %s1433_s3 = inlined_call_operand.vmem [shape: f32[2,1,16], index: 3, kind: input, shape index: {}]   ;;  %s1434_s4 = inlined_call_operand.vmem [shape: bf16[2,16,256], index: 4, kind: output, shape index: {}]  }
   0x1   :  { %1437 = sst [smem:[#allocation10_spill]] %s1434_s4 }
   0x2   :  { %s1186_s15 = smov 0   ;;  %s1188_s16 = smov 0  }
   0x3   :  { %s1190_s17 = smov 0   ;;  %s1192_s18 = smov 0  }
   0x4   :  { %s1194_s19 = smov 0   ;;  %s1196_s20 = smov 0  }
   0x5   :  { %s1198_s21 = smov 0   ;;  %s1200_s22 = smov 0  }
   0x6   :  { %s1202_s23 = smov 0   ;;  %s1204_s24 = smov 0  }
   0x7   :  { %s1206_s25 = smov 0  }
   0x8 LB: > { %1438 = sst [smem:[#allocation6_spill]] %s1140_s21  ;;  %s23_s27 = sadd.s32 1, %s1148_s23  ;;  %s1156_s25 = sphi %s1206_s25, %s14_s25   ;;  %s1152_s24 = sphi %s1204_s24, %s1461_s24   ;;  %s1148_s23 = sphi %s1202_s23, %s1460_s23   ;;  %s1144_s22 = sphi %s1200_s22, %s1459_s22   ;;  %s1140_s21 = sphi %s1198_s21, %s1458_s21   ;;  %s1136_s20 = sphi %s1196_s20, %s1457_s20   ;;  %s1132_s19 = sphi %s1194_s19, %s1456_s19   ;;  %s1128_s18 = sphi %s1192_s18, %s1455_s18   ;;  %s1124_s17 = sphi %s1190_s17, %s1454_s17   ;;  %s1120_s16 = sphi %s1188_s16, %s1453_s16   ;;  %s1116_s15 = sphi %s1186_s15, %s1452_s15  }
   0x9   : > { %p24_p0 = scmp.ge.s32.totalorder %s23_s27, 2  ;;  %s26_s28 = sadd.s32 1, %s1152_s24 }
   0xa   : > { %s35_s29 = sadd.s32 1, %s1136_s20  ;;  %p42_p1 = scmp.ne.s32.totalorder %s1136_s20, %s1132_s19 }
   0xb   : > { %s1463_s27 = smov (%p24_p0, %s23_s27), 0  ;;  %s1465_s28 = smov (!%p24_p0, %s26_s28), %s1152_s24 }
   0xc   : > { %1439 = sst [smem:[#allocation7_spill]] %s1463_s27  ;;  %s31_s30 = ssub.s32 %s1148_s23, %s1463_s27 }
   0xd   : > { %p43_p2 = scmp.eq.s32.totalorder %s1156_s25, 0  ;;  %p28_p3 = scmp.ge.s32.totalorder %s1465_s28, 2 }
   0xe   : > { %s58_s5 = sadd.s32 2, %s1148_s23  ;;  %s59_s7 = sadd.s32 2, %s1463_s27 }
   0xf   : > { %p1259_p4 = por %p43_p2, %p42_p1  ;;  %s1467_s28 = smov (%p28_p3, %s1465_s28), 0 }
  0x10   : > { %1441 = sst [smem:[#allocation8_spill]] %s1467_s28  ;;  %s61_s8 = ssub.s32 %s58_s5, %s59_s7 }
  0x11   : > { %s65_s9 = sadd.s32 1, %s1128_s18  ;;  %s30_s10 = ssub.s32 %s1152_s24, %s1467_s28 }
  0x12   : > { %p72_p5 = scmp.ne.s32.totalorder %s1128_s18, %s1124_s17  ;;  %s32_s11 = sor.u32 %s31_s30, %s30_s10 }
  0x13   : > { %s62_s12 = sor.u32 %s61_s8, %s30_s10  ;;  %p33_p6 = scmp.eq.s32.totalorder %s32_s11, 0 }
  0x14   : > { %p63_p7 = scmp.eq.s32.totalorder %s62_s12, 0  ;;  %p1273_p8 = por %p72_p5, %p43_p2 }
  0x15   : > { %s88_s14 = sadd.s32 4, %s1148_s23  ;;  %s89_s7 = sadd.s32 4, %s1463_s27 }
  0x16   : > { %s1279_s26 = scalar_select %p33_p6, %s1136_s20, %s35_s29  }
  0x17   : > { %s1282_s5 = scalar_select %p63_p7, %s1128_s18, %s65_s9  }
  0x18   : > { %1443 = sst [smem:[#allocation9_spill]] %s1279_s26  ;;  %s95_s28 = sadd.s32 1, %s1120_s16 }
  0x19   : > { %s91_s4 = ssub.s32 %s88_s14, %s89_s7  ;;  %p102_p9 = scmp.ne.s32.totalorder %s1120_s16, %s1116_s15 }
  0x1a   : > { %s92_s30 = sor.u32 %s91_s4, %s30_s10  ;;  %s1444_s21 = sadd.s32 4294967295, %s1156_s25  }
  0x1b   : > { %p160_p10 = scmp.eq.s32.totalorder %s1444_s21, 3  ;;  %p93_p11 = scmp.eq.s32.totalorder %s92_s30, 0 }
  0x1c   : > { %p1292_p12 = por %p102_p9, %p43_p2  ;;  %p891_p0 = scmp.ge.s32.totalorder %s1156_s25, 4 }
  0x1d   : > { %p1299_p13 = por %p160_p10, %p42_p1 }
  0x1e   : > { %s1304_s29 = scalar_select %p93_p11, %s1120_s16, %s95_s28  }
  0x1f   : > { %182 = sbr.rel (%p891_p0) target bundleno = 62 (0x3e), region = 16 }
  0x26   : > { %185 = sbr.rel (!%p1259_p4) target bundleno = 46 (0x2e), region = 20  ;;  %s187_s4 = sand.u32 (%p1259_p4), 1, %s1136_s20  }
  0x27   : > { %s960_s21 = smul.u32 (%p1259_p4), 12, %s1152_s24  ;;  %s892_s9 = sshll.u32 (%p1259_p4), %s187_s4, 3 }
  0x28   : > { %s189_s28 = scalar_lea.vmem (%p1259_p4), [#allocation2], %s892_s9 }
  0x29   : > { %s191_s10 = sadd.s32 (%p1259_p4), %s1148_s23, %s960_s21 }
  0x2a   : > { %s893_s12 = sshll.u32 (%p1259_p4), %s191_s10, 2 }
  0x2b   : > { %s193_s30 = scalar_lea.vmem (%p1259_p4), %s1430_s0, %s893_s12 }
  0x2c   : > { %v209_v0 = vld [vmem:[%s193_s30] sm:$0xf] (%p1259_p4)  ;;  %v211_v1 = vld [vmem:[%s193_s30 + $0x18] sm:$0xf] (%p1259_p4) }
  0x2d   : > { %210 = vst [vmem:[%s189_s28] sm:$0xf] %v209_v0  ;;  %212 = vst [vmem:[%s189_s28 + $0x4] sm:$0xf] %v211_v1 }
  0x2e PF: > { %239 = sbr.rel (!%p1273_p8) target bundleno = 54 (0x36), region = 61  ;;  %s241_s6 = sand.u32 (%p1273_p8), 1, %s1128_s18  }
  0x2f   : > { %s785_s4 = smul.u32 (%p1273_p8), 12, %s1152_s24  ;;  %s894_s21 = sshll.u32 (%p1273_p8), %s241_s6, 3 }
  0x30   : > { %s243_s9 = scalar_lea.vmem (%p1273_p8), [#allocation3], %s894_s21 }
  0x31   : > { %s786_s10 = sadd.s32 (%p1273_p8), %s1148_s23, %s785_s4 }
  0x32   : > { %s895_s27 = sshll.u32 (%p1273_p8), %s786_s10, 2 }
  0x33   : > { %s788_s12 = scalar_lea.vmem (%p1273_p8), %s1431_s1, %s895_s27 }
  0x34   : > { %v896_v2 = vld [vmem:[%s788_s12 + $0x8] sm:$0xf] (%p1273_p8)  ;;  %v897_v3 = vld [vmem:[%s788_s12 + $0x20] sm:$0xf] (%p1273_p8) }
  0x35   : > { %265 = vst [vmem:[%s243_s9] sm:$0xf] %v896_v2  ;;  %267 = vst [vmem:[%s243_s9 + $0x4] sm:$0xf] %v897_v3 }
  0x36 PF: > { %294 = sbr.rel (!%p1292_p12) target bundleno = 62 (0x3e), region = 102  ;;  %s296_s13 = sand.u32 (%p1292_p12), 1, %s1120_s16  }
  0x37   : > { %s792_s7 = smul.u32 (%p1292_p12), 12, %s1152_s24  ;;  %s898_s30 = sshll.u32 (%p1292_p12), %s296_s13, 3 }
  0x38   : > { %s298_s21 = scalar_lea.vmem (%p1292_p12), [#allocation4], %s898_s30 }
  0x39   : > { %s793_s28 = sadd.s32 (%p1292_p12), %s1148_s23, %s792_s7 }
  0x3a   : > { %s899_s6 = sshll.u32 (%p1292_p12), %s793_s28, 2 }
  0x3b   : > { %s795_s27 = scalar_lea.vmem (%p1292_p12), %s1432_s2, %s899_s6 }
  0x3c   : > { %v900_v4 = vld [vmem:[%s795_s27 + $0x10] sm:$0xf] (%p1292_p12)  ;;  %v901_v5 = vld [vmem:[%s795_s27 + $0x28] sm:$0xf] (%p1292_p12) }
  0x3d   : > { %320 = vst [vmem:[%s298_s21] sm:$0xf] %v900_v4  ;;  %322 = vst [vmem:[%s298_s21 + $0x4] sm:$0xf] %v901_v5 }
  0x3e PF: > { %p902_p1 = scmp.ge.s32.totalorder %s1156_s25, 1  ;;  %p354_p2 = scmp.lt.s32.totalorder %s1156_s25, 5 }
  0x40   : > { %p355_p3 = pnand %p902_p1, %p354_p2 }
  0x41   : > { %s368_s8 = sand.u32 (!%p355_p3), 1, %s1124_s17   ;;  %s361_s10 = sand.u32 (!%p355_p3), 1, %s1132_s19   ;;  %v1158_v6 = vmov (!%p355_p3), 0.0   ;;  %vm1159_vm0 = vmmov (!%p355_p3), 0   ;;  %vm442_vm1 = vcmask (!%p355_p3), 523264   ;;  %vm490_vm2 = vcmask (!%p355_p3), 130048  }
  0x42   : > { %358 = sbr.rel (%p355_p3) target bundleno = 1493 (0x5d5), region = 147  ;;  %936 = vmatprep.subr.bf16.mxu0 (!%p355_p3), %v1158_v6  ;;  %s904_s14 = sshll.u32 (!%p355_p3), %s368_s8, 3  ;;  %938 = vmatprep.mubr.msk.bf16.mxu0 (!%p355_p3), %vm1159_vm0, %v1158_v6  ;;  %vm572_vm3 = vcmask (!%p355_p3), 519168   ;;  %vm708_vm4 = vcmask (!%p355_p3), 1043968  }
  0x43   : > { %s1338_s12 = sshll.u32 (!%p355_p3), %s361_s10, 3  ;;  %942 = vmatprep.subr.bf16.mxu1 (!%p355_p3), %v1158_v6  ;;  %944 = vmatprep.mubr.msk.bf16.mxu1 (!%p355_p3), %vm1159_vm0, %v1158_v6  ;;  %s370_s17 = scalar_lea.vmem (!%p355_p3), [#allocation3], %s904_s14 }
  0x44   : > { %v1052_v7 = vld [vmem:[%s370_s17] sm:$0xff] (!%p355_p3)   ;;  %s363_s19 = scalar_lea.vmem (!%p355_p3), [#allocation2], %s1338_s12  ;;  %p412_p4 = scmp.lt.s32.totalorder (!%p355_p3), %s1144_s22, 1 }
  0x45   : > { %v418_v8 = vld [vmem:[%s363_s19] sm:$0xf] (!%p355_p3)  ;;  %v419_v9 = vld [vmem:[%s363_s19 + $0x4] sm:$0xf] (!%p355_p3)  ;;  %v447_v10 = vsel (!%p355_p3), %vm442_vm1, %v1052_v7, 0  ;;  %s1160_s28 = smov (!%p355_p3), 64  }
  0x46   : > { %v424_v11 = vmul.bf16 (!%p355_p3), 1040203264, %v418_v8  ;;  %v425_v12 = vmul.bf16 (!%p355_p3), 1040203264, %v419_v9  ;;  %937 = vmatpush3.bf16.xpose.msra.mxu0 (!%p355_p3), %v447_v10  ;;  %s375_s6 = sand.u32 (!%p355_p3), 1, %s1116_s15   ;;  %s1372_s15 = scalar_lea.vmem (!%p355_p3), [#allocation5], %s1338_s12 }
  0x47   : > { %954 = vmatprep.subr.bf16.mxu0 (!%p355_p3), %v1158_v6  ;;  %s905_s4 = sshll.u32 (!%p355_p3), %s375_s6, 3 }
  0x48   : > { %v908_v13 = vcombine.low (!%p355_p3), %v424_v11, %v425_v12  ;;  %s377_s26 = scalar_lea.vmem (!%p355_p3), [#allocation4], %s905_s4 }
  0x49   : > { %s413_s9 = scalar_select %p412_p4, %s1144_s22, 1  ;;  %v1053_v33 = vld [vmem:[%s377_s26] sm:$0xff]  }
  0x4a   : > { %943 = vmatpush3.bf16.msra.mxu1 %v1053_v33  ;;  %s1447_s27 = sld [smem:[#allocation6_spill]] (%p1299_p13)  ;;  %s920_s21 = sshll.u32 (%p1299_p13), %s1144_s22, 2 }
  0x4b   : > { %s414_s30 = scalar_lea.vmem %s1433_s3, %s413_s9  ;;  %948 = vmatprep.subr.bf16.mxu1 %v1158_v6  ;;  %s1448_s17 = sld [smem:[#allocation10_spill]] (%p1299_p13) }
  0x4c   : > { %v1354_v14 = vld [vmem:[%s414_s30] ss:$0 sm:$0xff] }
  0x4d   : > { %939 = vmatmul.mubr.msk.bf16.vlgmr.msra.gmra.mrb[0].mxu0 %vm442_vm1, %v908_v13 }
  0x4e   : > { %956 = vmatprep.mubr.msk.bf16.mxu0 %vm1159_vm0, %v1158_v6 }
  0x50   : > { %s719_s8 = sadd.s32 (%p1299_p13), %s1447_s27, %s920_s21 }
  0x51   : > { %s921_s10 = sshll.u32 (%p1299_p13), %s719_s8, 2 }
  0x52   : > { %s721_s19 = scalar_lea.vmem (%p1299_p13), %s1448_s17, %s921_s10 }
 0x120   : > { %v483_v15 = vpop.f32.mrb[0].mxu0 }
 0x121   : > { %v484_v16 = vadd.f32 %v1354_v14, %v483_v15  ;;  %v940_v17 = vpop.f32.mrb[1].mxu0 }
 0x122   : > { %v486_v18 = vpop.f32.mrb[2].mxu0 }
 0x123   : > { %v487_v19 = vadd.f32 %v1354_v14, %v486_v18  ;;  %v941_v20 = vpop.f32.mrb[3].mxu0  ;;  %v491_v21 = vsel %vm490_vm2, %v484_v16, -inf }
 0x124   : > { %492 = vmax.xlane.f32.xlu0 %v491_v21 }
 0x125   : > { %v494_v22 = vsel %vm490_vm2, %v487_v19, -inf }
 0x128   : > { %495 = vmax.xlane.f32.xlu0 %v494_v22 }
 0x13e   : > { %577 = vrot.lane.b32.xlu0 %v1052_v7, %s1160_s28 }
 0x1b1   : > { %v493_v23 = vpop.xlane.xlu0 %492 }
 0x1b2   : > { %v497_v24 = vsub.f32 %v484_v16, %v493_v23 }
 0x1b4   : > { %v499_v25 = vmul.f32 1.442695, %v497_v24 }
 0x1b5   : > { %v496_v26 = vpop.xlane.xlu0 %495 }
 0x1b6   : > { %1054 = vpow2.f32 %v499_v25  ;;  %v498_v27 = vsub.f32 %v487_v19, %v496_v26 }
 0x1b8   : > { %v501_v28 = vmul.f32 1.442695, %v498_v27 }
 0x1b9   : > { %v578_v38 = vpop.permute.xlu0 %577 }
 0x1ba   : > { %1056 = vpow2.f32 %v501_v28  ;;  %v583_v41 = vsel %vm442_vm1, %v578_v38, 0 }
 0x1c0   : > { %v1055_v29 = vpop.eup %1054 }
 0x1c1   : > { %v503_v30 = vsel %vm490_vm2, %v1055_v29, 0.0 }
 0x1c2   : > { %504 = vadd.xlane.f32.xlu1 %v503_v30 }
 0x1c4   : > { %v1057_v31 = vpop.eup %1056 }
 0x1c5   : > { %v506_v32 = vsel %vm490_vm2, %v1057_v31, 0.0 }
 0x1c6   : > { %507 = vadd.xlane.f32.xlu1 %v506_v32 }
 0x1d7   : > { %575 = vrot.lane.b32.xlu1 %v908_v13, %s1160_s28 }
 0x24f   : > { %v505_v34 = vpop.xlane.xlu1 %504 }
 0x250   : > { %1058 = vrcp.f32 %v505_v34 }
 0x253   : > { %v508_v35 = vpop.xlane.xlu1 %507 }
 0x254   : > { %1060 = vrcp.f32 %v508_v35 }
 0x257   : > { %v576_v43 = vpop.permute.xlu1 %575 }
 0x25a   : > { %v1059_v36 = vpop.eup %1058 }
 0x25b   : > { %v511_v39 = vmul.f32 %v1059_v36, %v1055_v29 }
 0x25e   : > { %v1061_v37 = vpop.eup %1060 }
 0x25f   : > { %v512_v40 = vmul.f32 %v1061_v37, %v1057_v31 }
 0x261   : > { %v513_v42 = vpack.c.bf16 %v512_v40, %v511_v39 }
 0x263   : > { %945 = vmatmul.mubr.msk.bf16.vlgmr.msra.gmra.mrb[0].mxu1 %vm490_vm2, %v513_v42 }
 0x264   : > { %949 = vmatpush3.bf16.xpose.msra.mxu1 %v583_v41  ;;  %950 = vmatprep.mubr.msk.bf16.mxu1 %vm1159_vm0, %v1158_v6 }
 0x26b   : > { %951 = vmatmul.mubr.msk.bf16.vlgmr.msra.gmra.mrb[4].mxu1 %vm442_vm1, %v576_v43 }
 0x336   : > { %v557_v44 = vpop.f32.mrb[0].mxu1 }
 0x337   : > { %v924_v45 = vpack.c.bf16 %v557_v44, %v557_v44  ;;  %v946_v46 = vpop.f32.mrb[1].mxu1 }
 0x338   : > { %v560_v47 = vpop.f32.mrb[2].mxu1 }
 0x339   : > { %573 = vst.msk [vmem:[%s1372_s15] sm:$0xf] %vm572_vm3, %v924_v45  ;;  %v925_v48 = vpack.c.bf16 %v560_v47, %v560_v47  ;;  %v947_v49 = vpop.f32.mrb[3].mxu1 }
 0x33b   : > { %574 = vst.msk [vmem:[%s1372_s15 + $0x4] sm:$0xf] %vm572_vm3, %v925_v48 }
 0x33e   : > { %v619_v50 = vpop.f32.mrb[4].mxu1 }
 0x33f   : > { %v620_v51 = vadd.f32 %v1354_v14, %v619_v50  ;;  %v952_v52 = vpop.f32.mrb[5].mxu1 }
 0x340   : > { %v622_v53 = vpop.f32.mrb[6].mxu1 }
 0x341   : > { %v623_v54 = vadd.f32 %v1354_v14, %v622_v53  ;;  %v953_v55 = vpop.f32.mrb[7].mxu1  ;;  %v626_v56 = vsel %vm490_vm2, %v620_v51, -inf }
 0x342   : > { %627 = vmax.xlane.f32.xlu1 %v626_v56 }
 0x343   : > { %v629_v57 = vsel %vm490_vm2, %v623_v54, -inf }
 0x344   : > { %630 = vmax.xlane.f32.xlu0 %v629_v57 }
 0x3cf   : > { %v628_v58 = vpop.xlane.xlu1 %627 }
 0x3d0   : > { %v632_v59 = vsub.f32 %v620_v51, %v628_v58 }
 0x3d1   : > { %v631_v60 = vpop.xlane.xlu0 %630 }
 0x3d2   : > { %v634_v61 = vmul.f32 1.442695, %v632_v59  ;;  %v633_v62 = vsub.f32 %v623_v54, %v631_v60 }
 0x3d4   : > { %1062 = vpow2.f32 %v634_v61  ;;  %v636_v63 = vmul.f32 1.442695, %v633_v62 }
 0x3d6   : > { %1064 = vpow2.f32 %v636_v63 }
 0x3de   : > { %v1063_v0 = vpop.eup %1062 }
 0x3df   : > { %v638_v1 = vsel %vm490_vm2, %v1063_v0, 0.0 }
 0x3e0   : > { %v1065_v2 = vpop.eup %1064  ;;  %639 = vadd.xlane.f32.xlu0 %v638_v1 }
 0x3e1   : > { %v641_v3 = vsel %vm490_vm2, %v1065_v2, 0.0 }
 0x3e2   : > { %642 = vadd.xlane.f32.xlu1 %v641_v3 }
 0x3f6   : > { %649 = vrot.lane.b32.xlu0 %v1053_v33, %s1160_s28 }
 0x46d   : > { %v640_v4 = vpop.xlane.xlu0 %639 }
 0x46e   : > { %1066 = vrcp.f32 %v640_v4 }
 0x46f   : > { %v643_v5 = vpop.xlane.xlu1 %642 }
 0x470   : > { %1068 = vrcp.f32 %v643_v5 }
 0x471   : > { %v650_v6 = vpop.permute.xlu0 %649 }
 0x472   : > { %955 = vmatpush3.bf16.msra.mxu0 %v650_v6 }
 0x478   : > { %v1067_v7 = vpop.eup %1066 }
 0x479   : > { %v646_v9 = vmul.f32 %v1067_v7, %v1063_v0 }
 0x47a   : > { %v1069_v8 = vpop.eup %1068 }
 0x47b   : > { %v647_v10 = vmul.f32 %v1069_v8, %v1065_v2 }
 0x47d   : > { %v648_v11 = vpack.c.bf16 %v647_v10, %v646_v9 }
 0x47f   : > { %957 = vmatmul.mubr.msk.bf16.vlgmr.msra.gmra.mrb[4].mxu0 %vm490_vm2, %v648_v11 }
 0x552   : > { %v689_v12 = vpop.f32.mrb[4].mxu0 }
 0x553   : > { %v926_v13 = vpack.c.bf16 %v689_v12, %v689_v12  ;;  %v958_v14 = vpop.f32.mrb[5].mxu0 }
 0x554   : > { %v692_v15 = vpop.f32.mrb[6].mxu0 }
 0x555   : > { %702 = vrot.lane.b32.xlu1 %v926_v13, %s1160_s28  ;;  %v959_v16 = vpop.f32.mrb[7].mxu0  ;;  %v927_v17 = vpack.c.bf16 %v692_v15, %v692_v15 }
 0x559   : > { %704 = vrot.lane.b32.xlu1 %v927_v17, %s1160_s28 }
 0x5c6   : > { %717 = sbr.rel (!%p1299_p13) target bundleno = 1493 (0x5d5), region = 163 }
 0x5c7   : > { %v703_v18 = vpop.permute.xlu1 %702 }
 0x5c8   : > { %709 = vst.msk [vmem:[%s1372_s15] sm:$0xf] %vm708_vm4, %v703_v18 }
 0x5cb   : > { %v705_v19 = vpop.permute.xlu1 %704 }
 0x5cc   : > { %710 = vst.msk [vmem:[%s1372_s15 + $0x4] sm:$0xf] %vm708_vm4, %v705_v19 }
 0x5cf   : > { %v737_v20 = vld [vmem:[%s1372_s15] sm:$0xf] }
 0x5d0   : > { %738 = vst [vmem:[%s721_s19] sm:$0xf] %v737_v20 }
 0x5d3   : > { %v739_v21 = vld [vmem:[%s1372_s15 + $0x4] sm:$0xf] }
 0x5d4   : > { %740 = vst [vmem:[%s721_s19 + $0x8] sm:$0xf] %v739_v21 }
 0x5d5 PF: > { %s14_s25 = sadd.s32 1, %s1156_s25   ;;  %s1449_s22 = sld [smem:[#allocation9_spill]] }
 0x5d6   : > { %p11_p5 = scmp.ge.s32.totalorder %s14_s25, 6   ;;  %s1450_s11 = sld [smem:[#allocation7_spill]] }
 0x5d7   : > { %s1451_s9 = sld [smem:[#allocation8_spill]]  ;;  %s1452_s15 = smov %s1120_s16 }
 0x5d8   : > { %s1453_s16 = smov %s1304_s29  ;;  %s1454_s17 = smov %s1128_s18 }
 0x5d9   : > { %s1455_s18 = smov %s1282_s5  ;;  %s1456_s19 = smov %s1136_s20 }
 0x5da   : > { %s1458_s21 = smov %s1148_s23  ;;  %13 = sbr.rel (!%p11_p5) target bundleno = 8 (0x8), region = 254 }
 0x5db   : > { %s1457_s20 = smov %s1449_s22  ;;  %s1459_s22 = smov %s1152_s24 }
 0x5dc   : > { %s1460_s23 = smov %s1450_s11 }
 0x5dd   : > { %s1461_s24 = smov %s1451_s9 }

// kernel: bert_classifier_forward.15
= control target key start
LH: loop header
LB: loop body
LE: loop exit
PB: predicated region body
PF: predicated region fallthrough
CT: control target
= control target key end

     0   :  { %v341_v36 = vlaneseq  ;;  %s850_s1 = inlined_call_operand.vmem [shape: bf16[256,256], index: 1, kind: input, shape index: {}]   ;;  %s851_s0 = inlined_call_operand.vmem [shape: bf16[32,256], index: 0, kind: input, shape index: {}]   ;;  %s852_s2 = inlined_call_operand.vmem [shape: f32[1,256], index: 2, kind: input, shape index: {}]   ;;  %s853_s3 = inlined_call_operand.vmem [shape: bf16[32,256], index: 3, kind: input, shape index: {}]   ;;  %s854_s4 = inlined_call_operand.vmem [shape: f32[1,256], index: 4, kind: input, shape index: {}]   ;;  %s855_s5 = inlined_call_operand.vmem [shape: f32[1,256], index: 5, kind: input, shape index: {}]   ;;  %s856_s6 = inlined_call_operand.vmem [shape: bf16[32,256], index: 6, kind: output, shape index: {}]  }
   0x1   :  { %v592_v0 = vld [vmem:[%s850_s1 + $0x4] ss:$8 sps:$4 sm:$0xff]   ;;  %v594_v1 = vld [vmem:[%s850_s1] ss:$8 sps:$4 sm:$0xff]   ;;  %v595_v2 = vld [vmem:[%s850_s1 + $0x14] ss:$8 sps:$4 sm:$0xff]  }
   0x2   :  { %259 = vmatprep.subr.bf16.mxu0 %v592_v0  ;;  %560 = vmatprep.subr.bf16.mxu1 %v592_v0  ;;  %v597_v3 = vld [vmem:[%s850_s1 + $0x10] ss:$8 sps:$4 sm:$0xff]   ;;  %v598_v4 = vld [vmem:[%s850_s1 + $0x24] ss:$8 sps:$4 sm:$0xff]   ;;  %v600_v5 = vld [vmem:[%s850_s1 + $0x20] ss:$8 sps:$4 sm:$0xff]  }
   0x3   :  { %260 = vmatpush1.bf16.msra.mxu0 %v594_v1  ;;  %576 = vmatpush1.bf16.msra.mxu1 %v594_v1  ;;  %v601_v6 = vld [vmem:[%s850_s1 + $0x34] ss:$8 sps:$4 sm:$0xff]   ;;  %v603_v7 = vld [vmem:[%s850_s1 + $0x30] ss:$8 sps:$4 sm:$0xff]   ;;  %v604_v8 = vld [vmem:[%s850_s1 + $0x44] ss:$8 sps:$4 sm:$0xff]  }
   0x4   :  { %261 = vmatprep.subr.bf16.mxu0 %v595_v2  ;;  %561 = vmatprep.subr.bf16.mxu1 %v595_v2  ;;  %v606_v9 = vld [vmem:[%s850_s1 + $0x40] ss:$8 sps:$4 sm:$0xff]   ;;  %v607_v10 = vld [vmem:[%s850_s1 + $0x54] ss:$8 sps:$4 sm:$0xff]   ;;  %v609_v11 = vld [vmem:[%s850_s1 + $0x50] ss:$8 sps:$4 sm:$0xff]  }
   0x5   :  { %v610_v12 = vld [vmem:[%s850_s1 + $0x64] ss:$8 sps:$4 sm:$0xff]   ;;  %v612_v14 = vld [vmem:[%s850_s1 + $0x60] ss:$8 sps:$4 sm:$0xff]   ;;  %v645_v15 = vld [vmem:[%s851_s0 + $0x14] ss:$8 sps:$4 sm:$0xff]  }
   0x6   :  { %v642_v13 = vld [vmem:[%s851_s0 + $0x4] ss:$8 sps:$4 sm:$0xff]   ;;  %v613_v16 = vld [vmem:[%s850_s1 + $0x74] ss:$8 sps:$4 sm:$0xff]   ;;  %301 = vmatprep.mubr.bf16.mxu1 %v645_v15  ;;  %v615_v17 = vld [vmem:[%s850_s1 + $0x70] ss:$8 sps:$4 sm:$0xff]  }
   0x7   :  { %262 = vmatpush1.bf16.msra.mxu0 %v597_v3  ;;  %577 = vmatpush1.bf16.msra.mxu1 %v597_v3  ;;  %v616_v18 = vld [vmem:[%s850_s1 + $0x84] ss:$8 sps:$4 sm:$0xff]   ;;  %v618_v19 = vld [vmem:[%s850_s1 + $0x80] ss:$8 sps:$4 sm:$0xff]   ;;  %v619_v20 = vld [vmem:[%s850_s1 + $0x94] ss:$8 sps:$4 sm:$0xff]  }
   0x8   :  { %263 = vmatprep.subr.bf16.mxu0 %v598_v4  ;;  %562 = vmatprep.subr.bf16.mxu1 %v598_v4  ;;  %v621_v21 = vld [vmem:[%s850_s1 + $0x90] ss:$8 sps:$4 sm:$0xff]   ;;  %v622_v22 = vld [vmem:[%s850_s1 + $0xa4] ss:$8 sps:$4 sm:$0xff]   ;;  %v624_v23 = vld [vmem:[%s850_s1 + $0xa0] ss:$8 sps:$4 sm:$0xff]  }
   0x9   :  { %291 = vmatprep.mubr.bf16.mxu0 %v642_v13  ;;  %v625_v24 = vld [vmem:[%s850_s1 + $0xb4] ss:$8 sps:$4 sm:$0xff]   ;;  %v627_v25 = vld [vmem:[%s850_s1 + $0xb0] ss:$8 sps:$4 sm:$0xff]   ;;  %v628_v26 = vld [vmem:[%s850_s1 + $0xc4] ss:$8 sps:$4 sm:$0xff]  }
   0xa   :  { %v630_v27 = vld [vmem:[%s850_s1 + $0xc0] ss:$8 sps:$4 sm:$0xff]   ;;  %v631_v28 = vld [vmem:[%s850_s1 + $0xd4] ss:$8 sps:$4 sm:$0xff]   ;;  %v633_v29 = vld [vmem:[%s850_s1 + $0xd0] ss:$8 sps:$4 sm:$0xff]  }
   0xb   :  { %264 = vmatpush1.bf16.msra.mxu0 %v600_v5  ;;  %578 = vmatpush1.bf16.msra.mxu1 %v600_v5  ;;  %v634_v30 = vld [vmem:[%s850_s1 + $0xe4] ss:$8 sps:$4 sm:$0xff]   ;;  %v636_v31 = vld [vmem:[%s850_s1 + $0xe0] ss:$8 sps:$4 sm:$0xff]   ;;  %v637_v32 = vld [vmem:[%s850_s1 + $0xf4] ss:$8 sps:$4 sm:$0xff]  }
   0xc   :  { %265 = vmatprep.subr.bf16.mxu0 %v601_v6  ;;  %563 = vmatprep.subr.bf16.mxu1 %v601_v6  ;;  %v639_v33 = vld [vmem:[%s850_s1 + $0xf0] ss:$8 sps:$4 sm:$0xff]   ;;  %v640_v34 = vld [vmem:[%s851_s0] ss:$8 sps:$4 sm:$0xff]   ;;  %v342_v37 = vshrl.u32 %v341_v36, 7 }
   0xd   :  { %v643_v35 = vld [vmem:[%s851_s0 + $0x10] ss:$8 sps:$4 sm:$0xff]   ;;  %v339_v39 = vld [vmem:[%s852_s2] sm:$0x3]  ;;  %v360_v45 = vld [vmem:[%s853_s3 + $0x8] sm:$0xff] }
   0xe   :  { %v797_v38 = vsub.s32 0, %v342_v37  ;;  %v802_v40 = vsub.s32 1, %v342_v37  ;;  %v361_v41 = vld [vmem:[%s853_s3 + $0x10] sm:$0xff]  ;;  %v359_v42 = vld [vmem:[%s853_s3] sm:$0xff]  ;;  %v362_v46 = vld [vmem:[%s853_s3 + $0x18] sm:$0xff]  ;;  %v365_v57 = vunpack.c.l.bf16 %v360_v45  ;;  %v366_v62 = vunpack.c.h.bf16 %v360_v45 }
   0xf   :  { %266 = vmatpush1.bf16.msra.mxu0 %v603_v7  ;;  %579 = vmatpush1.bf16.msra.mxu1 %v603_v7  ;;  %v367_v47 = vunpack.c.l.bf16 %v361_v41  ;;  %v363_v48 = vunpack.c.l.bf16 %v359_v42  ;;  %v368_v51 = vunpack.c.h.bf16 %v361_v41  ;;  %v364_v52 = vunpack.c.h.bf16 %v359_v42 }
  0x10   :  { %267 = vmatprep.subr.bf16.mxu0 %v604_v8  ;;  %564 = vmatprep.subr.bf16.mxu1 %v604_v8  ;;  %v344_v43 = vrot.slane %v339_v39, %v797_v38  ;;  %v348_v44 = vrot.slane %v339_v39, %v802_v40  ;;  %v369_v58 = vunpack.c.l.bf16 %v362_v46  ;;  %v370_v0 = vunpack.c.h.bf16 %v362_v46 }
  0x13   :  { %268 = vmatpush1.bf16.msra.mxu0 %v606_v9  ;;  %580 = vmatpush1.bf16.msra.mxu1 %v606_v9 }
  0x14   :  { %269 = vmatprep.subr.bf16.mxu0 %v607_v10  ;;  %565 = vmatprep.subr.bf16.mxu1 %v607_v10 }
  0x17   :  { %270 = vmatpush1.bf16.msra.mxu0 %v609_v11  ;;  %581 = vmatpush1.bf16.msra.mxu1 %v609_v11 }
  0x18   :  { %271 = vmatprep.subr.bf16.mxu0 %v610_v12  ;;  %566 = vmatprep.subr.bf16.mxu1 %v610_v12 }
  0x1b   :  { %272 = vmatpush1.bf16.msra.mxu0 %v612_v14  ;;  %582 = vmatpush1.bf16.msra.mxu1 %v612_v14 }
  0x1c   :  { %273 = vmatprep.subr.bf16.mxu0 %v613_v16  ;;  %567 = vmatprep.subr.bf16.mxu1 %v613_v16 }
  0x1f   :  { %274 = vmatpush1.bf16.msra.mxu0 %v615_v17  ;;  %583 = vmatpush1.bf16.msra.mxu1 %v615_v17 }
  0x20   :  { %275 = vmatprep.subr.bf16.mxu0 %v616_v18  ;;  %568 = vmatprep.subr.bf16.mxu1 %v616_v18 }
  0x23   :  { %276 = vmatpush1.bf16.msra.mxu0 %v618_v19  ;;  %584 = vmatpush1.bf16.msra.mxu1 %v618_v19 }
  0x24   :  { %277 = vmatprep.subr.bf16.mxu0 %v619_v20  ;;  %569 = vmatprep.subr.bf16.mxu1 %v619_v20 }
  0x27   :  { %278 = vmatpush1.bf16.msra.mxu0 %v621_v21  ;;  %585 = vmatpush1.bf16.msra.mxu1 %v621_v21 }
  0x28   :  { %279 = vmatprep.subr.bf16.mxu0 %v622_v22  ;;  %570 = vmatprep.subr.bf16.mxu1 %v622_v22 }
  0x2b   :  { %280 = vmatpush1.bf16.msra.mxu0 %v624_v23  ;;  %586 = vmatpush1.bf16.msra.mxu1 %v624_v23 }
  0x2c   :  { %281 = vmatprep.subr.bf16.mxu0 %v625_v24  ;;  %571 = vmatprep.subr.bf16.mxu1 %v625_v24 }
  0x2f   :  { %282 = vmatpush1.bf16.msra.mxu0 %v627_v25  ;;  %587 = vmatpush1.bf16.msra.mxu1 %v627_v25 }
  0x30   :  { %283 = vmatprep.subr.bf16.mxu0 %v628_v26  ;;  %572 = vmatprep.subr.bf16.mxu1 %v628_v26 }
  0x33   :  { %284 = vmatpush1.bf16.msra.mxu0 %v630_v27  ;;  %588 = vmatpush1.bf16.msra.mxu1 %v630_v27 }
  0x34   :  { %285 = vmatprep.subr.bf16.mxu0 %v631_v28  ;;  %573 = vmatprep.subr.bf16.mxu1 %v631_v28 }
  0x37   :  { %286 = vmatpush1.bf16.msra.mxu0 %v633_v29  ;;  %589 = vmatpush1.bf16.msra.mxu1 %v633_v29 }
  0x38   :  { %287 = vmatprep.subr.bf16.mxu0 %v634_v30  ;;  %574 = vmatprep.subr.bf16.mxu1 %v634_v30 }
  0x3b   :  { %288 = vmatpush1.bf16.msra.mxu0 %v636_v31  ;;  %590 = vmatpush1.bf16.msra.mxu1 %v636_v31 }
  0x3c   :  { %289 = vmatprep.subr.bf16.mxu0 %v637_v32  ;;  %575 = vmatprep.subr.bf16.mxu1 %v637_v32 }
  0x3f   :  { %290 = vmatpush1.bf16.msra.mxu0 %v639_v33  ;;  %591 = vmatpush1.bf16.msra.mxu1 %v639_v33 }
  0x42   :  { %292 = vmatmul.mubr.bf16.vlgmr.msra.gmra.mrb[0].mxu0 %v640_v34  ;;  %302 = vmatmul.mubr.bf16.vlgmr.msra.gmra.mrb[0].mxu1 %v643_v35 }
 0x115   :  { %v293_v49 = vpop.f32.mrb[0].mxu0  ;;  %v303_v50 = vpop.f32.mrb[0].mxu1 }
 0x116   :  { %v351_v53 = vadd.f32 %v344_v43, %v293_v49  ;;  %v355_v54 = vadd.f32 %v344_v43, %v303_v50  ;;  %v295_v55 = vpop.f32.mrb[1].mxu0  ;;  %v305_v56 = vpop.f32.mrb[1].mxu1 }
 0x117   :  { %v352_v59 = vadd.f32 %v348_v44, %v295_v55  ;;  %v356_v60 = vadd.f32 %v348_v44, %v305_v56  ;;  %v297_v61 = vpop.f32.mrb[2].mxu0  ;;  %v307_v63 = vpop.f32.mrb[2].mxu1 }
 0x118   :  { %v353_v1 = vadd.f32 %v344_v43, %v297_v61  ;;  %v299_v2 = vpop.f32.mrb[3].mxu0  ;;  %v357_v3 = vadd.f32 %v344_v43, %v307_v63  ;;  %v309_v4 = vpop.f32.mrb[3].mxu1  ;;  %v375_v5 = vadd.f32 %v367_v47, %v355_v54  ;;  %v371_v6 = vadd.f32 %v363_v48, %v351_v53  ;;  %v444_v61 = vld [vmem:[%s854_s4] sm:$0x3] }
 0x119   :  { %v354_v7 = vadd.f32 %v348_v44, %v299_v2  ;;  %v358_v8 = vadd.f32 %v348_v44, %v309_v4  ;;  %v376_v9 = vadd.f32 %v368_v51, %v356_v60  ;;  %v372_v10 = vadd.f32 %v364_v52, %v352_v59 }
 0x11a   :  { %v373_v11 = vadd.f32 %v365_v57, %v353_v1  ;;  %v377_v12 = vadd.f32 %v369_v58, %v357_v3  ;;  %v449_v63 = vrot.slane %v444_v61, %v797_v38 }
 0x11b   :  { %v374_v13 = vadd.f32 %v366_v62, %v354_v7  ;;  %v378_v14 = vadd.f32 %v370_v0, %v358_v8  ;;  %v385_v15 = vadd.f32 %v376_v9, %v375_v5  ;;  %v379_v16 = vadd.f32 %v372_v10, %v371_v6  ;;  %v464_v62 = vld [vmem:[%s855_s5] sm:$0x3] }
 0x11c   :  { %v453_v0 = vrot.slane %v444_v61, %v802_v40  ;;  %v469_v2 = vrot.slane %v464_v62, %v797_v38  ;;  %v473_v3 = vrot.slane %v464_v62, %v802_v40 }
 0x11d   :  { %386 = vadd.xlane.f32.xlu1 %v385_v15  ;;  %380 = vadd.xlane.f32.xlu0 %v379_v16  ;;  %v388_v17 = vadd.f32 %v378_v14, %v377_v12  ;;  %v382_v18 = vadd.f32 %v374_v13, %v373_v11 }
 0x121   :  { %389 = vadd.xlane.f32.xlu1 %v388_v17  ;;  %383 = vadd.xlane.f32.xlu0 %v382_v18 }
 0x1aa   :  { %v387_v19 = vpop.xlane.xlu1 %386  ;;  %v381_v20 = vpop.xlane.xlu0 %380 }
 0x1ab   :  { %v394_v21 = vmul.f32 0.00390625, %v387_v19  ;;  %v392_v22 = vmul.f32 0.00390625, %v381_v20 }
 0x1ad   :  { %v396_v23 = vsub.f32 %v371_v6, %v392_v22  ;;  %v397_v24 = vsub.f32 %v372_v10, %v392_v22  ;;  %v400_v25 = vsub.f32 %v375_v5, %v394_v21  ;;  %v401_v26 = vsub.f32 %v376_v9, %v394_v21 }
 0x1ae   :  { %v390_v27 = vpop.xlane.xlu1 %389  ;;  %v384_v28 = vpop.xlane.xlu0 %383 }
 0x1af   :  { %v395_v29 = vmul.f32 0.00390625, %v390_v27  ;;  %v393_v30 = vmul.f32 0.00390625, %v384_v28  ;;  %v404_v31 = vmul.f32 %v396_v23, %v396_v23  ;;  %v405_v32 = vmul.f32 %v397_v24, %v397_v24 }
 0x1b0   :  { %v408_v39 = vmul.f32 %v400_v25, %v400_v25  ;;  %v409_v41 = vmul.f32 %v401_v26, %v401_v26 }
 0x1b1   :  { %v818_v33 = vsub.f32 %v377_v12, %v395_v29  ;;  %v820_v34 = vsub.f32 %v378_v14, %v395_v29  ;;  %v398_v35 = vsub.f32 %v373_v11, %v393_v30  ;;  %v399_v36 = vsub.f32 %v374_v13, %v393_v30 }
 0x1b2   :  { %v412_v37 = vadd.f32 %v405_v32, %v404_v31  ;;  %v418_v47 = vadd.f32 %v409_v41, %v408_v39 }
 0x1b3   :  { %v406_v42 = vmul.f32 %v398_v35, %v398_v35  ;;  %v407_v43 = vmul.f32 %v399_v36, %v399_v36  ;;  %v410_v45 = vmul.f32 %v818_v33, %v818_v33  ;;  %v411_v46 = vmul.f32 %v820_v34, %v820_v34 }
 0x1b4   :  { %413 = vadd.xlane.f32.xlu0 %v412_v37 }
 0x1b5   :  { %v415_v44 = vadd.f32 %v407_v43, %v406_v42  ;;  %v421_v48 = vadd.f32 %v411_v46, %v410_v45 }
 0x1b7   :  { %416 = vadd.xlane.f32.xlu1 %v415_v44 }
 0x1b8   :  { %419 = vadd.xlane.f32.xlu0 %v418_v47 }
 0x1bb   :  { %422 = vadd.xlane.f32.xlu1 %v421_v48 }
 0x241   :  { %v414_v49 = vpop.xlane.xlu0 %413 }
 0x242   :  { %v424_v50 = vmul.f32 0.00390625, %v414_v49 }
 0x244   :  { %v428_v51 = vadd.f32 1e-12, %v424_v50  ;;  %v417_v52 = vpop.xlane.xlu1 %416 }
 0x245   :  { %v425_v53 = vmul.f32 0.00390625, %v417_v52  ;;  %v420_v54 = vpop.xlane.xlu0 %419 }
 0x246   :  { %646 = vrsqrt.f32 %v428_v51  ;;  %v426_v55 = vmul.f32 0.00390625, %v420_v54 }
 0x247   :  { %v429_v56 = vadd.f32 1e-12, %v425_v53 }
 0x248   :  { %v430_v57 = vadd.f32 1e-12, %v426_v55  ;;  %v423_v58 = vpop.xlane.xlu1 %422 }
 0x249   :  { %648 = vrsqrt.f32 %v429_v56  ;;  %v427_v59 = vmul.f32 0.00390625, %v423_v58 }
 0x24a   :  { %650 = vrsqrt.f32 %v430_v57 }
 0x24b   :  { %v431_v60 = vadd.f32 1e-12, %v427_v59 }
 0x24d   :  { %652 = vrsqrt.f32 %v431_v60 }
 0x250   :  { %v647_v1 = vpop.eup %646 }
 0x251   :  { %v436_v4 = vmul.f32 %v647_v1, %v396_v23  ;;  %v437_v5 = vmul.f32 %v647_v1, %v397_v24 }
 0x253   :  { %v649_v6 = vpop.eup %648  ;;  %v456_v7 = vmul.f32 %v449_v63, %v436_v4  ;;  %v457_v8 = vmul.f32 %v453_v0, %v437_v5 }
 0x254   :  { %v651_v9 = vpop.eup %650  ;;  %v438_v10 = vmul.f32 %v649_v6, %v398_v35  ;;  %v439_v11 = vmul.f32 %v649_v6, %v399_v36 }
 0x255   :  { %v476_v12 = vadd.f32 %v469_v2, %v456_v7  ;;  %v477_v13 = vadd.f32 %v473_v3, %v457_v8  ;;  %v440_v14 = vmul.f32 %v651_v9, %v400_v25  ;;  %v441_v15 = vmul.f32 %v651_v9, %v401_v26 }
 0x256   :  { %v458_v16 = vmul.f32 %v449_v63, %v438_v10  ;;  %v459_v17 = vmul.f32 %v453_v0, %v439_v11 }
 0x257   :  { %v653_v18 = vpop.eup %652  ;;  %v556_v19 = vpack.c.bf16 %v477_v13, %v476_v12  ;;  %v460_v20 = vmul.f32 %v449_v63, %v440_v14  ;;  %v461_v38 = vmul.f32 %v453_v0, %v441_v15 }
 0x258   :  { %v478_v21 = vadd.f32 %v469_v2, %v458_v16  ;;  %v479_v40 = vadd.f32 %v473_v3, %v459_v17  ;;  %v442_v22 = vmul.f32 %v653_v18, %v818_v33  ;;  %v443_v23 = vmul.f32 %v653_v18, %v820_v34 }
 0x259   :  { %508 = vst [vmem:[%s856_s6] sm:$0xff] %v556_v19  ;;  %v480_v24 = vadd.f32 %v469_v2, %v460_v20  ;;  %v481_v27 = vadd.f32 %v473_v3, %v461_v38 }
 0x25a   :  { %v557_v25 = vpack.c.bf16 %v479_v40, %v478_v21  ;;  %v462_v26 = vmul.f32 %v449_v63, %v442_v22  ;;  %v463_v28 = vmul.f32 %v453_v0, %v443_v23 }
 0x25b   :  { %v558_v29 = vpack.c.bf16 %v481_v27, %v480_v24 }
 0x25c   :  { %509 = vst [vmem:[%s856_s6 + $0x8] sm:$0xff] %v557_v25  ;;  %v482_v30 = vadd.f32 %v469_v2, %v462_v26  ;;  %v483_v31 = vadd.f32 %v473_v3, %v463_v28 }
 0x25d   :  { %510 = vst [vmem:[%s856_s6 + $0x10] sm:$0xff] %v558_v29 }
 0x25e   :  { %v559_v32 = vpack.c.bf16 %v483_v31, %v482_v30 }
 0x260   :  { %511 = vst [vmem:[%s856_s6 + $0x18] sm:$0xff] %v559_v32 }

// kernel: bert_classifier_forward.13
= control target key start
LH: loop header
LB: loop body
LE: loop exit
PB: predicated region body
PF: predicated region fallthrough
CT: control target
= control target key end

     0   :  { %8 = vsyncpa [#allocation4], 0  ;;  %s1392_s12 = smov [#allocation3]   ;;  %s1505_s0 = inlined_call_operand.vmem [shape: bf16[32,256], index: 0, kind: input, shape index: {}]   ;;  %s1506_s1 = inlined_call_operand.hbm [shape: bf16[256,768], index: 1, kind: input, shape index: {}]   ;;  %s1507_s2 = inlined_call_operand.vmem [shape: f32[1,768], index: 2, kind: input, shape index: {}]   ;;  %s1508_s3 = inlined_call_operand.vmem [shape: bf16[32,768], index: 3, kind: output, shape index: {}]  }
   0x1   :  { %s16_s13 = sshll.u32 %s1392_s12, 4  ;;  %s1368_s16 = scalar_lea.hbm %s1506_s1, 12288  ;;  %s17_s13 = int_to_ptr.vmem [resolvable:$true] %s16_s13 }
   0x2   :  { %p1369_p0 = scmp.ne.s32.totalorder %s1506_s1, %s1368_s16  ;;  %p1372_p1 = scmp.lt.u32.totalorder %s1368_s16, %s1506_s1 }
   0x4   :  { %p1374_p2 = pnand %p1372_p1, %p1369_p0 }
   0x6   :  { %1377 = shalt.err (!%p1374_p2)
}
   0x7   :  { %s1378_s21 = scalar_lea.vmem %s17_s13, 12288  ;;  %p1383_p4 = scmp.lt.s32.totalorder %s17_s13, %s17_s13 }
   0x8   :  { %p1379_p3 = scmp.ne.s32.totalorder %s17_s13, %s1378_s21  ;;  %p1384_p5 = scmp.lt.s32.totalorder %s1378_s21, %s1378_s21 }
   0xa   :  { %p1385_p6 = por %p1384_p5, %p1383_p4 }
   0xc   :  { %p1386_p7 = pnand %p1385_p6, %p1379_p3 }
   0xe   :  { %1389 = shalt.err (!%p1386_p7)
}
   0xf   :  { %s1393_s22 = smov 384   ;;  %s1394_s23 = smov 24  }
  0x10   :  { %22 = dma.hbm_to_vmem [thread:$0]  %s1506_s1, 12288, %s17_s13, [#allocation4], %s1393_s22, %s1393_s22, %s1394_s23  }
  0x11   :  { %1390 = dma.done.wait [#allocation4], 12288  }
  0x12   :  { %1391 = vsyncadd [#allocation4], 4294955008  ;;  %v1218_v0 = vld [vmem:[#allocation3 + $0x4] ss:$24 sps:$4 sm:$0xff]   ;;  %v1222_v2 = vld [vmem:[#allocation3] ss:$24 sps:$4 sm:$0xff]  }
  0x13   :  { %v1220_v1 = vld [vmem:[#allocation3 + $0xc] ss:$24 sps:$4 sm:$0xff]   ;;  %680 = vmatprep.subr.bf16.mxu0 %v1218_v0  ;;  %v1223_v3 = vld [vmem:[#allocation3 + $0x8] ss:$24 sps:$4 sm:$0xff]   ;;  %v1226_v5 = vld [vmem:[#allocation3 + $0x3c] ss:$24 sps:$4 sm:$0xff]  }
  0x14   :  { %733 = vmatprep.subr.bf16.mxu1 %v1220_v1  ;;  %v1224_v4 = vld [vmem:[#allocation3 + $0x34] ss:$24 sps:$4 sm:$0xff]   ;;  %681 = vmatpush1.bf16.msra.mxu0 %v1222_v2  ;;  %v1228_v6 = vld [vmem:[#allocation3 + $0x30] ss:$24 sps:$4 sm:$0xff]   ;;  %v1230_v8 = vld [vmem:[#allocation3 + $0x64] ss:$24 sps:$4 sm:$0xff]  }
  0x15   :  { %734 = vmatpush1.bf16.msra.mxu1 %v1223_v3  ;;  %682 = vmatprep.subr.bf16.mxu0 %v1224_v4  ;;  %v1229_v7 = vld [vmem:[#allocation3 + $0x38] ss:$24 sps:$4 sm:$0xff]   ;;  %v1232_v9 = vld [vmem:[#allocation3 + $0x6c] ss:$24 sps:$4 sm:$0xff]   ;;  %v1235_v11 = vld [vmem:[#allocation3 + $0x68] ss:$24 sps:$4 sm:$0xff]  }
  0x16   :  { %735 = vmatprep.subr.bf16.mxu1 %v1226_v5  ;;  %v1234_v10 = vld [vmem:[#allocation3 + $0x60] ss:$24 sps:$4 sm:$0xff]   ;;  %v1236_v12 = vld [vmem:[#allocation3 + $0x94] ss:$24 sps:$4 sm:$0xff]   ;;  %v1240_v14 = vld [vmem:[#allocation3 + $0x90] ss:$24 sps:$4 sm:$0xff]  }
  0x17   :  { %v1238_v13 = vld [vmem:[#allocation3 + $0x9c] ss:$24 sps:$4 sm:$0xff]   ;;  %v1241_v15 = vld [vmem:[#allocation3 + $0x98] ss:$24 sps:$4 sm:$0xff]   ;;  %v1244_v17 = vld [vmem:[#allocation3 + $0xcc] ss:$24 sps:$4 sm:$0xff]  }
  0x18   :  { %683 = vmatpush1.bf16.msra.mxu0 %v1228_v6  ;;  %v1242_v16 = vld [vmem:[#allocation3 + $0xc4] ss:$24 sps:$4 sm:$0xff]   ;;  %v1246_v18 = vld [vmem:[#allocation3 + $0xc0] ss:$24 sps:$4 sm:$0xff]   ;;  %v1248_v20 = vld [vmem:[#allocation3 + $0xf4] ss:$24 sps:$4 sm:$0xff]  }
  0x19   :  { %736 = vmatpush1.bf16.msra.mxu1 %v1229_v7  ;;  %684 = vmatprep.subr.bf16.mxu0 %v1230_v8  ;;  %v1247_v19 = vld [vmem:[#allocation3 + $0xc8] ss:$24 sps:$4 sm:$0xff]   ;;  %v1250_v21 = vld [vmem:[#allocation3 + $0xfc] ss:$24 sps:$4 sm:$0xff]   ;;  %v1253_v23 = vld [vmem:[#allocation3 + $0xf8] ss:$24 sps:$4 sm:$0xff]  }
  0x1a   :  { %737 = vmatprep.subr.bf16.mxu1 %v1232_v9  ;;  %v1252_v22 = vld [vmem:[#allocation3 + $0xf0] ss:$24 sps:$4 sm:$0xff]   ;;  %v1254_v24 = vld [vmem:[#allocation3 + $0x124] ss:$24 sps:$4 sm:$0xff]   ;;  %v1258_v26 = vld [vmem:[#allocation3 + $0x120] ss:$24 sps:$4 sm:$0xff]  }
  0x1b   :  { %v1256_v25 = vld [vmem:[#allocation3 + $0x12c] ss:$24 sps:$4 sm:$0xff]   ;;  %v1259_v27 = vld [vmem:[#allocation3 + $0x128] ss:$24 sps:$4 sm:$0xff]   ;;  %v1262_v29 = vld [vmem:[#allocation3 + $0x15c] ss:$24 sps:$4 sm:$0xff]  }
  0x1c   :  { %685 = vmatpush1.bf16.msra.mxu0 %v1234_v10  ;;  %v1260_v28 = vld [vmem:[#allocation3 + $0x154] ss:$24 sps:$4 sm:$0xff]   ;;  %v1264_v30 = vld [vmem:[#allocation3 + $0x150] ss:$24 sps:$4 sm:$0xff]   ;;  %v1266_v32 = vld [vmem:[#allocation3 + $0x184] ss:$24 sps:$4 sm:$0xff]  }
  0x1d   :  { %738 = vmatpush1.bf16.msra.mxu1 %v1235_v11  ;;  %686 = vmatprep.subr.bf16.mxu0 %v1236_v12  ;;  %v1265_v31 = vld [vmem:[#allocation3 + $0x158] ss:$24 sps:$4 sm:$0xff]   ;;  %v1268_v33 = vld [vmem:[#allocation3 + $0x18c] ss:$24 sps:$4 sm:$0xff]   ;;  %v1271_v35 = vld [vmem:[#allocation3 + $0x188] ss:$24 sps:$4 sm:$0xff]  }
  0x1e   :  { %739 = vmatprep.subr.bf16.mxu1 %v1238_v13  ;;  %v1270_v34 = vld [vmem:[#allocation3 + $0x180] ss:$24 sps:$4 sm:$0xff]   ;;  %v1272_v36 = vld [vmem:[#allocation3 + $0x1b4] ss:$24 sps:$4 sm:$0xff]   ;;  %v1276_v38 = vld [vmem:[#allocation3 + $0x1b0] ss:$24 sps:$4 sm:$0xff]  }
  0x1f   :  { %v1274_v37 = vld [vmem:[#allocation3 + $0x1bc] ss:$24 sps:$4 sm:$0xff]   ;;  %v1277_v39 = vld [vmem:[#allocation3 + $0x1b8] ss:$24 sps:$4 sm:$0xff]   ;;  %v1280_v41 = vld [vmem:[#allocation3 + $0x1ec] ss:$24 sps:$4 sm:$0xff]  }
  0x20   :  { %687 = vmatpush1.bf16.msra.mxu0 %v1240_v14  ;;  %v1278_v40 = vld [vmem:[#allocation3 + $0x1e4] ss:$24 sps:$4 sm:$0xff]   ;;  %v1282_v42 = vld [vmem:[#allocation3 + $0x1e0] ss:$24 sps:$4 sm:$0xff]   ;;  %v1284_v44 = vld [vmem:[#allocation3 + $0x214] ss:$24 sps:$4 sm:$0xff]  }
  0x21   :  { %740 = vmatpush1.bf16.msra.mxu1 %v1241_v15  ;;  %688 = vmatprep.subr.bf16.mxu0 %v1242_v16  ;;  %v1283_v43 = vld [vmem:[#allocation3 + $0x1e8] ss:$24 sps:$4 sm:$0xff]   ;;  %v1286_v45 = vld [vmem:[#allocation3 + $0x21c] ss:$24 sps:$4 sm:$0xff]   ;;  %v1289_v47 = vld [vmem:[#allocation3 + $0x218] ss:$24 sps:$4 sm:$0xff]  }
  0x22   :  { %741 = vmatprep.subr.bf16.mxu1 %v1244_v17  ;;  %v1288_v46 = vld [vmem:[#allocation3 + $0x210] ss:$24 sps:$4 sm:$0xff]   ;;  %v1430_v48 = vld [vmem:[%s1505_s0 + $0x4] ss:$8 sps:$4 sm:$0xff]   ;;  %v1294_v51 = vld [vmem:[#allocation3 + $0x240] ss:$24 sps:$4 sm:$0xff]  }
  0x23   :  { %v1290_v49 = vld [vmem:[#allocation3 + $0x244] ss:$24 sps:$4 sm:$0xff]   ;;  %712 = vmatprep.mubr.bf16.mxu0 %v1430_v48  ;;  %765 = vmatprep.mubr.bf16.mxu1 %v1430_v48  ;;  %v1295_v52 = vld [vmem:[#allocation3 + $0x248] ss:$24 sps:$4 sm:$0xff]   ;;  %v1296_v53 = vld [vmem:[#allocation3 + $0x274] ss:$24 sps:$4 sm:$0xff]  }
  0x24   :  { %689 = vmatpush1.bf16.msra.mxu0 %v1246_v18  ;;  %v1292_v50 = vld [vmem:[#allocation3 + $0x24c] ss:$24 sps:$4 sm:$0xff]   ;;  %v1298_v54 = vld [vmem:[#allocation3 + $0x27c] ss:$24 sps:$4 sm:$0xff]   ;;  %v1300_v55 = vld [vmem:[#allocation3 + $0x270] ss:$24 sps:$4 sm:$0xff]  }
  0x25   :  { %742 = vmatpush1.bf16.msra.mxu1 %v1247_v19  ;;  %690 = vmatprep.subr.bf16.mxu0 %v1248_v20  ;;  %v1301_v56 = vld [vmem:[#allocation3 + $0x278] ss:$24 sps:$4 sm:$0xff]   ;;  %v1302_v57 = vld [vmem:[#allocation3 + $0x2a4] ss:$24 sps:$4 sm:$0xff]   ;;  %v1307_v60 = vld [vmem:[#allocation3 + $0x2a8] ss:$24 sps:$4 sm:$0xff]  }
  0x26   :  { %743 = vmatprep.subr.bf16.mxu1 %v1250_v21  ;;  %v1304_v58 = vld [vmem:[#allocation3 + $0x2ac] ss:$24 sps:$4 sm:$0xff]   ;;  %v1306_v59 = vld [vmem:[#allocation3 + $0x2a0] ss:$24 sps:$4 sm:$0xff]   ;;  %v1310_v62 = vld [vmem:[#allocation3 + $0x2dc] ss:$24 sps:$4 sm:$0xff]  }
  0x27   :  { %v1308_v61 = vld [vmem:[#allocation3 + $0x2d4] ss:$24 sps:$4 sm:$0xff]   ;;  %v1312_v63 = vld [vmem:[#allocation3 + $0x2d0] ss:$24 sps:$4 sm:$0xff]   ;;  %v1322_v4 = vld [vmem:[#allocation3 + $0x44] ss:$24 sps:$4 sm:$0xff]  }
  0x28   :  { %691 = vmatpush1.bf16.msra.mxu0 %v1252_v22  ;;  %v1313_v0 = vld [vmem:[#allocation3 + $0x2d8] ss:$24 sps:$4 sm:$0xff]   ;;  %v1319_v1 = vld [vmem:[#allocation3 + $0x14] ss:$24 sps:$4 sm:$0xff]   ;;  %v1437_v2 = vld [vmem:[%s1505_s0] ss:$8 sps:$4 sm:$0xff]  }
  0x29   :  { %744 = vmatpush1.bf16.msra.mxu1 %v1253_v23  ;;  %692 = vmatprep.subr.bf16.mxu0 %v1254_v24  ;;  %v1317_v3 = vld [vmem:[#allocation3 + $0x10] ss:$24 sps:$4 sm:$0xff]   ;;  %v1356_v5 = vld [vmem:[%s1505_s0 + $0x14] ss:$8 sps:$4 sm:$0xff]   ;;  %v1320_v6 = vld [vmem:[#allocation3 + $0x40] ss:$24 sps:$4 sm:$0xff]  }
  0x2a   :  { %745 = vmatprep.subr.bf16.mxu1 %v1256_v25  ;;  %v1325_v7 = vld [vmem:[#allocation3 + $0x74] ss:$24 sps:$4 sm:$0xff]   ;;  %v1447_v8 = vld [vmem:[%s1505_s0 + $0x10] ss:$8 sps:$4 sm:$0xff]   ;;  %v1328_v10 = vld [vmem:[#allocation3 + $0xa4] ss:$24 sps:$4 sm:$0xff]  }
  0x2b   :  { %v1323_v9 = vld [vmem:[#allocation3 + $0x70] ss:$24 sps:$4 sm:$0xff]   ;;  %v1326_v11 = vld [vmem:[#allocation3 + $0xa0] ss:$24 sps:$4 sm:$0xff]   ;;  %v1331_v12 = vld [vmem:[#allocation3 + $0xd4] ss:$24 sps:$4 sm:$0xff]  }
  0x2c   :  { %693 = vmatpush1.bf16.msra.mxu0 %v1258_v26  ;;  %v1329_v13 = vld [vmem:[#allocation3 + $0xd0] ss:$24 sps:$4 sm:$0xff]   ;;  %v1334_v14 = vld [vmem:[#allocation3 + $0x104] ss:$24 sps:$4 sm:$0xff]   ;;  %v1332_v15 = vld [vmem:[#allocation3 + $0x100] ss:$24 sps:$4 sm:$0xff]  }
  0x2d   :  { %746 = vmatpush1.bf16.msra.mxu1 %v1259_v27  ;;  %694 = vmatprep.subr.bf16.mxu0 %v1260_v28  ;;  %v1337_v16 = vld [vmem:[#allocation3 + $0x134] ss:$24 sps:$4 sm:$0xff]   ;;  %v1335_v17 = vld [vmem:[#allocation3 + $0x130] ss:$24 sps:$4 sm:$0xff]   ;;  %v1340_v18 = vld [vmem:[#allocation3 + $0x164] ss:$24 sps:$4 sm:$0xff]  }
  0x2e   :  { %747 = vmatprep.subr.bf16.mxu1 %v1262_v29  ;;  %v1338_v19 = vld [vmem:[#allocation3 + $0x160] ss:$24 sps:$4 sm:$0xff]   ;;  %v1343_v20 = vld [vmem:[#allocation3 + $0x194] ss:$24 sps:$4 sm:$0xff]   ;;  %v1341_v21 = vld [vmem:[#allocation3 + $0x190] ss:$24 sps:$4 sm:$0xff]  }
  0x2f   :  { %v1346_v22 = vld [vmem:[#allocation3 + $0x1c4] ss:$24 sps:$4 sm:$0xff]   ;;  %v1344_v23 = vld [vmem:[#allocation3 + $0x1c0] ss:$24 sps:$4 sm:$0xff]   ;;  %v1349_v24 = vld [vmem:[#allocation3 + $0x1f4] ss:$24 sps:$4 sm:$0xff]  }
  0x30   :  { %695 = vmatpush1.bf16.msra.mxu0 %v1264_v30  ;;  %v1347_v25 = vld [vmem:[#allocation3 + $0x1f0] ss:$24 sps:$4 sm:$0xff]   ;;  %v1352_v26 = vld [vmem:[#allocation3 + $0x224] ss:$24 sps:$4 sm:$0xff]   ;;  %v1350_v27 = vld [vmem:[#allocation3 + $0x220] ss:$24 sps:$4 sm:$0xff]  }
  0x31   :  { %748 = vmatpush1.bf16.msra.mxu1 %v1265_v31  ;;  %696 = vmatprep.subr.bf16.mxu0 %v1266_v32  ;;  %v1355_v28 = vld [vmem:[#allocation3 + $0x254] ss:$24 sps:$4 sm:$0xff]   ;;  %v1353_v29 = vld [vmem:[#allocation3 + $0x250] ss:$24 sps:$4 sm:$0xff]   ;;  %v1360_v30 = vld [vmem:[#allocation3 + $0x284] ss:$24 sps:$4 sm:$0xff]  }
  0x32   :  { %749 = vmatprep.subr.bf16.mxu1 %v1268_v33  ;;  %v1358_v31 = vld [vmem:[#allocation3 + $0x280] ss:$24 sps:$4 sm:$0xff]   ;;  %v1364_v32 = vld [vmem:[#allocation3 + $0x2b4] ss:$24 sps:$4 sm:$0xff]   ;;  %v1362_v33 = vld [vmem:[#allocation3 + $0x2b0] ss:$24 sps:$4 sm:$0xff]  }
  0x34   :  { %697 = vmatpush1.bf16.msra.mxu0 %v1270_v34  ;;  %v1367_v34 = vld [vmem:[#allocation3 + $0x2e4] ss:$24 sps:$4 sm:$0xff]  }
  0x35   :  { %750 = vmatpush1.bf16.msra.mxu1 %v1271_v35  ;;  %698 = vmatprep.subr.bf16.mxu0 %v1272_v36  ;;  %v1365_v35 = vld [vmem:[#allocation3 + $0x2e0] ss:$24 sps:$4 sm:$0xff]   ;;  %v916_v36 = vlaneseq }
  0x36   :  { %751 = vmatprep.subr.bf16.mxu1 %v1274_v37 }
  0x37   :  { %v917_v37 = vshrl.u32 %v916_v36, 7 }
  0x38   :  { %699 = vmatpush1.bf16.msra.mxu0 %v1276_v38 }
  0x39   :  { %752 = vmatpush1.bf16.msra.mxu1 %v1277_v39  ;;  %700 = vmatprep.subr.bf16.mxu0 %v1278_v40  ;;  %v934_v38 = vsub.s32 4, %v917_v37  ;;  %v914_v39 = vld [vmem:[%s1507_s2] sm:$0x3f]  ;;  %v938_v40 = vsub.s32 5, %v917_v37 }
  0x3a   :  { %753 = vmatprep.subr.bf16.mxu1 %v1280_v41 }
  0x3b   :  { %v1457_v41 = vrot.slane %v914_v39, %v934_v38 }
  0x3c   :  { %701 = vmatpush1.bf16.msra.mxu0 %v1282_v42  ;;  %v1459_v42 = vrot.slane %v914_v39, %v938_v40 }
  0x3d   :  { %754 = vmatpush1.bf16.msra.mxu1 %v1283_v43  ;;  %702 = vmatprep.subr.bf16.mxu0 %v1284_v44  ;;  %v918_v43 = vsub.s32 0, %v917_v37  ;;  %v926_v44 = vsub.s32 2, %v917_v37 }
  0x3e   :  { %755 = vmatprep.subr.bf16.mxu1 %v1286_v45  ;;  %v922_v45 = vsub.s32 1, %v917_v37 }
  0x40   :  { %703 = vmatpush1.bf16.msra.mxu0 %v1288_v46  ;;  %v930_v46 = vsub.s32 3, %v917_v37 }
  0x41   :  { %756 = vmatpush1.bf16.msra.mxu1 %v1289_v47  ;;  %704 = vmatprep.subr.bf16.mxu0 %v1290_v49  ;;  %v919_v47 = vrot.slane %v914_v39, %v918_v43  ;;  %v923_v49 = vrot.slane %v914_v39, %v922_v45 }
  0x42   :  { %757 = vmatprep.subr.bf16.mxu1 %v1292_v50  ;;  %v931_v50 = vrot.slane %v914_v39, %v930_v46 }
  0x44   :  { %705 = vmatpush1.bf16.msra.mxu0 %v1294_v51 }
  0x45   :  { %758 = vmatpush1.bf16.msra.mxu1 %v1295_v52  ;;  %706 = vmatprep.subr.bf16.mxu0 %v1296_v53 }
  0x46   :  { %759 = vmatprep.subr.bf16.mxu1 %v1298_v54 }
  0x48   :  { %707 = vmatpush1.bf16.msra.mxu0 %v1300_v55 }
  0x49   :  { %760 = vmatpush1.bf16.msra.mxu1 %v1301_v56  ;;  %708 = vmatprep.subr.bf16.mxu0 %v1302_v57 }
  0x4a   :  { %761 = vmatprep.subr.bf16.mxu1 %v1304_v58 }
  0x4c   :  { %709 = vmatpush1.bf16.msra.mxu0 %v1306_v59 }
  0x4d   :  { %762 = vmatpush1.bf16.msra.mxu1 %v1307_v60  ;;  %710 = vmatprep.subr.bf16.mxu0 %v1308_v61 }
  0x4e   :  { %763 = vmatprep.subr.bf16.mxu1 %v1310_v62 }
  0x50   :  { %711 = vmatpush1.bf16.msra.mxu0 %v1312_v63 }
  0x51   :  { %764 = vmatpush1.bf16.msra.mxu1 %v1313_v0  ;;  %786 = vmatprep.subr.bf16.mxu0 %v1319_v1 }
  0x52   :  { %1183 = vmatprep.subr.bf16.mxu1 %v1319_v1 }
  0x53   :  { %713 = vmatmul.mubr.bf16.vlgmr.msra.gmra.mrb[0].mxu0 %v1437_v2 }
  0x54   :  { %766 = vmatmul.mubr.bf16.vlgmr.msra.gmra.mrb[0].mxu1 %v1437_v2  ;;  %787 = vmatpush1.bf16.msra.mxu0 %v1317_v3 }
  0x55   :  { %1199 = vmatpush1.bf16.msra.mxu1 %v1317_v3  ;;  %788 = vmatprep.subr.bf16.mxu0 %v1322_v4 }
  0x56   :  { %1184 = vmatprep.subr.bf16.mxu1 %v1322_v4  ;;  %722 = vmatprep.mubr.bf16.mxu0 %v1356_v5 }
  0x57   :  { %775 = vmatprep.mubr.bf16.mxu1 %v1356_v5 }
  0x58   :  { %789 = vmatpush1.bf16.msra.mxu0 %v1320_v6 }
  0x59   :  { %1200 = vmatpush1.bf16.msra.mxu1 %v1320_v6  ;;  %790 = vmatprep.subr.bf16.mxu0 %v1325_v7 }
  0x5a   :  { %1185 = vmatprep.subr.bf16.mxu1 %v1325_v7 }
  0x5b   :  { %723 = vmatmul.mubr.bf16.gmra.mrb[4].mxu0 %v1447_v8 }
  0x5c   :  { %776 = vmatmul.mubr.bf16.gmra.mrb[4].mxu1 %v1447_v8  ;;  %791 = vmatpush1.bf16.msra.mxu0 %v1323_v9 }
  0x5d   :  { %1201 = vmatpush1.bf16.msra.mxu1 %v1323_v9  ;;  %792 = vmatprep.subr.bf16.mxu0 %v1328_v10 }
  0x5e   :  { %1186 = vmatprep.subr.bf16.mxu1 %v1328_v10  ;;  %818 = vmatprep.mubr.bf16.mxu0 %v1430_v48  ;;  %v927_v48 = vrot.slane %v914_v39, %v926_v44 }
  0x5f   :  { %828 = vmatprep.mubr.bf16.mxu1 %v1356_v5 }
  0x60   :  { %793 = vmatpush1.bf16.msra.mxu0 %v1326_v11 }
  0x61   :  { %1202 = vmatpush1.bf16.msra.mxu1 %v1326_v11  ;;  %794 = vmatprep.subr.bf16.mxu0 %v1331_v12 }
  0x62   :  { %1187 = vmatprep.subr.bf16.mxu1 %v1331_v12 }
  0x64   :  { %795 = vmatpush1.bf16.msra.mxu0 %v1329_v13 }
  0x65   :  { %1203 = vmatpush1.bf16.msra.mxu1 %v1329_v13  ;;  %796 = vmatprep.subr.bf16.mxu0 %v1334_v14 }
  0x66   :  { %1188 = vmatprep.subr.bf16.mxu1 %v1334_v14 }
  0x68   :  { %797 = vmatpush1.bf16.msra.mxu0 %v1332_v15 }
  0x69   :  { %1204 = vmatpush1.bf16.msra.mxu1 %v1332_v15  ;;  %798 = vmatprep.subr.bf16.mxu0 %v1337_v16 }
  0x6a   :  { %1189 = vmatprep.subr.bf16.mxu1 %v1337_v16 }
  0x6c   :  { %799 = vmatpush1.bf16.msra.mxu0 %v1335_v17 }
  0x6d   :  { %1205 = vmatpush1.bf16.msra.mxu1 %v1335_v17  ;;  %800 = vmatprep.subr.bf16.mxu0 %v1340_v18 }
  0x6e   :  { %1190 = vmatprep.subr.bf16.mxu1 %v1340_v18 }
  0x70   :  { %801 = vmatpush1.bf16.msra.mxu0 %v1338_v19 }
  0x71   :  { %1206 = vmatpush1.bf16.msra.mxu1 %v1338_v19  ;;  %802 = vmatprep.subr.bf16.mxu0 %v1343_v20 }
  0x72   :  { %1191 = vmatprep.subr.bf16.mxu1 %v1343_v20 }
  0x74   :  { %803 = vmatpush1.bf16.msra.mxu0 %v1341_v21 }
  0x75   :  { %1207 = vmatpush1.bf16.msra.mxu1 %v1341_v21  ;;  %804 = vmatprep.subr.bf16.mxu0 %v1346_v22 }
  0x76   :  { %1192 = vmatprep.subr.bf16.mxu1 %v1346_v22 }
  0x78   :  { %805 = vmatpush1.bf16.msra.mxu0 %v1344_v23 }
  0x79   :  { %1208 = vmatpush1.bf16.msra.mxu1 %v1344_v23  ;;  %806 = vmatprep.subr.bf16.mxu0 %v1349_v24 }
  0x7a   :  { %1193 = vmatprep.subr.bf16.mxu1 %v1349_v24 }
  0x7c   :  { %807 = vmatpush1.bf16.msra.mxu0 %v1347_v25 }
  0x7d   :  { %1209 = vmatpush1.bf16.msra.mxu1 %v1347_v25  ;;  %808 = vmatprep.subr.bf16.mxu0 %v1352_v26 }
  0x7e   :  { %1194 = vmatprep.subr.bf16.mxu1 %v1352_v26 }
  0x80   :  { %809 = vmatpush1.bf16.msra.mxu0 %v1350_v27 }
  0x81   :  { %1210 = vmatpush1.bf16.msra.mxu1 %v1350_v27  ;;  %810 = vmatprep.subr.bf16.mxu0 %v1355_v28 }
  0x82   :  { %1195 = vmatprep.subr.bf16.mxu1 %v1355_v28 }
  0x84   :  { %811 = vmatpush1.bf16.msra.mxu0 %v1353_v29 }
  0x85   :  { %1211 = vmatpush1.bf16.msra.mxu1 %v1353_v29  ;;  %812 = vmatprep.subr.bf16.mxu0 %v1360_v30 }
  0x86   :  { %1196 = vmatprep.subr.bf16.mxu1 %v1360_v30 }
  0x88   :  { %813 = vmatpush1.bf16.msra.mxu0 %v1358_v31 }
  0x89   :  { %1212 = vmatpush1.bf16.msra.mxu1 %v1358_v31  ;;  %814 = vmatprep.subr.bf16.mxu0 %v1364_v32 }
  0x8a   :  { %1197 = vmatprep.subr.bf16.mxu1 %v1364_v32 }
  0x8c   :  { %815 = vmatpush1.bf16.msra.mxu0 %v1362_v33 }
  0x8d   :  { %1213 = vmatpush1.bf16.msra.mxu1 %v1362_v33  ;;  %816 = vmatprep.subr.bf16.mxu0 %v1367_v34 }
  0x8e   :  { %1198 = vmatprep.subr.bf16.mxu1 %v1367_v34 }
  0x90   :  { %817 = vmatpush1.bf16.msra.mxu0 %v1365_v35 }
  0x91   :  { %1214 = vmatpush1.bf16.msra.mxu1 %v1365_v35 }
  0x93   :  { %819 = vmatmul.mubr.bf16.vlgmr.msra.gmra.mrb[8].mxu0 %v1437_v2 }
  0x94   :  { %829 = vmatmul.mubr.bf16.vlgmr.msra.gmra.mrb[8].mxu1 %v1447_v8 }
 0x126   :  { %v714_v51 = vpop.f32.mrb[0].mxu0 }
 0x127   :  { %v767_v52 = vpop.f32.mrb[0].mxu1  ;;  %v946_v53 = vadd.f32 %v919_v47, %v714_v51  ;;  %v716_v55 = vpop.f32.mrb[1].mxu0 }
 0x128   :  { %v948_v54 = vadd.f32 %v927_v48, %v767_v52  ;;  %v769_v56 = vpop.f32.mrb[1].mxu1  ;;  %v947_v57 = vadd.f32 %v923_v49, %v716_v55  ;;  %v718_v59 = vpop.f32.mrb[2].mxu0 }
 0x129   :  { %v949_v58 = vadd.f32 %v931_v50, %v769_v56  ;;  %v771_v60 = vpop.f32.mrb[2].mxu1  ;;  %v952_v61 = vadd.f32 %v919_v47, %v718_v59  ;;  %v720_v63 = vpop.f32.mrb[3].mxu0 }
 0x12a   :  { %v954_v62 = vadd.f32 %v927_v48, %v771_v60  ;;  %v773_v0 = vpop.f32.mrb[3].mxu1  ;;  %v1171_v1 = vpack.c.bf16 %v947_v57, %v946_v53  ;;  %v953_v3 = vadd.f32 %v923_v49, %v720_v63 }
 0x12b   :  { %v1172_v2 = vpack.c.bf16 %v949_v58, %v948_v54  ;;  %v955_v4 = vadd.f32 %v931_v50, %v773_v0 }
 0x12c   :  { %1042 = vst [vmem:[%s1508_s3] sm:$0xff] %v1171_v1  ;;  %v1174_v5 = vpack.c.bf16 %v953_v3, %v952_v61 }
 0x12d   :  { %1043 = vst [vmem:[%s1508_s3 + $0x8] sm:$0xff] %v1172_v2  ;;  %v1175_v6 = vpack.c.bf16 %v955_v4, %v954_v62 }
 0x12e   :  { %1045 = vst [vmem:[%s1508_s3 + $0x18] sm:$0xff] %v1174_v5  ;;  %v724_v7 = vpop.f32.mrb[4].mxu0 }
 0x12f   :  { %1046 = vst [vmem:[%s1508_s3 + $0x20] sm:$0xff] %v1175_v6  ;;  %v777_v8 = vpop.f32.mrb[4].mxu1  ;;  %v958_v9 = vadd.f32 %v919_v47, %v724_v7  ;;  %v726_v11 = vpop.f32.mrb[5].mxu0 }
 0x130   :  { %v960_v10 = vadd.f32 %v927_v48, %v777_v8  ;;  %v779_v12 = vpop.f32.mrb[5].mxu1  ;;  %v959_v13 = vadd.f32 %v923_v49, %v726_v11  ;;  %v728_v15 = vpop.f32.mrb[6].mxu0 }
 0x131   :  { %v961_v14 = vadd.f32 %v931_v50, %v779_v12  ;;  %v781_v16 = vpop.f32.mrb[6].mxu1  ;;  %v964_v17 = vadd.f32 %v919_v47, %v728_v15  ;;  %v730_v19 = vpop.f32.mrb[7].mxu0 }
 0x132   :  { %v966_v18 = vadd.f32 %v927_v48, %v781_v16  ;;  %v783_v20 = vpop.f32.mrb[7].mxu1  ;;  %v1177_v21 = vpack.c.bf16 %v959_v13, %v958_v9  ;;  %v965_v23 = vadd.f32 %v923_v49, %v730_v19 }
 0x133   :  { %v1178_v22 = vpack.c.bf16 %v961_v14, %v960_v10  ;;  %v967_v24 = vadd.f32 %v931_v50, %v783_v20 }
 0x134   :  { %1048 = vst [vmem:[%s1508_s3 + $0x30] sm:$0xff] %v1177_v21  ;;  %v1180_v25 = vpack.c.bf16 %v965_v23, %v964_v17 }
 0x135   :  { %1049 = vst [vmem:[%s1508_s3 + $0x38] sm:$0xff] %v1178_v22  ;;  %v1181_v26 = vpack.c.bf16 %v967_v24, %v966_v18 }
 0x136   :  { %1051 = vst [vmem:[%s1508_s3 + $0x48] sm:$0xff] %v1180_v25 }
 0x137   :  { %1052 = vst [vmem:[%s1508_s3 + $0x50] sm:$0xff] %v1181_v26 }
 0x166   :  { %v820_v27 = vpop.f32.mrb[8].mxu0 }
 0x167   :  { %v830_v28 = vpop.f32.mrb[8].mxu1  ;;  %v950_v29 = vadd.f32 %v1457_v41, %v820_v27  ;;  %v822_v31 = vpop.f32.mrb[9].mxu0 }
 0x168   :  { %v962_v30 = vadd.f32 %v1457_v41, %v830_v28  ;;  %v832_v32 = vpop.f32.mrb[9].mxu1  ;;  %v951_v33 = vadd.f32 %v1459_v42, %v822_v31  ;;  %v824_v35 = vpop.f32.mrb[10].mxu0 }
 0x169   :  { %v963_v34 = vadd.f32 %v1459_v42, %v832_v32  ;;  %v834_v36 = vpop.f32.mrb[10].mxu1  ;;  %v956_v37 = vadd.f32 %v1457_v41, %v824_v35  ;;  %v826_v39 = vpop.f32.mrb[11].mxu0 }
 0x16a   :  { %v968_v38 = vadd.f32 %v1457_v41, %v834_v36  ;;  %v836_v40 = vpop.f32.mrb[11].mxu1  ;;  %v1173_v43 = vpack.c.bf16 %v951_v33, %v950_v29  ;;  %v957_v45 = vadd.f32 %v1459_v42, %v826_v39 }
 0x16b   :  { %v1179_v44 = vpack.c.bf16 %v963_v34, %v962_v30  ;;  %v969_v46 = vadd.f32 %v1459_v42, %v836_v40 }
 0x16c   :  { %1044 = vst [vmem:[%s1508_s3 + $0x10] sm:$0xff] %v1173_v43  ;;  %v1176_v47 = vpack.c.bf16 %v957_v45, %v956_v37 }
 0x16d   :  { %1050 = vst [vmem:[%s1508_s3 + $0x40] sm:$0xff] %v1179_v44  ;;  %v1182_v48 = vpack.c.bf16 %v969_v46, %v968_v38 }
 0x16e   :  { %1047 = vst [vmem:[%s1508_s3 + $0x28] sm:$0xff] %v1176_v47 }
 0x16f   :  { %1053 = vst [vmem:[%s1508_s3 + $0x58] sm:$0xff] %v1182_v48 }
 0x170   :  { %1058 = vsyncpa [#allocation4], 1 }

// kernel: bert_classifier_forward.16
= control target key start
LH: loop header
LB: loop body
LE: loop exit
PB: predicated region body
PF: predicated region fallthrough
CT: control target
= control target key end

     0   :  { %s1306_s1 = inlined_call_operand.vmem [shape: bf16[256,512], index: 1, kind: input, shape index: {}]   ;;  %s1307_s0 = inlined_call_operand.vmem [shape: bf16[32,256], index: 0, kind: input, shape index: {}]   ;;  %s1308_s2 = inlined_call_operand.vmem [shape: f32[1,512], index: 2, kind: input, shape index: {}]   ;;  %s1309_s3 = inlined_call_operand.vmem [shape: bf16[32,512], index: 3, kind: output, shape index: {}]  }
   0x1   :  { %v877_v0 = vld [vmem:[%s1306_s1 + $0x4] ss:$16 sps:$4 sm:$0xff]   ;;  %v879_v1 = vld [vmem:[%s1306_s1 + $0xc] ss:$16 sps:$4 sm:$0xff]   ;;  %v881_v2 = vld [vmem:[%s1306_s1] ss:$16 sps:$4 sm:$0xff]  }
   0x2   :  { %458 = vmatprep.subr.bf16.mxu0 %v877_v0  ;;  %v882_v3 = vld [vmem:[%s1306_s1 + $0x8] ss:$16 sps:$4 sm:$0xff]   ;;  %511 = vmatprep.subr.bf16.mxu1 %v879_v1  ;;  %v883_v4 = vld [vmem:[%s1306_s1 + $0x24] ss:$16 sps:$4 sm:$0xff]   ;;  %v885_v5 = vld [vmem:[%s1306_s1 + $0x2c] ss:$16 sps:$4 sm:$0xff]  }
   0x3   :  { %459 = vmatpush1.bf16.msra.mxu0 %v881_v2  ;;  %512 = vmatpush1.bf16.msra.mxu1 %v882_v3  ;;  %v887_v6 = vld [vmem:[%s1306_s1 + $0x20] ss:$16 sps:$4 sm:$0xff]   ;;  %v888_v7 = vld [vmem:[%s1306_s1 + $0x28] ss:$16 sps:$4 sm:$0xff]   ;;  %v889_v8 = vld [vmem:[%s1306_s1 + $0x44] ss:$16 sps:$4 sm:$0xff]  }
   0x4   :  { %460 = vmatprep.subr.bf16.mxu0 %v883_v4  ;;  %513 = vmatprep.subr.bf16.mxu1 %v885_v5  ;;  %v891_v9 = vld [vmem:[%s1306_s1 + $0x4c] ss:$16 sps:$4 sm:$0xff]   ;;  %v893_v10 = vld [vmem:[%s1306_s1 + $0x40] ss:$16 sps:$4 sm:$0xff]   ;;  %v894_v11 = vld [vmem:[%s1306_s1 + $0x48] ss:$16 sps:$4 sm:$0xff]   ;;  %v617_v4 = vlaneseq }
   0x5   :  { %v895_v12 = vld [vmem:[%s1306_s1 + $0x64] ss:$16 sps:$4 sm:$0xff]   ;;  %v897_v13 = vld [vmem:[%s1306_s1 + $0x6c] ss:$16 sps:$4 sm:$0xff]   ;;  %v899_v14 = vld [vmem:[%s1306_s1 + $0x60] ss:$16 sps:$4 sm:$0xff]  }
   0x6   :  { %v900_v15 = vld [vmem:[%s1306_s1 + $0x68] ss:$16 sps:$4 sm:$0xff]   ;;  %v901_v16 = vld [vmem:[%s1306_s1 + $0x84] ss:$16 sps:$4 sm:$0xff]   ;;  %v903_v17 = vld [vmem:[%s1306_s1 + $0x8c] ss:$16 sps:$4 sm:$0xff]  }
   0x7   :  { %461 = vmatpush1.bf16.msra.mxu0 %v887_v6  ;;  %514 = vmatpush1.bf16.msra.mxu1 %v888_v7  ;;  %v905_v18 = vld [vmem:[%s1306_s1 + $0x80] ss:$16 sps:$4 sm:$0xff]   ;;  %v906_v19 = vld [vmem:[%s1306_s1 + $0x88] ss:$16 sps:$4 sm:$0xff]   ;;  %v907_v20 = vld [vmem:[%s1306_s1 + $0xa4] ss:$16 sps:$4 sm:$0xff]  }
   0x8   :  { %462 = vmatprep.subr.bf16.mxu0 %v889_v8  ;;  %515 = vmatprep.subr.bf16.mxu1 %v891_v9  ;;  %v909_v21 = vld [vmem:[%s1306_s1 + $0xac] ss:$16 sps:$4 sm:$0xff]   ;;  %v911_v22 = vld [vmem:[%s1306_s1 + $0xa0] ss:$16 sps:$4 sm:$0xff]   ;;  %v912_v23 = vld [vmem:[%s1306_s1 + $0xa8] ss:$16 sps:$4 sm:$0xff]  }
   0x9   :  { %v913_v24 = vld [vmem:[%s1306_s1 + $0xc4] ss:$16 sps:$4 sm:$0xff]   ;;  %v915_v25 = vld [vmem:[%s1306_s1 + $0xcc] ss:$16 sps:$4 sm:$0xff]   ;;  %v917_v26 = vld [vmem:[%s1306_s1 + $0xc0] ss:$16 sps:$4 sm:$0xff]  }
   0xa   :  { %v918_v27 = vld [vmem:[%s1306_s1 + $0xc8] ss:$16 sps:$4 sm:$0xff]   ;;  %v919_v28 = vld [vmem:[%s1306_s1 + $0xe4] ss:$16 sps:$4 sm:$0xff]   ;;  %v921_v29 = vld [vmem:[%s1306_s1 + $0xec] ss:$16 sps:$4 sm:$0xff]  }
   0xb   :  { %463 = vmatpush1.bf16.msra.mxu0 %v893_v10  ;;  %516 = vmatpush1.bf16.msra.mxu1 %v894_v11  ;;  %v923_v30 = vld [vmem:[%s1306_s1 + $0xe0] ss:$16 sps:$4 sm:$0xff]   ;;  %v924_v31 = vld [vmem:[%s1306_s1 + $0xe8] ss:$16 sps:$4 sm:$0xff]   ;;  %v925_v32 = vld [vmem:[%s1306_s1 + $0x104] ss:$16 sps:$4 sm:$0xff]  }
   0xc   :  { %464 = vmatprep.subr.bf16.mxu0 %v895_v12  ;;  %517 = vmatprep.subr.bf16.mxu1 %v897_v13  ;;  %v927_v33 = vld [vmem:[%s1306_s1 + $0x10c] ss:$16 sps:$4 sm:$0xff]   ;;  %v929_v34 = vld [vmem:[%s1306_s1 + $0x100] ss:$16 sps:$4 sm:$0xff]   ;;  %v930_v35 = vld [vmem:[%s1306_s1 + $0x108] ss:$16 sps:$4 sm:$0xff]  }
   0xd   :  { %v931_v36 = vld [vmem:[%s1306_s1 + $0x124] ss:$16 sps:$4 sm:$0xff]   ;;  %v933_v37 = vld [vmem:[%s1306_s1 + $0x12c] ss:$16 sps:$4 sm:$0xff]   ;;  %v935_v38 = vld [vmem:[%s1306_s1 + $0x120] ss:$16 sps:$4 sm:$0xff]  }
   0xe   :  { %v936_v39 = vld [vmem:[%s1306_s1 + $0x128] ss:$16 sps:$4 sm:$0xff]   ;;  %v937_v40 = vld [vmem:[%s1306_s1 + $0x144] ss:$16 sps:$4 sm:$0xff]   ;;  %v939_v41 = vld [vmem:[%s1306_s1 + $0x14c] ss:$16 sps:$4 sm:$0xff]  }
   0xf   :  { %465 = vmatpush1.bf16.msra.mxu0 %v899_v14  ;;  %518 = vmatpush1.bf16.msra.mxu1 %v900_v15  ;;  %v941_v42 = vld [vmem:[%s1306_s1 + $0x140] ss:$16 sps:$4 sm:$0xff]   ;;  %v942_v43 = vld [vmem:[%s1306_s1 + $0x148] ss:$16 sps:$4 sm:$0xff]   ;;  %v943_v44 = vld [vmem:[%s1306_s1 + $0x164] ss:$16 sps:$4 sm:$0xff]  }
  0x10   :  { %466 = vmatprep.subr.bf16.mxu0 %v901_v16  ;;  %519 = vmatprep.subr.bf16.mxu1 %v903_v17  ;;  %v945_v45 = vld [vmem:[%s1306_s1 + $0x16c] ss:$16 sps:$4 sm:$0xff]   ;;  %v947_v46 = vld [vmem:[%s1306_s1 + $0x160] ss:$16 sps:$4 sm:$0xff]   ;;  %v948_v48 = vld [vmem:[%s1306_s1 + $0x168] ss:$16 sps:$4 sm:$0xff]  }
  0x11   :  { %v975_v47 = vld [vmem:[%s1307_s0 + $0x4] ss:$8 sps:$4 sm:$0xff]   ;;  %v953_v51 = vld [vmem:[%s1306_s1 + $0x180] ss:$16 sps:$4 sm:$0xff]   ;;  %v954_v52 = vld [vmem:[%s1306_s1 + $0x188] ss:$16 sps:$4 sm:$0xff]  }
  0x12   :  { %v949_v49 = vld [vmem:[%s1306_s1 + $0x184] ss:$16 sps:$4 sm:$0xff]   ;;  %v951_v50 = vld [vmem:[%s1306_s1 + $0x18c] ss:$16 sps:$4 sm:$0xff]   ;;  %490 = vmatprep.mubr.bf16.mxu0 %v975_v47  ;;  %543 = vmatprep.mubr.bf16.mxu1 %v975_v47  ;;  %v959_v55 = vld [vmem:[%s1306_s1 + $0x1a0] ss:$16 sps:$4 sm:$0xff]  }
  0x13   :  { %467 = vmatpush1.bf16.msra.mxu0 %v905_v18  ;;  %520 = vmatpush1.bf16.msra.mxu1 %v906_v19  ;;  %v955_v53 = vld [vmem:[%s1306_s1 + $0x1a4] ss:$16 sps:$4 sm:$0xff]   ;;  %v957_v54 = vld [vmem:[%s1306_s1 + $0x1ac] ss:$16 sps:$4 sm:$0xff]   ;;  %v960_v56 = vld [vmem:[%s1306_s1 + $0x1a8] ss:$16 sps:$4 sm:$0xff]  }
  0x14   :  { %468 = vmatprep.subr.bf16.mxu0 %v907_v20  ;;  %521 = vmatprep.subr.bf16.mxu1 %v909_v21  ;;  %v961_v57 = vld [vmem:[%s1306_s1 + $0x1c4] ss:$16 sps:$4 sm:$0xff]   ;;  %v963_v58 = vld [vmem:[%s1306_s1 + $0x1cc] ss:$16 sps:$4 sm:$0xff]   ;;  %v965_v59 = vld [vmem:[%s1306_s1 + $0x1c0] ss:$16 sps:$4 sm:$0xff]  }
  0x15   :  { %v966_v60 = vld [vmem:[%s1306_s1 + $0x1c8] ss:$16 sps:$4 sm:$0xff]   ;;  %v967_v61 = vld [vmem:[%s1306_s1 + $0x1e4] ss:$16 sps:$4 sm:$0xff]   ;;  %v969_v62 = vld [vmem:[%s1306_s1 + $0x1ec] ss:$16 sps:$4 sm:$0xff]  }
  0x16   :  { %v971_v63 = vld [vmem:[%s1306_s1 + $0x1e0] ss:$16 sps:$4 sm:$0xff]   ;;  %v972_v0 = vld [vmem:[%s1306_s1 + $0x1e8] ss:$16 sps:$4 sm:$0xff]   ;;  %v976_v2 = vld [vmem:[%s1307_s0 + $0x14] ss:$8 sps:$4 sm:$0xff]  }
  0x17   :  { %469 = vmatpush1.bf16.msra.mxu0 %v911_v22  ;;  %522 = vmatpush1.bf16.msra.mxu1 %v912_v23  ;;  %v973_v1 = vld [vmem:[%s1307_s0] ss:$8 sps:$4 sm:$0xff]   ;;  %v978_v3 = vld [vmem:[%s1307_s0 + $0x10] ss:$8 sps:$4 sm:$0xff]   ;;  %v618_v5 = vshrl.u32 %v617_v4, 7 }
  0x18   :  { %470 = vmatprep.subr.bf16.mxu0 %v913_v24  ;;  %523 = vmatprep.subr.bf16.mxu1 %v915_v25  ;;  %v615_v8 = vld [vmem:[%s1308_s2] sm:$0xf] }
  0x19   :  { %v619_v6 = vsub.s32 0, %v618_v5  ;;  %v627_v7 = vsub.s32 2, %v618_v5  ;;  %v623_v9 = vsub.s32 1, %v618_v5  ;;  %v631_v10 = vsub.s32 3, %v618_v5 }
  0x1b   :  { %471 = vmatpush1.bf16.msra.mxu0 %v917_v26  ;;  %524 = vmatpush1.bf16.msra.mxu1 %v918_v27  ;;  %v620_v11 = vrot.slane %v615_v8, %v619_v6  ;;  %v628_v12 = vrot.slane %v615_v8, %v627_v7  ;;  %v624_v13 = vrot.slane %v615_v8, %v623_v9 }
  0x1c   :  { %472 = vmatprep.subr.bf16.mxu0 %v919_v28  ;;  %525 = vmatprep.subr.bf16.mxu1 %v921_v29  ;;  %v632_v14 = vrot.slane %v615_v8, %v631_v10 }
  0x1f   :  { %473 = vmatpush1.bf16.msra.mxu0 %v923_v30  ;;  %526 = vmatpush1.bf16.msra.mxu1 %v924_v31 }
  0x20   :  { %474 = vmatprep.subr.bf16.mxu0 %v925_v32  ;;  %527 = vmatprep.subr.bf16.mxu1 %v927_v33 }
  0x23   :  { %475 = vmatpush1.bf16.msra.mxu0 %v929_v34  ;;  %528 = vmatpush1.bf16.msra.mxu1 %v930_v35 }
  0x24   :  { %476 = vmatprep.subr.bf16.mxu0 %v931_v36  ;;  %529 = vmatprep.subr.bf16.mxu1 %v933_v37 }
  0x27   :  { %477 = vmatpush1.bf16.msra.mxu0 %v935_v38  ;;  %530 = vmatpush1.bf16.msra.mxu1 %v936_v39 }
  0x28   :  { %478 = vmatprep.subr.bf16.mxu0 %v937_v40  ;;  %531 = vmatprep.subr.bf16.mxu1 %v939_v41 }
  0x2b   :  { %479 = vmatpush1.bf16.msra.mxu0 %v941_v42  ;;  %532 = vmatpush1.bf16.msra.mxu1 %v942_v43 }
  0x2c   :  { %480 = vmatprep.subr.bf16.mxu0 %v943_v44  ;;  %533 = vmatprep.subr.bf16.mxu1 %v945_v45 }
  0x2f   :  { %481 = vmatpush1.bf16.msra.mxu0 %v947_v46  ;;  %534 = vmatpush1.bf16.msra.mxu1 %v948_v48 }
  0x30   :  { %482 = vmatprep.subr.bf16.mxu0 %v949_v49  ;;  %535 = vmatprep.subr.bf16.mxu1 %v951_v50 }
  0x33   :  { %483 = vmatpush1.bf16.msra.mxu0 %v953_v51  ;;  %536 = vmatpush1.bf16.msra.mxu1 %v954_v52 }
  0x34   :  { %484 = vmatprep.subr.bf16.mxu0 %v955_v53  ;;  %537 = vmatprep.subr.bf16.mxu1 %v957_v54 }
  0x37   :  { %485 = vmatpush1.bf16.msra.mxu0 %v959_v55  ;;  %538 = vmatpush1.bf16.msra.mxu1 %v960_v56 }
  0x38   :  { %486 = vmatprep.subr.bf16.mxu0 %v961_v57  ;;  %539 = vmatprep.subr.bf16.mxu1 %v963_v58 }
  0x3b   :  { %487 = vmatpush1.bf16.msra.mxu0 %v965_v59  ;;  %540 = vmatpush1.bf16.msra.mxu1 %v966_v60 }
  0x3c   :  { %488 = vmatprep.subr.bf16.mxu0 %v967_v61  ;;  %541 = vmatprep.subr.bf16.mxu1 %v969_v62 }
  0x3f   :  { %489 = vmatpush1.bf16.msra.mxu0 %v971_v63  ;;  %542 = vmatpush1.bf16.msra.mxu1 %v972_v0 }
  0x42   :  { %491 = vmatmul.mubr.bf16.vlgmr.msra.gmra.mrb[0].mxu0 %v973_v1  ;;  %544 = vmatmul.mubr.bf16.vlgmr.msra.gmra.mrb[0].mxu1 %v973_v1 }
  0x43   :  { %500 = vmatprep.mubr.bf16.mxu0 %v976_v2  ;;  %553 = vmatprep.mubr.bf16.mxu1 %v976_v2 }
  0x4a   :  { %501 = vmatmul.mubr.bf16.gmra.mrb[4].mxu0 %v978_v3  ;;  %554 = vmatmul.mubr.bf16.gmra.mrb[4].mxu1 %v978_v3 }
 0x115   :  { %v492_v15 = vpop.f32.mrb[0].mxu0  ;;  %v545_v16 = vpop.f32.mrb[0].mxu1 }
 0x116   :  { %v637_v17 = vadd.f32 %v620_v11, %v492_v15  ;;  %v639_v18 = vadd.f32 %v628_v12, %v545_v16  ;;  %v494_v19 = vpop.f32.mrb[1].mxu0  ;;  %v547_v20 = vpop.f32.mrb[1].mxu1 }
 0x117   :  { %v638_v21 = vadd.f32 %v624_v13, %v494_v19  ;;  %v640_v22 = vadd.f32 %v632_v14, %v547_v20  ;;  %v496_v23 = vpop.f32.mrb[2].mxu0  ;;  %v549_v24 = vpop.f32.mrb[2].mxu1 }
 0x118   :  { %v669_v25 = vmul.f32 0.70710677, %v637_v17  ;;  %v671_v26 = vmul.f32 0.70710677, %v639_v18  ;;  %v641_v29 = vadd.f32 %v620_v11, %v496_v23  ;;  %v1238_v30 = vadd.f32 %v628_v12, %v549_v24  ;;  %v498_v31 = vpop.f32.mrb[3].mxu0  ;;  %v551_v32 = vpop.f32.mrb[3].mxu1 }
 0x119   :  { %v670_v27 = vmul.f32 0.70710677, %v638_v21  ;;  %v672_v28 = vmul.f32 0.70710677, %v640_v22  ;;  %v1240_v33 = vadd.f32 %v624_v13, %v498_v31  ;;  %v1242_v34 = vadd.f32 %v632_v14, %v551_v32 }
 0x11a   :  { %979 = verf.f32 %v669_v25  ;;  %v673_v35 = vmul.f32 0.70710677, %v641_v29  ;;  %v675_v36 = vmul.f32 0.70710677, %v1238_v30  ;;  %v653_v59 = vmul.f32 0.5, %v637_v17 }
 0x11b   :  { %981 = verf.f32 %v671_v26  ;;  %v674_v37 = vmul.f32 0.70710677, %v1240_v33  ;;  %v676_v39 = vmul.f32 0.70710677, %v1242_v34  ;;  %v655_v60 = vmul.f32 0.5, %v639_v18 }
 0x11c   :  { %983 = verf.f32 %v670_v27  ;;  %v654_v3 = vmul.f32 0.5, %v638_v21  ;;  %v656_v4 = vmul.f32 0.5, %v640_v22  ;;  %v659_v20 = vmul.f32 0.5, %v1238_v30 }
 0x11d   :  { %985 = verf.f32 %v672_v28  ;;  %v502_v38 = vpop.f32.mrb[4].mxu0  ;;  %v555_v41 = vpop.f32.mrb[4].mxu1  ;;  %v658_v22 = vmul.f32 0.5, %v1240_v33  ;;  %v660_v31 = vmul.f32 0.5, %v1242_v34 }
 0x11e   :  { %987 = verf.f32 %v673_v35  ;;  %v1247_v40 = vadd.f32 %v620_v11, %v502_v38  ;;  %v504_v42 = vpop.f32.mrb[5].mxu0  ;;  %v1249_v43 = vadd.f32 %v628_v12, %v555_v41  ;;  %v557_v45 = vpop.f32.mrb[5].mxu1 }
 0x11f   :  { %989 = verf.f32 %v675_v36  ;;  %v1251_v44 = vadd.f32 %v624_v13, %v504_v42  ;;  %v506_v46 = vpop.f32.mrb[6].mxu0  ;;  %v1254_v48 = vadd.f32 %v632_v14, %v557_v45  ;;  %v559_v49 = vpop.f32.mrb[6].mxu1 }
 0x120   :  { %991 = verf.f32 %v674_v37  ;;  %v677_v47 = vmul.f32 0.70710677, %v1247_v40  ;;  %v508_v50 = vpop.f32.mrb[7].mxu0  ;;  %v679_v51 = vmul.f32 0.70710677, %v1249_v43  ;;  %v561_v52 = vpop.f32.mrb[7].mxu1  ;;  %v1259_v55 = vadd.f32 %v620_v11, %v506_v46 }
 0x121   :  { %993 = verf.f32 %v676_v39  ;;  %v678_v53 = vmul.f32 0.70710677, %v1251_v44  ;;  %v680_v54 = vmul.f32 0.70710677, %v1254_v48  ;;  %v1261_v56 = vadd.f32 %v628_v12, %v559_v49 }
 0x122   :  { %995 = verf.f32 %v677_v47  ;;  %v1263_v57 = vadd.f32 %v624_v13, %v508_v50  ;;  %v681_v63 = vmul.f32 0.70710677, %v1259_v55  ;;  %v1266_v0 = vadd.f32 %v632_v14, %v561_v52 }
 0x123   :  { %997 = verf.f32 %v679_v51  ;;  %v683_v5 = vmul.f32 0.70710677, %v1261_v56  ;;  %v657_v13 = vmul.f32 0.5, %v641_v29  ;;  %v661_v36 = vmul.f32 0.5, %v1247_v40 }
 0x124   :  { %v980_v58 = vpop.eup %979  ;;  %999 = verf.f32 %v678_v53  ;;  %v682_v9 = vmul.f32 0.70710677, %v1263_v57  ;;  %v684_v17 = vmul.f32 0.70710677, %v1266_v0  ;;  %v663_v39 = vmul.f32 0.5, %v1249_v43 }
 0x125   :  { %v982_v61 = vpop.eup %981  ;;  %v701_v62 = vadd.f32 1.0, %v980_v58  ;;  %1001 = verf.f32 %v680_v54  ;;  %v662_v46 = vmul.f32 0.5, %v1251_v44  ;;  %v664_v40 = vmul.f32 0.5, %v1254_v48 }
 0x126   :  { %v984_v1 = vpop.eup %983  ;;  %v703_v2 = vadd.f32 1.0, %v982_v61  ;;  %1003 = verf.f32 %v681_v63  ;;  %v665_v44 = vmul.f32 0.5, %v1259_v55  ;;  %v667_v48 = vmul.f32 0.5, %v1261_v56 }
 0x127   :  { %v986_v6 = vpop.eup %985  ;;  %v717_v7 = vmul.f32 %v701_v62, %v653_v59  ;;  %v702_v8 = vadd.f32 1.0, %v984_v1  ;;  %1005 = verf.f32 %v683_v5  ;;  %v666_v1 = vmul.f32 0.5, %v1263_v57 }
 0x128   :  { %v988_v10 = vpop.eup %987  ;;  %v719_v11 = vmul.f32 %v703_v2, %v655_v60  ;;  %v704_v12 = vadd.f32 1.0, %v986_v6  ;;  %1007 = verf.f32 %v682_v9  ;;  %v668_v5 = vmul.f32 0.5, %v1266_v0 }
 0x129   :  { %v990_v15 = vpop.eup %989  ;;  %v718_v14 = vmul.f32 %v702_v8, %v654_v3  ;;  %v705_v16 = vadd.f32 1.0, %v988_v10  ;;  %1009 = verf.f32 %v684_v17 }
 0x12a   :  { %v992_v18 = vpop.eup %991  ;;  %v720_v19 = vmul.f32 %v704_v12, %v656_v4  ;;  %v707_v21 = vadd.f32 1.0, %v990_v15 }
 0x12b   :  { %v994_v23 = vpop.eup %993  ;;  %v869_v24 = vpack.c.bf16 %v718_v14, %v717_v7  ;;  %v721_v25 = vmul.f32 %v705_v16, %v657_v13  ;;  %v706_v26 = vadd.f32 1.0, %v992_v18 }
 0x12c   :  { %v996_v27 = vpop.eup %995  ;;  %v870_v28 = vpack.c.bf16 %v720_v19, %v719_v11  ;;  %v723_v29 = vmul.f32 %v707_v21, %v659_v20  ;;  %v708_v32 = vadd.f32 1.0, %v994_v23 }
 0x12d   :  { %v998_v35 = vpop.eup %997  ;;  %781 = vst [vmem:[%s1309_s3] sm:$0xff] %v869_v24  ;;  %v722_v30 = vmul.f32 %v706_v26, %v658_v22  ;;  %v709_v33 = vadd.f32 1.0, %v996_v27 }
 0x12e   :  { %v1000_v37 = vpop.eup %999  ;;  %782 = vst [vmem:[%s1309_s3 + $0x8] sm:$0xff] %v870_v28  ;;  %v724_v38 = vmul.f32 %v708_v32, %v660_v31  ;;  %v711_v41 = vadd.f32 1.0, %v998_v35 }
 0x12f   :  { %v1002_v34 = vpop.eup %1001  ;;  %v871_v42 = vpack.c.bf16 %v722_v30, %v721_v25  ;;  %v725_v45 = vmul.f32 %v709_v33, %v661_v36  ;;  %v710_v47 = vadd.f32 1.0, %v1000_v37 }
 0x130   :  { %v872_v49 = vpack.c.bf16 %v724_v38, %v723_v29  ;;  %v727_v50 = vmul.f32 %v711_v41, %v663_v39  ;;  %v712_v51 = vadd.f32 1.0, %v1002_v34  ;;  %v1004_v52 = vpop.eup %1003 }
 0x131   :  { %783 = vst [vmem:[%s1309_s3 + $0x10] sm:$0xff] %v871_v42  ;;  %v726_v53 = vmul.f32 %v710_v47, %v662_v46  ;;  %v1006_v54 = vpop.eup %1005  ;;  %v713_v58 = vadd.f32 1.0, %v1004_v52 }
 0x132   :  { %784 = vst [vmem:[%s1309_s3 + $0x18] sm:$0xff] %v872_v49  ;;  %v728_v43 = vmul.f32 %v712_v51, %v664_v40  ;;  %v1008_v59 = vpop.eup %1007  ;;  %v715_v61 = vadd.f32 1.0, %v1006_v54 }
 0x133   :  { %v873_v60 = vpack.c.bf16 %v726_v53, %v725_v45  ;;  %v729_v63 = vmul.f32 %v713_v58, %v665_v44  ;;  %v714_v2 = vadd.f32 1.0, %v1008_v59  ;;  %v1010_v3 = vpop.eup %1009 }
 0x134   :  { %v874_v62 = vpack.c.bf16 %v728_v43, %v727_v50  ;;  %v731_v55 = vmul.f32 %v715_v61, %v667_v48  ;;  %v716_v56 = vadd.f32 1.0, %v1010_v3 }
 0x135   :  { %785 = vst [vmem:[%s1309_s3 + $0x20] sm:$0xff] %v873_v60  ;;  %v730_v4 = vmul.f32 %v714_v2, %v666_v1 }
 0x136   :  { %786 = vst [vmem:[%s1309_s3 + $0x28] sm:$0xff] %v874_v62  ;;  %v732_v7 = vmul.f32 %v716_v56, %v668_v5 }
 0x137   :  { %v875_v6 = vpack.c.bf16 %v730_v4, %v729_v63 }
 0x138   :  { %v876_v57 = vpack.c.bf16 %v732_v7, %v731_v55 }
 0x139   :  { %787 = vst [vmem:[%s1309_s3 + $0x30] sm:$0xff] %v875_v6 }
 0x13a   :  { %788 = vst [vmem:[%s1309_s3 + $0x38] sm:$0xff] %v876_v57 }

// kernel: bert_classifier_forward.18
= control target key start
LH: loop header
LB: loop body
LE: loop exit
PB: predicated region body
PF: predicated region fallthrough
CT: control target
= control target key end

     0   :  { %s1736_s1 = inlined_call_operand.vmem [shape: bf16[256,768], index: 1, kind: input, shape index: {}]   ;;  %s1737_s0 = inlined_call_operand.vmem [shape: bf16[32,256], index: 0, kind: input, shape index: {}]   ;;  %s1738_s2 = inlined_call_operand.vmem [shape: f32[1,768], index: 2, kind: input, shape index: {}]   ;;  %s1739_s3 = inlined_call_operand.vmem [shape: bf16[32,768], index: 3, kind: output, shape index: {}]  }
   0x1   :  { %v1200_v0 = vld [vmem:[%s1736_s1 + $0x4] ss:$24 sps:$4 sm:$0xff]   ;;  %v1204_v2 = vld [vmem:[%s1736_s1] ss:$24 sps:$4 sm:$0xff]   ;;  %v1206_v4 = vld [vmem:[%s1736_s1 + $0x34] ss:$24 sps:$4 sm:$0xff]  }
   0x2   :  { %v1202_v1 = vld [vmem:[%s1736_s1 + $0xc] ss:$24 sps:$4 sm:$0xff]   ;;  %666 = vmatprep.subr.bf16.mxu0 %v1200_v0  ;;  %v1205_v3 = vld [vmem:[%s1736_s1 + $0x8] ss:$24 sps:$4 sm:$0xff]   ;;  %v1208_v5 = vld [vmem:[%s1736_s1 + $0x3c] ss:$24 sps:$4 sm:$0xff]  }
   0x3   :  { %719 = vmatprep.subr.bf16.mxu1 %v1202_v1  ;;  %667 = vmatpush1.bf16.msra.mxu0 %v1204_v2  ;;  %v1210_v6 = vld [vmem:[%s1736_s1 + $0x30] ss:$24 sps:$4 sm:$0xff]   ;;  %v1212_v8 = vld [vmem:[%s1736_s1 + $0x64] ss:$24 sps:$4 sm:$0xff]   ;;  %v1216_v10 = vld [vmem:[%s1736_s1 + $0x60] ss:$24 sps:$4 sm:$0xff]  }
   0x4   :  { %720 = vmatpush1.bf16.msra.mxu1 %v1205_v3  ;;  %668 = vmatprep.subr.bf16.mxu0 %v1206_v4  ;;  %v1211_v7 = vld [vmem:[%s1736_s1 + $0x38] ss:$24 sps:$4 sm:$0xff]   ;;  %v1214_v9 = vld [vmem:[%s1736_s1 + $0x6c] ss:$24 sps:$4 sm:$0xff]   ;;  %v1217_v11 = vld [vmem:[%s1736_s1 + $0x68] ss:$24 sps:$4 sm:$0xff]  }
   0x5   :  { %721 = vmatprep.subr.bf16.mxu1 %v1208_v5  ;;  %v1218_v12 = vld [vmem:[%s1736_s1 + $0x94] ss:$24 sps:$4 sm:$0xff]   ;;  %v1222_v14 = vld [vmem:[%s1736_s1 + $0x90] ss:$24 sps:$4 sm:$0xff]   ;;  %v1224_v16 = vld [vmem:[%s1736_s1 + $0xc4] ss:$24 sps:$4 sm:$0xff]  }
   0x6   :  { %v1220_v13 = vld [vmem:[%s1736_s1 + $0x9c] ss:$24 sps:$4 sm:$0xff]   ;;  %v1223_v15 = vld [vmem:[%s1736_s1 + $0x98] ss:$24 sps:$4 sm:$0xff]   ;;  %v1226_v17 = vld [vmem:[%s1736_s1 + $0xcc] ss:$24 sps:$4 sm:$0xff]  }
   0x7   :  { %669 = vmatpush1.bf16.msra.mxu0 %v1210_v6  ;;  %v1228_v18 = vld [vmem:[%s1736_s1 + $0xc0] ss:$24 sps:$4 sm:$0xff]   ;;  %v1230_v20 = vld [vmem:[%s1736_s1 + $0xf4] ss:$24 sps:$4 sm:$0xff]   ;;  %v1234_v22 = vld [vmem:[%s1736_s1 + $0xf0] ss:$24 sps:$4 sm:$0xff]  }
   0x8   :  { %722 = vmatpush1.bf16.msra.mxu1 %v1211_v7  ;;  %670 = vmatprep.subr.bf16.mxu0 %v1212_v8  ;;  %v1229_v19 = vld [vmem:[%s1736_s1 + $0xc8] ss:$24 sps:$4 sm:$0xff]   ;;  %v1232_v21 = vld [vmem:[%s1736_s1 + $0xfc] ss:$24 sps:$4 sm:$0xff]   ;;  %v1235_v23 = vld [vmem:[%s1736_s1 + $0xf8] ss:$24 sps:$4 sm:$0xff]  }
   0x9   :  { %723 = vmatprep.subr.bf16.mxu1 %v1214_v9  ;;  %v1236_v24 = vld [vmem:[%s1736_s1 + $0x124] ss:$24 sps:$4 sm:$0xff]   ;;  %v1240_v26 = vld [vmem:[%s1736_s1 + $0x120] ss:$24 sps:$4 sm:$0xff]   ;;  %v1242_v28 = vld [vmem:[%s1736_s1 + $0x154] ss:$24 sps:$4 sm:$0xff]  }
   0xa   :  { %v1238_v25 = vld [vmem:[%s1736_s1 + $0x12c] ss:$24 sps:$4 sm:$0xff]   ;;  %v1241_v27 = vld [vmem:[%s1736_s1 + $0x128] ss:$24 sps:$4 sm:$0xff]   ;;  %v1244_v29 = vld [vmem:[%s1736_s1 + $0x15c] ss:$24 sps:$4 sm:$0xff]  }
   0xb   :  { %671 = vmatpush1.bf16.msra.mxu0 %v1216_v10  ;;  %v1246_v30 = vld [vmem:[%s1736_s1 + $0x150] ss:$24 sps:$4 sm:$0xff]   ;;  %v1248_v32 = vld [vmem:[%s1736_s1 + $0x184] ss:$24 sps:$4 sm:$0xff]   ;;  %v1252_v34 = vld [vmem:[%s1736_s1 + $0x180] ss:$24 sps:$4 sm:$0xff]  }
   0xc   :  { %724 = vmatpush1.bf16.msra.mxu1 %v1217_v11  ;;  %672 = vmatprep.subr.bf16.mxu0 %v1218_v12  ;;  %v1247_v31 = vld [vmem:[%s1736_s1 + $0x158] ss:$24 sps:$4 sm:$0xff]   ;;  %v1250_v33 = vld [vmem:[%s1736_s1 + $0x18c] ss:$24 sps:$4 sm:$0xff]   ;;  %v1253_v35 = vld [vmem:[%s1736_s1 + $0x188] ss:$24 sps:$4 sm:$0xff]  }
   0xd   :  { %725 = vmatprep.subr.bf16.mxu1 %v1220_v13  ;;  %v1254_v36 = vld [vmem:[%s1736_s1 + $0x1b4] ss:$24 sps:$4 sm:$0xff]   ;;  %v1258_v38 = vld [vmem:[%s1736_s1 + $0x1b0] ss:$24 sps:$4 sm:$0xff]   ;;  %v1260_v40 = vld [vmem:[%s1736_s1 + $0x1e4] ss:$24 sps:$4 sm:$0xff]  }
   0xe   :  { %v1256_v37 = vld [vmem:[%s1736_s1 + $0x1bc] ss:$24 sps:$4 sm:$0xff]   ;;  %v1259_v39 = vld [vmem:[%s1736_s1 + $0x1b8] ss:$24 sps:$4 sm:$0xff]   ;;  %v1262_v41 = vld [vmem:[%s1736_s1 + $0x1ec] ss:$24 sps:$4 sm:$0xff]  }
   0xf   :  { %673 = vmatpush1.bf16.msra.mxu0 %v1222_v14  ;;  %v1264_v42 = vld [vmem:[%s1736_s1 + $0x1e0] ss:$24 sps:$4 sm:$0xff]   ;;  %v1266_v44 = vld [vmem:[%s1736_s1 + $0x214] ss:$24 sps:$4 sm:$0xff]   ;;  %v1270_v46 = vld [vmem:[%s1736_s1 + $0x210] ss:$24 sps:$4 sm:$0xff]  }
  0x10   :  { %726 = vmatpush1.bf16.msra.mxu1 %v1223_v15  ;;  %674 = vmatprep.subr.bf16.mxu0 %v1224_v16  ;;  %v1265_v43 = vld [vmem:[%s1736_s1 + $0x1e8] ss:$24 sps:$4 sm:$0xff]   ;;  %v1268_v45 = vld [vmem:[%s1736_s1 + $0x21c] ss:$24 sps:$4 sm:$0xff]   ;;  %v1271_v47 = vld [vmem:[%s1736_s1 + $0x218] ss:$24 sps:$4 sm:$0xff]  }
  0x11   :  { %727 = vmatprep.subr.bf16.mxu1 %v1226_v17  ;;  %v1517_v48 = vld [vmem:[%s1737_s0 + $0x4] ss:$8 sps:$4 sm:$0xff]   ;;  %v1276_v51 = vld [vmem:[%s1736_s1 + $0x240] ss:$24 sps:$4 sm:$0xff]   ;;  %v1280_v54 = vld [vmem:[%s1736_s1 + $0x27c] ss:$24 sps:$4 sm:$0xff]  }
  0x12   :  { %v1272_v49 = vld [vmem:[%s1736_s1 + $0x244] ss:$24 sps:$4 sm:$0xff]   ;;  %698 = vmatprep.mubr.bf16.mxu0 %v1517_v48  ;;  %751 = vmatprep.mubr.bf16.mxu1 %v1517_v48  ;;  %v1277_v52 = vld [vmem:[%s1736_s1 + $0x248] ss:$24 sps:$4 sm:$0xff]   ;;  %v1278_v53 = vld [vmem:[%s1736_s1 + $0x274] ss:$24 sps:$4 sm:$0xff]  }
  0x13   :  { %675 = vmatpush1.bf16.msra.mxu0 %v1228_v18  ;;  %v1274_v50 = vld [vmem:[%s1736_s1 + $0x24c] ss:$24 sps:$4 sm:$0xff]   ;;  %v1282_v55 = vld [vmem:[%s1736_s1 + $0x270] ss:$24 sps:$4 sm:$0xff]   ;;  %v1288_v59 = vld [vmem:[%s1736_s1 + $0x2a0] ss:$24 sps:$4 sm:$0xff]  }
  0x14   :  { %728 = vmatpush1.bf16.msra.mxu1 %v1229_v19  ;;  %676 = vmatprep.subr.bf16.mxu0 %v1230_v20  ;;  %v1283_v56 = vld [vmem:[%s1736_s1 + $0x278] ss:$24 sps:$4 sm:$0xff]   ;;  %v1284_v57 = vld [vmem:[%s1736_s1 + $0x2a4] ss:$24 sps:$4 sm:$0xff]   ;;  %v1289_v60 = vld [vmem:[%s1736_s1 + $0x2a8] ss:$24 sps:$4 sm:$0xff]  }
  0x15   :  { %729 = vmatprep.subr.bf16.mxu1 %v1232_v21  ;;  %v1286_v58 = vld [vmem:[%s1736_s1 + $0x2ac] ss:$24 sps:$4 sm:$0xff]   ;;  %v1292_v62 = vld [vmem:[%s1736_s1 + $0x2dc] ss:$24 sps:$4 sm:$0xff]   ;;  %v1294_v63 = vld [vmem:[%s1736_s1 + $0x2d0] ss:$24 sps:$4 sm:$0xff]  }
  0x16   :  { %v1290_v61 = vld [vmem:[%s1736_s1 + $0x2d4] ss:$24 sps:$4 sm:$0xff]   ;;  %v1295_v0 = vld [vmem:[%s1736_s1 + $0x2d8] ss:$24 sps:$4 sm:$0xff]   ;;  %v1575_v2 = vld [vmem:[%s1737_s0] ss:$8 sps:$4 sm:$0xff]  }
  0x17   :  { %677 = vmatpush1.bf16.msra.mxu0 %v1234_v22  ;;  %v1301_v1 = vld [vmem:[%s1736_s1 + $0x14] ss:$24 sps:$4 sm:$0xff]   ;;  %v1299_v3 = vld [vmem:[%s1736_s1 + $0x10] ss:$24 sps:$4 sm:$0xff]   ;;  %v1304_v4 = vld [vmem:[%s1736_s1 + $0x44] ss:$24 sps:$4 sm:$0xff]  }
  0x18   :  { %730 = vmatpush1.bf16.msra.mxu1 %v1235_v23  ;;  %678 = vmatprep.subr.bf16.mxu0 %v1236_v24  ;;  %v1338_v5 = vld [vmem:[%s1737_s0 + $0x14] ss:$8 sps:$4 sm:$0xff]   ;;  %v1302_v6 = vld [vmem:[%s1736_s1 + $0x40] ss:$24 sps:$4 sm:$0xff]   ;;  %v1305_v9 = vld [vmem:[%s1736_s1 + $0x70] ss:$24 sps:$4 sm:$0xff]  }
  0x19   :  { %731 = vmatprep.subr.bf16.mxu1 %v1238_v25  ;;  %v1307_v7 = vld [vmem:[%s1736_s1 + $0x74] ss:$24 sps:$4 sm:$0xff]   ;;  %v1597_v8 = vld [vmem:[%s1737_s0 + $0x10] ss:$8 sps:$4 sm:$0xff]   ;;  %v1310_v10 = vld [vmem:[%s1736_s1 + $0xa4] ss:$24 sps:$4 sm:$0xff]  }
  0x1a   :  { %v1308_v11 = vld [vmem:[%s1736_s1 + $0xa0] ss:$24 sps:$4 sm:$0xff]   ;;  %v1313_v12 = vld [vmem:[%s1736_s1 + $0xd4] ss:$24 sps:$4 sm:$0xff]   ;;  %v1311_v13 = vld [vmem:[%s1736_s1 + $0xd0] ss:$24 sps:$4 sm:$0xff]  }
  0x1b   :  { %679 = vmatpush1.bf16.msra.mxu0 %v1240_v26  ;;  %v1316_v14 = vld [vmem:[%s1736_s1 + $0x104] ss:$24 sps:$4 sm:$0xff]   ;;  %v1314_v15 = vld [vmem:[%s1736_s1 + $0x100] ss:$24 sps:$4 sm:$0xff]   ;;  %v1319_v16 = vld [vmem:[%s1736_s1 + $0x134] ss:$24 sps:$4 sm:$0xff]  }
  0x1c   :  { %732 = vmatpush1.bf16.msra.mxu1 %v1241_v27  ;;  %680 = vmatprep.subr.bf16.mxu0 %v1242_v28  ;;  %v1317_v17 = vld [vmem:[%s1736_s1 + $0x130] ss:$24 sps:$4 sm:$0xff]   ;;  %v1322_v18 = vld [vmem:[%s1736_s1 + $0x164] ss:$24 sps:$4 sm:$0xff]   ;;  %v1320_v19 = vld [vmem:[%s1736_s1 + $0x160] ss:$24 sps:$4 sm:$0xff]  }
  0x1d   :  { %733 = vmatprep.subr.bf16.mxu1 %v1244_v29  ;;  %v1325_v20 = vld [vmem:[%s1736_s1 + $0x194] ss:$24 sps:$4 sm:$0xff]   ;;  %v1323_v21 = vld [vmem:[%s1736_s1 + $0x190] ss:$24 sps:$4 sm:$0xff]   ;;  %v1328_v22 = vld [vmem:[%s1736_s1 + $0x1c4] ss:$24 sps:$4 sm:$0xff]  }
  0x1e   :  { %v1326_v23 = vld [vmem:[%s1736_s1 + $0x1c0] ss:$24 sps:$4 sm:$0xff]   ;;  %v1331_v24 = vld [vmem:[%s1736_s1 + $0x1f4] ss:$24 sps:$4 sm:$0xff]   ;;  %v1329_v25 = vld [vmem:[%s1736_s1 + $0x1f0] ss:$24 sps:$4 sm:$0xff]  }
  0x1f   :  { %681 = vmatpush1.bf16.msra.mxu0 %v1246_v30  ;;  %v1334_v26 = vld [vmem:[%s1736_s1 + $0x224] ss:$24 sps:$4 sm:$0xff]   ;;  %v1332_v27 = vld [vmem:[%s1736_s1 + $0x220] ss:$24 sps:$4 sm:$0xff]   ;;  %v1337_v28 = vld [vmem:[%s1736_s1 + $0x254] ss:$24 sps:$4 sm:$0xff]  }
  0x20   :  { %734 = vmatpush1.bf16.msra.mxu1 %v1247_v31  ;;  %682 = vmatprep.subr.bf16.mxu0 %v1248_v32  ;;  %v1335_v29 = vld [vmem:[%s1736_s1 + $0x250] ss:$24 sps:$4 sm:$0xff]   ;;  %v1342_v30 = vld [vmem:[%s1736_s1 + $0x284] ss:$24 sps:$4 sm:$0xff]   ;;  %v1340_v31 = vld [vmem:[%s1736_s1 + $0x280] ss:$24 sps:$4 sm:$0xff]  }
  0x21   :  { %735 = vmatprep.subr.bf16.mxu1 %v1250_v33  ;;  %v1346_v32 = vld [vmem:[%s1736_s1 + $0x2b4] ss:$24 sps:$4 sm:$0xff]   ;;  %v1344_v33 = vld [vmem:[%s1736_s1 + $0x2b0] ss:$24 sps:$4 sm:$0xff]  }
  0x23   :  { %683 = vmatpush1.bf16.msra.mxu0 %v1252_v34  ;;  %v1349_v34 = vld [vmem:[%s1736_s1 + $0x2e4] ss:$24 sps:$4 sm:$0xff]  }
  0x24   :  { %736 = vmatpush1.bf16.msra.mxu1 %v1253_v35  ;;  %684 = vmatprep.subr.bf16.mxu0 %v1254_v36  ;;  %v1347_v35 = vld [vmem:[%s1736_s1 + $0x2e0] ss:$24 sps:$4 sm:$0xff]   ;;  %v902_v36 = vlaneseq }
  0x25   :  { %737 = vmatprep.subr.bf16.mxu1 %v1256_v37 }
  0x26   :  { %v903_v37 = vshrl.u32 %v902_v36, 7 }
  0x27   :  { %685 = vmatpush1.bf16.msra.mxu0 %v1258_v38 }
  0x28   :  { %738 = vmatpush1.bf16.msra.mxu1 %v1259_v39  ;;  %686 = vmatprep.subr.bf16.mxu0 %v1260_v40  ;;  %v920_v38 = vsub.s32 4, %v903_v37  ;;  %v900_v39 = vld [vmem:[%s1738_s2] sm:$0x3f]  ;;  %v924_v40 = vsub.s32 5, %v903_v37 }
  0x29   :  { %739 = vmatprep.subr.bf16.mxu1 %v1262_v41 }
  0x2a   :  { %v1688_v41 = vrot.slane %v900_v39, %v920_v38 }
  0x2b   :  { %687 = vmatpush1.bf16.msra.mxu0 %v1264_v42  ;;  %v1690_v42 = vrot.slane %v900_v39, %v924_v40 }
  0x2c   :  { %740 = vmatpush1.bf16.msra.mxu1 %v1265_v43  ;;  %688 = vmatprep.subr.bf16.mxu0 %v1266_v44  ;;  %v904_v43 = vsub.s32 0, %v903_v37  ;;  %v912_v44 = vsub.s32 2, %v903_v37 }
  0x2d   :  { %741 = vmatprep.subr.bf16.mxu1 %v1268_v45  ;;  %v908_v45 = vsub.s32 1, %v903_v37 }
  0x2f   :  { %689 = vmatpush1.bf16.msra.mxu0 %v1270_v46  ;;  %v916_v46 = vsub.s32 3, %v903_v37 }
  0x30   :  { %742 = vmatpush1.bf16.msra.mxu1 %v1271_v47  ;;  %690 = vmatprep.subr.bf16.mxu0 %v1272_v49  ;;  %v905_v47 = vrot.slane %v900_v39, %v904_v43  ;;  %v909_v49 = vrot.slane %v900_v39, %v908_v45 }
  0x31   :  { %743 = vmatprep.subr.bf16.mxu1 %v1274_v50  ;;  %v917_v50 = vrot.slane %v900_v39, %v916_v46 }
  0x33   :  { %691 = vmatpush1.bf16.msra.mxu0 %v1276_v51 }
  0x34   :  { %744 = vmatpush1.bf16.msra.mxu1 %v1277_v52  ;;  %692 = vmatprep.subr.bf16.mxu0 %v1278_v53 }
  0x35   :  { %745 = vmatprep.subr.bf16.mxu1 %v1280_v54 }
  0x37   :  { %693 = vmatpush1.bf16.msra.mxu0 %v1282_v55 }
  0x38   :  { %746 = vmatpush1.bf16.msra.mxu1 %v1283_v56  ;;  %694 = vmatprep.subr.bf16.mxu0 %v1284_v57 }
  0x39   :  { %747 = vmatprep.subr.bf16.mxu1 %v1286_v58 }
  0x3b   :  { %695 = vmatpush1.bf16.msra.mxu0 %v1288_v59 }
  0x3c   :  { %748 = vmatpush1.bf16.msra.mxu1 %v1289_v60  ;;  %696 = vmatprep.subr.bf16.mxu0 %v1290_v61 }
  0x3d   :  { %749 = vmatprep.subr.bf16.mxu1 %v1292_v62 }
  0x3f   :  { %697 = vmatpush1.bf16.msra.mxu0 %v1294_v63 }
  0x40   :  { %750 = vmatpush1.bf16.msra.mxu1 %v1295_v0  ;;  %772 = vmatprep.subr.bf16.mxu0 %v1301_v1 }
  0x41   :  { %1168 = vmatprep.subr.bf16.mxu1 %v1301_v1 }
  0x42   :  { %699 = vmatmul.mubr.bf16.vlgmr.msra.gmra.mrb[0].mxu0 %v1575_v2 }
  0x43   :  { %752 = vmatmul.mubr.bf16.vlgmr.msra.gmra.mrb[0].mxu1 %v1575_v2  ;;  %773 = vmatpush1.bf16.msra.mxu0 %v1299_v3 }
  0x44   :  { %1184 = vmatpush1.bf16.msra.mxu1 %v1299_v3  ;;  %774 = vmatprep.subr.bf16.mxu0 %v1304_v4 }
  0x45   :  { %1169 = vmatprep.subr.bf16.mxu1 %v1304_v4  ;;  %708 = vmatprep.mubr.bf16.mxu0 %v1338_v5 }
  0x46   :  { %761 = vmatprep.mubr.bf16.mxu1 %v1338_v5 }
  0x47   :  { %775 = vmatpush1.bf16.msra.mxu0 %v1302_v6 }
  0x48   :  { %1185 = vmatpush1.bf16.msra.mxu1 %v1302_v6  ;;  %776 = vmatprep.subr.bf16.mxu0 %v1307_v7 }
  0x49   :  { %1170 = vmatprep.subr.bf16.mxu1 %v1307_v7 }
  0x4a   :  { %709 = vmatmul.mubr.bf16.gmra.mrb[4].mxu0 %v1597_v8 }
  0x4b   :  { %762 = vmatmul.mubr.bf16.gmra.mrb[4].mxu1 %v1597_v8  ;;  %777 = vmatpush1.bf16.msra.mxu0 %v1305_v9 }
  0x4c   :  { %1186 = vmatpush1.bf16.msra.mxu1 %v1305_v9  ;;  %778 = vmatprep.subr.bf16.mxu0 %v1310_v10 }
  0x4d   :  { %1171 = vmatprep.subr.bf16.mxu1 %v1310_v10  ;;  %804 = vmatprep.mubr.bf16.mxu0 %v1517_v48  ;;  %v913_v48 = vrot.slane %v900_v39, %v912_v44 }
  0x4e   :  { %814 = vmatprep.mubr.bf16.mxu1 %v1338_v5 }
  0x4f   :  { %779 = vmatpush1.bf16.msra.mxu0 %v1308_v11 }
  0x50   :  { %1187 = vmatpush1.bf16.msra.mxu1 %v1308_v11  ;;  %780 = vmatprep.subr.bf16.mxu0 %v1313_v12 }
  0x51   :  { %1172 = vmatprep.subr.bf16.mxu1 %v1313_v12 }
  0x53   :  { %781 = vmatpush1.bf16.msra.mxu0 %v1311_v13 }
  0x54   :  { %1188 = vmatpush1.bf16.msra.mxu1 %v1311_v13  ;;  %782 = vmatprep.subr.bf16.mxu0 %v1316_v14 }
  0x55   :  { %1173 = vmatprep.subr.bf16.mxu1 %v1316_v14 }
  0x57   :  { %783 = vmatpush1.bf16.msra.mxu0 %v1314_v15 }
  0x58   :  { %1189 = vmatpush1.bf16.msra.mxu1 %v1314_v15  ;;  %784 = vmatprep.subr.bf16.mxu0 %v1319_v16 }
  0x59   :  { %1174 = vmatprep.subr.bf16.mxu1 %v1319_v16 }
  0x5b   :  { %785 = vmatpush1.bf16.msra.mxu0 %v1317_v17 }
  0x5c   :  { %1190 = vmatpush1.bf16.msra.mxu1 %v1317_v17  ;;  %786 = vmatprep.subr.bf16.mxu0 %v1322_v18 }
  0x5d   :  { %1175 = vmatprep.subr.bf16.mxu1 %v1322_v18 }
  0x5f   :  { %787 = vmatpush1.bf16.msra.mxu0 %v1320_v19 }
  0x60   :  { %1191 = vmatpush1.bf16.msra.mxu1 %v1320_v19  ;;  %788 = vmatprep.subr.bf16.mxu0 %v1325_v20 }
  0x61   :  { %1176 = vmatprep.subr.bf16.mxu1 %v1325_v20 }
  0x63   :  { %789 = vmatpush1.bf16.msra.mxu0 %v1323_v21 }
  0x64   :  { %1192 = vmatpush1.bf16.msra.mxu1 %v1323_v21  ;;  %790 = vmatprep.subr.bf16.mxu0 %v1328_v22 }
  0x65   :  { %1177 = vmatprep.subr.bf16.mxu1 %v1328_v22 }
  0x67   :  { %791 = vmatpush1.bf16.msra.mxu0 %v1326_v23 }
  0x68   :  { %1193 = vmatpush1.bf16.msra.mxu1 %v1326_v23  ;;  %792 = vmatprep.subr.bf16.mxu0 %v1331_v24 }
  0x69   :  { %1178 = vmatprep.subr.bf16.mxu1 %v1331_v24 }
  0x6b   :  { %793 = vmatpush1.bf16.msra.mxu0 %v1329_v25 }
  0x6c   :  { %1194 = vmatpush1.bf16.msra.mxu1 %v1329_v25  ;;  %794 = vmatprep.subr.bf16.mxu0 %v1334_v26 }
  0x6d   :  { %1179 = vmatprep.subr.bf16.mxu1 %v1334_v26 }
  0x6f   :  { %795 = vmatpush1.bf16.msra.mxu0 %v1332_v27 }
  0x70   :  { %1195 = vmatpush1.bf16.msra.mxu1 %v1332_v27  ;;  %796 = vmatprep.subr.bf16.mxu0 %v1337_v28 }
  0x71   :  { %1180 = vmatprep.subr.bf16.mxu1 %v1337_v28 }
  0x73   :  { %797 = vmatpush1.bf16.msra.mxu0 %v1335_v29 }
  0x74   :  { %1196 = vmatpush1.bf16.msra.mxu1 %v1335_v29  ;;  %798 = vmatprep.subr.bf16.mxu0 %v1342_v30 }
  0x75   :  { %1181 = vmatprep.subr.bf16.mxu1 %v1342_v30 }
  0x77   :  { %799 = vmatpush1.bf16.msra.mxu0 %v1340_v31 }
  0x78   :  { %1197 = vmatpush1.bf16.msra.mxu1 %v1340_v31  ;;  %800 = vmatprep.subr.bf16.mxu0 %v1346_v32 }
  0x79   :  { %1182 = vmatprep.subr.bf16.mxu1 %v1346_v32 }
  0x7b   :  { %801 = vmatpush1.bf16.msra.mxu0 %v1344_v33 }
  0x7c   :  { %1198 = vmatpush1.bf16.msra.mxu1 %v1344_v33  ;;  %802 = vmatprep.subr.bf16.mxu0 %v1349_v34 }
  0x7d   :  { %1183 = vmatprep.subr.bf16.mxu1 %v1349_v34 }
  0x7f   :  { %803 = vmatpush1.bf16.msra.mxu0 %v1347_v35 }
  0x80   :  { %1199 = vmatpush1.bf16.msra.mxu1 %v1347_v35 }
  0x82   :  { %805 = vmatmul.mubr.bf16.vlgmr.msra.gmra.mrb[8].mxu0 %v1575_v2 }
  0x83   :  { %815 = vmatmul.mubr.bf16.vlgmr.msra.gmra.mrb[8].mxu1 %v1597_v8 }
 0x115   :  { %v700_v51 = vpop.f32.mrb[0].mxu0 }
 0x116   :  { %v753_v52 = vpop.f32.mrb[0].mxu1  ;;  %v932_v53 = vadd.f32 %v905_v47, %v700_v51  ;;  %v702_v55 = vpop.f32.mrb[1].mxu0 }
 0x117   :  { %v934_v54 = vadd.f32 %v913_v48, %v753_v52  ;;  %v755_v56 = vpop.f32.mrb[1].mxu1  ;;  %v933_v57 = vadd.f32 %v909_v49, %v702_v55  ;;  %v704_v59 = vpop.f32.mrb[2].mxu0 }
 0x118   :  { %v935_v58 = vadd.f32 %v917_v50, %v755_v56  ;;  %v757_v60 = vpop.f32.mrb[2].mxu1  ;;  %v938_v61 = vadd.f32 %v905_v47, %v704_v59  ;;  %v706_v63 = vpop.f32.mrb[3].mxu0 }
 0x119   :  { %v940_v62 = vadd.f32 %v913_v48, %v757_v60  ;;  %v759_v0 = vpop.f32.mrb[3].mxu1  ;;  %v1156_v1 = vpack.c.bf16 %v933_v57, %v932_v53  ;;  %v939_v3 = vadd.f32 %v909_v49, %v706_v63 }
 0x11a   :  { %v1157_v2 = vpack.c.bf16 %v935_v58, %v934_v54  ;;  %v941_v4 = vadd.f32 %v917_v50, %v759_v0 }
 0x11b   :  { %1028 = vst [vmem:[%s1739_s3] sm:$0xff] %v1156_v1  ;;  %v1159_v5 = vpack.c.bf16 %v939_v3, %v938_v61 }
 0x11c   :  { %1029 = vst [vmem:[%s1739_s3 + $0x8] sm:$0xff] %v1157_v2  ;;  %v1160_v6 = vpack.c.bf16 %v941_v4, %v940_v62 }
 0x11d   :  { %1031 = vst [vmem:[%s1739_s3 + $0x18] sm:$0xff] %v1159_v5  ;;  %v710_v7 = vpop.f32.mrb[4].mxu0 }
 0x11e   :  { %1032 = vst [vmem:[%s1739_s3 + $0x20] sm:$0xff] %v1160_v6  ;;  %v763_v8 = vpop.f32.mrb[4].mxu1  ;;  %v944_v9 = vadd.f32 %v905_v47, %v710_v7  ;;  %v712_v11 = vpop.f32.mrb[5].mxu0 }
 0x11f   :  { %v946_v10 = vadd.f32 %v913_v48, %v763_v8  ;;  %v765_v12 = vpop.f32.mrb[5].mxu1  ;;  %v945_v13 = vadd.f32 %v909_v49, %v712_v11  ;;  %v714_v15 = vpop.f32.mrb[6].mxu0 }
 0x120   :  { %v947_v14 = vadd.f32 %v917_v50, %v765_v12  ;;  %v767_v16 = vpop.f32.mrb[6].mxu1  ;;  %v950_v17 = vadd.f32 %v905_v47, %v714_v15  ;;  %v716_v19 = vpop.f32.mrb[7].mxu0 }
 0x121   :  { %v952_v18 = vadd.f32 %v913_v48, %v767_v16  ;;  %v769_v20 = vpop.f32.mrb[7].mxu1  ;;  %v1162_v21 = vpack.c.bf16 %v945_v13, %v944_v9  ;;  %v951_v23 = vadd.f32 %v909_v49, %v716_v19 }
 0x122   :  { %v1163_v22 = vpack.c.bf16 %v947_v14, %v946_v10  ;;  %v953_v24 = vadd.f32 %v917_v50, %v769_v20 }
 0x123   :  { %1034 = vst [vmem:[%s1739_s3 + $0x30] sm:$0xff] %v1162_v21  ;;  %v1165_v25 = vpack.c.bf16 %v951_v23, %v950_v17 }
 0x124   :  { %1035 = vst [vmem:[%s1739_s3 + $0x38] sm:$0xff] %v1163_v22  ;;  %v1166_v26 = vpack.c.bf16 %v953_v24, %v952_v18 }
 0x125   :  { %1037 = vst [vmem:[%s1739_s3 + $0x48] sm:$0xff] %v1165_v25 }
 0x126   :  { %1038 = vst [vmem:[%s1739_s3 + $0x50] sm:$0xff] %v1166_v26 }
 0x155   :  { %v806_v27 = vpop.f32.mrb[8].mxu0 }
 0x156   :  { %v816_v28 = vpop.f32.mrb[8].mxu1  ;;  %v936_v29 = vadd.f32 %v1688_v41, %v806_v27  ;;  %v808_v31 = vpop.f32.mrb[9].mxu0 }
 0x157   :  { %v948_v30 = vadd.f32 %v1688_v41, %v816_v28  ;;  %v818_v32 = vpop.f32.mrb[9].mxu1  ;;  %v937_v33 = vadd.f32 %v1690_v42, %v808_v31  ;;  %v810_v35 = vpop.f32.mrb[10].mxu0 }
 0x158   :  { %v949_v34 = vadd.f32 %v1690_v42, %v818_v32  ;;  %v820_v36 = vpop.f32.mrb[10].mxu1  ;;  %v942_v37 = vadd.f32 %v1688_v41, %v810_v35  ;;  %v812_v39 = vpop.f32.mrb[11].mxu0 }
 0x159   :  { %v954_v38 = vadd.f32 %v1688_v41, %v820_v36  ;;  %v822_v40 = vpop.f32.mrb[11].mxu1  ;;  %v1158_v43 = vpack.c.bf16 %v937_v33, %v936_v29  ;;  %v943_v45 = vadd.f32 %v1690_v42, %v812_v39 }
 0x15a   :  { %v1164_v44 = vpack.c.bf16 %v949_v34, %v948_v30  ;;  %v955_v46 = vadd.f32 %v1690_v42, %v822_v40 }
 0x15b   :  { %1030 = vst [vmem:[%s1739_s3 + $0x10] sm:$0xff] %v1158_v43  ;;  %v1161_v47 = vpack.c.bf16 %v943_v45, %v942_v37 }
 0x15c   :  { %1036 = vst [vmem:[%s1739_s3 + $0x40] sm:$0xff] %v1164_v44  ;;  %v1167_v48 = vpack.c.bf16 %v955_v46, %v954_v38 }
 0x15d   :  { %1033 = vst [vmem:[%s1739_s3 + $0x28] sm:$0xff] %v1161_v47 }
 0x15e   :  { %1039 = vst [vmem:[%s1739_s3 + $0x58] sm:$0xff] %v1167_v48 }

// kernel: bert_classifier_forward.17
= control target key start
LH: loop header
LB: loop body
LE: loop exit
PB: predicated region body
PF: predicated region fallthrough
CT: control target
= control target key end

     0   :  { %s1283_s1 = inlined_call_operand.vmem [shape: bf16[512,256], index: 1, kind: input, shape index: {}]   ;;  %s1284_s0 = inlined_call_operand.vmem [shape: bf16[32,512], index: 0, kind: input, shape index: {}]   ;;  %s1285_s2 = inlined_call_operand.vmem [shape: f32[1,256], index: 2, kind: input, shape index: {}]   ;;  %s1286_s3 = inlined_call_operand.vmem [shape: bf16[32,256], index: 3, kind: input, shape index: {}]   ;;  %s1287_s4 = inlined_call_operand.vmem [shape: f32[1,256], index: 4, kind: input, shape index: {}]   ;;  %s1288_s5 = inlined_call_operand.vmem [shape: f32[1,256], index: 5, kind: input, shape index: {}]   ;;  %s1289_s6 = inlined_call_operand.vmem [shape: bf16[32,256], index: 6, kind: output, shape index: {}]  }
   0x1   :  { %v873_v0 = vld [vmem:[%s1283_s1 + $0x4] ss:$8 sps:$4 sm:$0xff]   ;;  %v877_v2 = vld [vmem:[%s1283_s1] ss:$8 sps:$4 sm:$0xff]   ;;  %v879_v4 = vld [vmem:[%s1283_s1 + $0x14] ss:$8 sps:$4 sm:$0xff]  }
   0x2   :  { %v875_v1 = vld [vmem:[%s1283_s1 + $0x104] ss:$8 sps:$4 sm:$0xff]   ;;  %475 = vmatprep.subr.bf16.mxu1 %v873_v0  ;;  %v878_v3 = vld [vmem:[%s1283_s1 + $0x100] ss:$8 sps:$4 sm:$0xff]   ;;  %v881_v5 = vld [vmem:[%s1283_s1 + $0x114] ss:$8 sps:$4 sm:$0xff]  }
   0x3   :  { %528 = vmatprep.subr.bf16.mxu0 %v875_v1  ;;  %476 = vmatpush1.bf16.msra.mxu1 %v877_v2  ;;  %v883_v6 = vld [vmem:[%s1283_s1 + $0x10] ss:$8 sps:$4 sm:$0xff]   ;;  %v885_v8 = vld [vmem:[%s1283_s1 + $0x24] ss:$8 sps:$4 sm:$0xff]   ;;  %v889_v10 = vld [vmem:[%s1283_s1 + $0x20] ss:$8 sps:$4 sm:$0xff]  }
   0x4   :  { %529 = vmatpush1.bf16.msra.mxu0 %v878_v3  ;;  %477 = vmatprep.subr.bf16.mxu1 %v879_v4  ;;  %v884_v7 = vld [vmem:[%s1283_s1 + $0x110] ss:$8 sps:$4 sm:$0xff]   ;;  %v887_v9 = vld [vmem:[%s1283_s1 + $0x124] ss:$8 sps:$4 sm:$0xff]   ;;  %v890_v11 = vld [vmem:[%s1283_s1 + $0x120] ss:$8 sps:$4 sm:$0xff]  }
   0x5   :  { %530 = vmatprep.subr.bf16.mxu0 %v881_v5  ;;  %v891_v12 = vld [vmem:[%s1283_s1 + $0x34] ss:$8 sps:$4 sm:$0xff]   ;;  %v895_v14 = vld [vmem:[%s1283_s1 + $0x30] ss:$8 sps:$4 sm:$0xff]   ;;  %v897_v16 = vld [vmem:[%s1283_s1 + $0x44] ss:$8 sps:$4 sm:$0xff]  }
   0x6   :  { %v893_v13 = vld [vmem:[%s1283_s1 + $0x134] ss:$8 sps:$4 sm:$0xff]   ;;  %v896_v15 = vld [vmem:[%s1283_s1 + $0x130] ss:$8 sps:$4 sm:$0xff]   ;;  %v899_v17 = vld [vmem:[%s1283_s1 + $0x144] ss:$8 sps:$4 sm:$0xff]  }
   0x7   :  { %478 = vmatpush1.bf16.msra.mxu1 %v883_v6  ;;  %v901_v18 = vld [vmem:[%s1283_s1 + $0x40] ss:$8 sps:$4 sm:$0xff]   ;;  %v903_v20 = vld [vmem:[%s1283_s1 + $0x54] ss:$8 sps:$4 sm:$0xff]   ;;  %v907_v22 = vld [vmem:[%s1283_s1 + $0x50] ss:$8 sps:$4 sm:$0xff]  }
   0x8   :  { %531 = vmatpush1.bf16.msra.mxu0 %v884_v7  ;;  %479 = vmatprep.subr.bf16.mxu1 %v885_v8  ;;  %v902_v19 = vld [vmem:[%s1283_s1 + $0x140] ss:$8 sps:$4 sm:$0xff]   ;;  %v905_v21 = vld [vmem:[%s1283_s1 + $0x154] ss:$8 sps:$4 sm:$0xff]   ;;  %v908_v23 = vld [vmem:[%s1283_s1 + $0x150] ss:$8 sps:$4 sm:$0xff]   ;;  %v610_v8 = vlaneseq }
   0x9   :  { %532 = vmatprep.subr.bf16.mxu0 %v887_v9  ;;  %v909_v24 = vld [vmem:[%s1283_s1 + $0x64] ss:$8 sps:$4 sm:$0xff]   ;;  %v913_v26 = vld [vmem:[%s1283_s1 + $0x60] ss:$8 sps:$4 sm:$0xff]   ;;  %v915_v28 = vld [vmem:[%s1283_s1 + $0x74] ss:$8 sps:$4 sm:$0xff]  }
   0xa   :  { %v911_v25 = vld [vmem:[%s1283_s1 + $0x164] ss:$8 sps:$4 sm:$0xff]   ;;  %v914_v27 = vld [vmem:[%s1283_s1 + $0x160] ss:$8 sps:$4 sm:$0xff]   ;;  %v917_v29 = vld [vmem:[%s1283_s1 + $0x174] ss:$8 sps:$4 sm:$0xff]  }
   0xb   :  { %480 = vmatpush1.bf16.msra.mxu1 %v889_v10  ;;  %v919_v30 = vld [vmem:[%s1283_s1 + $0x70] ss:$8 sps:$4 sm:$0xff]   ;;  %v921_v32 = vld [vmem:[%s1283_s1 + $0x84] ss:$8 sps:$4 sm:$0xff]   ;;  %v925_v34 = vld [vmem:[%s1283_s1 + $0x80] ss:$8 sps:$4 sm:$0xff]  }
   0xc   :  { %533 = vmatpush1.bf16.msra.mxu0 %v890_v11  ;;  %481 = vmatprep.subr.bf16.mxu1 %v891_v12  ;;  %v920_v31 = vld [vmem:[%s1283_s1 + $0x170] ss:$8 sps:$4 sm:$0xff]   ;;  %v923_v33 = vld [vmem:[%s1283_s1 + $0x184] ss:$8 sps:$4 sm:$0xff]   ;;  %v926_v35 = vld [vmem:[%s1283_s1 + $0x180] ss:$8 sps:$4 sm:$0xff]  }
   0xd   :  { %534 = vmatprep.subr.bf16.mxu0 %v893_v13  ;;  %v927_v36 = vld [vmem:[%s1283_s1 + $0x94] ss:$8 sps:$4 sm:$0xff]   ;;  %v931_v38 = vld [vmem:[%s1283_s1 + $0x90] ss:$8 sps:$4 sm:$0xff]   ;;  %v933_v40 = vld [vmem:[%s1283_s1 + $0xa4] ss:$8 sps:$4 sm:$0xff]  }
   0xe   :  { %v929_v37 = vld [vmem:[%s1283_s1 + $0x194] ss:$8 sps:$4 sm:$0xff]   ;;  %v932_v39 = vld [vmem:[%s1283_s1 + $0x190] ss:$8 sps:$4 sm:$0xff]   ;;  %v935_v41 = vld [vmem:[%s1283_s1 + $0x1a4] ss:$8 sps:$4 sm:$0xff]  }
   0xf   :  { %482 = vmatpush1.bf16.msra.mxu1 %v895_v14  ;;  %v937_v42 = vld [vmem:[%s1283_s1 + $0xa0] ss:$8 sps:$4 sm:$0xff]   ;;  %v939_v44 = vld [vmem:[%s1283_s1 + $0xb4] ss:$8 sps:$4 sm:$0xff]   ;;  %v943_v46 = vld [vmem:[%s1283_s1 + $0xb0] ss:$8 sps:$4 sm:$0xff]  }
  0x10   :  { %535 = vmatpush1.bf16.msra.mxu0 %v896_v15  ;;  %483 = vmatprep.subr.bf16.mxu1 %v897_v16  ;;  %v938_v43 = vld [vmem:[%s1283_s1 + $0x1a0] ss:$8 sps:$4 sm:$0xff]   ;;  %v941_v45 = vld [vmem:[%s1283_s1 + $0x1b4] ss:$8 sps:$4 sm:$0xff]   ;;  %v944_v47 = vld [vmem:[%s1283_s1 + $0x1b0] ss:$8 sps:$4 sm:$0xff]  }
  0x11   :  { %536 = vmatprep.subr.bf16.mxu0 %v899_v17  ;;  %v945_v48 = vld [vmem:[%s1283_s1 + $0xc4] ss:$8 sps:$4 sm:$0xff]   ;;  %v949_v52 = vld [vmem:[%s1283_s1 + $0xc0] ss:$8 sps:$4 sm:$0xff]   ;;  %v951_v54 = vld [vmem:[%s1283_s1 + $0xd4] ss:$8 sps:$4 sm:$0xff]  }
  0x12   :  { %v971_v49 = vld [vmem:[%s1284_s0 + $0x4] ss:$16 sps:$4 sm:$0xff]   ;;  %v974_v51 = vld [vmem:[%s1284_s0 + $0xc] ss:$16 sps:$4 sm:$0xff]   ;;  %v950_v53 = vld [vmem:[%s1283_s1 + $0x1c0] ss:$8 sps:$4 sm:$0xff]  }
  0x13   :  { %484 = vmatpush1.bf16.msra.mxu1 %v901_v18  ;;  %v947_v50 = vld [vmem:[%s1283_s1 + $0x1c4] ss:$8 sps:$4 sm:$0xff]   ;;  %507 = vmatprep.mubr.bf16.mxu1 %v971_v49  ;;  %v953_v55 = vld [vmem:[%s1283_s1 + $0x1d4] ss:$8 sps:$4 sm:$0xff]   ;;  %v955_v56 = vld [vmem:[%s1283_s1 + $0xd0] ss:$8 sps:$4 sm:$0xff]  }
  0x14   :  { %537 = vmatpush1.bf16.msra.mxu0 %v902_v19  ;;  %485 = vmatprep.subr.bf16.mxu1 %v903_v20  ;;  %v956_v57 = vld [vmem:[%s1283_s1 + $0x1d0] ss:$8 sps:$4 sm:$0xff]   ;;  %v957_v58 = vld [vmem:[%s1283_s1 + $0xe4] ss:$8 sps:$4 sm:$0xff]   ;;  %v961_v60 = vld [vmem:[%s1283_s1 + $0xe0] ss:$8 sps:$4 sm:$0xff]  }
  0x15   :  { %538 = vmatprep.subr.bf16.mxu0 %v905_v21  ;;  %560 = vmatprep.mubr.bf16.mxu0 %v974_v51  ;;  %v959_v59 = vld [vmem:[%s1283_s1 + $0x1e4] ss:$8 sps:$4 sm:$0xff]   ;;  %v962_v61 = vld [vmem:[%s1283_s1 + $0x1e0] ss:$8 sps:$4 sm:$0xff]   ;;  %v963_v62 = vld [vmem:[%s1283_s1 + $0xf4] ss:$8 sps:$4 sm:$0xff]  }
  0x16   :  { %v965_v63 = vld [vmem:[%s1283_s1 + $0x1f4] ss:$8 sps:$4 sm:$0xff]   ;;  %v967_v0 = vld [vmem:[%s1283_s1 + $0xf0] ss:$8 sps:$4 sm:$0xff]   ;;  %v611_v9 = vshrl.u32 %v610_v8, 7  ;;  %v628_v13 = vld [vmem:[%s1286_s3] sm:$0xff] }
  0x17   :  { %486 = vmatpush1.bf16.msra.mxu1 %v907_v22  ;;  %v968_v1 = vld [vmem:[%s1283_s1 + $0x1f0] ss:$8 sps:$4 sm:$0xff]   ;;  %v975_v4 = vld [vmem:[%s1284_s0 + $0x24] ss:$16 sps:$4 sm:$0xff]   ;;  %v977_v5 = vld [vmem:[%s1284_s0 + $0x2c] ss:$16 sps:$4 sm:$0xff]   ;;  %v632_v21 = vunpack.c.l.bf16 %v628_v13 }
  0x18   :  { %539 = vmatpush1.bf16.msra.mxu0 %v908_v23  ;;  %487 = vmatprep.subr.bf16.mxu1 %v909_v24  ;;  %v969_v2 = vld [vmem:[%s1284_s0] ss:$16 sps:$4 sm:$0xff]   ;;  %v972_v3 = vld [vmem:[%s1284_s0 + $0x8] ss:$16 sps:$4 sm:$0xff]   ;;  %v1240_v10 = vsub.s32 0, %v611_v9  ;;  %v1245_v12 = vsub.s32 1, %v611_v9 }
  0x19   :  { %540 = vmatprep.subr.bf16.mxu0 %v911_v25  ;;  %v979_v6 = vld [vmem:[%s1284_s0 + $0x20] ss:$16 sps:$4 sm:$0xff]   ;;  %v980_v7 = vld [vmem:[%s1284_s0 + $0x28] ss:$16 sps:$4 sm:$0xff]  }
  0x1a   :  { %v608_v11 = vld [vmem:[%s1285_s2] sm:$0x3]  ;;  %v629_v22 = vld [vmem:[%s1286_s3 + $0x8] sm:$0xff] }
  0x1b   :  { %488 = vmatpush1.bf16.msra.mxu1 %v913_v26  ;;  %v613_v14 = vrot.slane %v608_v11, %v1240_v10  ;;  %v617_v17 = vrot.slane %v608_v11, %v1245_v12  ;;  %v633_v26 = vunpack.c.h.bf16 %v628_v13 }
  0x1c   :  { %541 = vmatpush1.bf16.msra.mxu0 %v914_v27  ;;  %489 = vmatprep.subr.bf16.mxu1 %v915_v28 }
  0x1d   :  { %542 = vmatprep.subr.bf16.mxu0 %v917_v29 }
  0x1f   :  { %490 = vmatpush1.bf16.msra.mxu1 %v919_v30 }
  0x20   :  { %543 = vmatpush1.bf16.msra.mxu0 %v920_v31  ;;  %491 = vmatprep.subr.bf16.mxu1 %v921_v32 }
  0x21   :  { %544 = vmatprep.subr.bf16.mxu0 %v923_v33  ;;  %v634_v33 = vunpack.c.l.bf16 %v629_v22 }
  0x23   :  { %492 = vmatpush1.bf16.msra.mxu1 %v925_v34  ;;  %v635_v34 = vunpack.c.h.bf16 %v629_v22 }
  0x24   :  { %545 = vmatpush1.bf16.msra.mxu0 %v926_v35  ;;  %493 = vmatprep.subr.bf16.mxu1 %v927_v36 }
  0x25   :  { %546 = vmatprep.subr.bf16.mxu0 %v929_v37 }
  0x27   :  { %494 = vmatpush1.bf16.msra.mxu1 %v931_v38 }
  0x28   :  { %547 = vmatpush1.bf16.msra.mxu0 %v932_v39  ;;  %495 = vmatprep.subr.bf16.mxu1 %v933_v40  ;;  %v630_v39 = vld [vmem:[%s1286_s3 + $0x10] sm:$0xff] }
  0x29   :  { %548 = vmatprep.subr.bf16.mxu0 %v935_v41  ;;  %v636_v49 = vunpack.c.l.bf16 %v630_v39 }
  0x2b   :  { %496 = vmatpush1.bf16.msra.mxu1 %v937_v42 }
  0x2c   :  { %549 = vmatpush1.bf16.msra.mxu0 %v938_v43  ;;  %497 = vmatprep.subr.bf16.mxu1 %v939_v44 }
  0x2d   :  { %550 = vmatprep.subr.bf16.mxu0 %v941_v45  ;;  %v631_v45 = vld [vmem:[%s1286_s3 + $0x18] sm:$0xff] }
  0x2f   :  { %498 = vmatpush1.bf16.msra.mxu1 %v943_v46 }
  0x30   :  { %551 = vmatpush1.bf16.msra.mxu0 %v944_v47  ;;  %499 = vmatprep.subr.bf16.mxu1 %v945_v48 }
  0x31   :  { %552 = vmatprep.subr.bf16.mxu0 %v947_v50 }
  0x33   :  { %500 = vmatpush1.bf16.msra.mxu1 %v949_v52 }
  0x34   :  { %553 = vmatpush1.bf16.msra.mxu0 %v950_v53  ;;  %501 = vmatprep.subr.bf16.mxu1 %v951_v54  ;;  %v637_v53 = vunpack.c.h.bf16 %v630_v39 }
  0x35   :  { %554 = vmatprep.subr.bf16.mxu0 %v953_v55 }
  0x37   :  { %502 = vmatpush1.bf16.msra.mxu1 %v955_v56 }
  0x38   :  { %555 = vmatpush1.bf16.msra.mxu0 %v956_v57  ;;  %503 = vmatprep.subr.bf16.mxu1 %v957_v58  ;;  %v638_v58 = vunpack.c.l.bf16 %v631_v45 }
  0x39   :  { %556 = vmatprep.subr.bf16.mxu0 %v959_v59 }
  0x3b   :  { %504 = vmatpush1.bf16.msra.mxu1 %v961_v60 }
  0x3c   :  { %557 = vmatpush1.bf16.msra.mxu0 %v962_v61  ;;  %505 = vmatprep.subr.bf16.mxu1 %v963_v62  ;;  %v639_v62 = vunpack.c.h.bf16 %v631_v45  ;;  %v713_v45 = vld [vmem:[%s1287_s4] sm:$0x3] }
  0x3d   :  { %558 = vmatprep.subr.bf16.mxu0 %v965_v63 }
  0x3f   :  { %506 = vmatpush1.bf16.msra.mxu1 %v967_v0 }
  0x40   :  { %559 = vmatpush1.bf16.msra.mxu0 %v968_v1 }
  0x42   :  { %508 = vmatmul.mubr.bf16.vlgmr.msra.gmra.mrb[0].mxu1 %v969_v2 }
  0x43   :  { %561 = vmatmul.mubr.bf16.vlgmr.msra.gmra.mrb[0].mxu0 %v972_v3  ;;  %517 = vmatprep.mubr.bf16.mxu1 %v975_v4 }
  0x44   :  { %570 = vmatprep.mubr.bf16.mxu0 %v977_v5 }
  0x4a   :  { %518 = vmatmul.mubr.bf16.gmra.mrb[4].mxu1 %v979_v6 }
  0x4b   :  { %571 = vmatmul.mubr.bf16.gmra.mrb[4].mxu0 %v980_v7 }
 0x115   :  { %v509_v15 = vpop.f32.mrb[0].mxu1 }
 0x116   :  { %v562_v16 = vpop.f32.mrb[0].mxu0  ;;  %v511_v19 = vpop.f32.mrb[1].mxu1 }
 0x117   :  { %v563_v18 = vadd.f32 %v562_v16, %v509_v15  ;;  %v564_v20 = vpop.f32.mrb[1].mxu0  ;;  %v513_v24 = vpop.f32.mrb[2].mxu1 }
 0x118   :  { %v565_v23 = vadd.f32 %v564_v20, %v511_v19  ;;  %v566_v25 = vpop.f32.mrb[2].mxu0  ;;  %v515_v29 = vpop.f32.mrb[3].mxu1 }
 0x119   :  { %v620_v27 = vadd.f32 %v613_v14, %v563_v18  ;;  %v567_v28 = vadd.f32 %v566_v25, %v513_v24  ;;  %v568_v30 = vpop.f32.mrb[3].mxu0 }
 0x11a   :  { %v621_v31 = vadd.f32 %v617_v17, %v565_v23  ;;  %v569_v32 = vadd.f32 %v568_v30, %v515_v29 }
 0x11b   :  { %v622_v35 = vadd.f32 %v613_v14, %v567_v28  ;;  %v640_v36 = vadd.f32 %v632_v21, %v620_v27 }
 0x11c   :  { %v623_v37 = vadd.f32 %v617_v17, %v569_v32  ;;  %v641_v38 = vadd.f32 %v633_v26, %v621_v31 }
 0x11d   :  { %v519_v40 = vpop.f32.mrb[4].mxu1  ;;  %v642_v43 = vadd.f32 %v634_v33, %v622_v35 }
 0x11e   :  { %v572_v41 = vpop.f32.mrb[4].mxu0  ;;  %v648_v42 = vadd.f32 %v641_v38, %v640_v36  ;;  %v643_v44 = vadd.f32 %v635_v34, %v623_v37  ;;  %v521_v47 = vpop.f32.mrb[5].mxu1 }
 0x11f   :  { %v573_v46 = vadd.f32 %v572_v41, %v519_v40  ;;  %v574_v48 = vpop.f32.mrb[5].mxu0  ;;  %v523_v52 = vpop.f32.mrb[6].mxu1 }
 0x120   :  { %v575_v50 = vadd.f32 %v574_v48, %v521_v47  ;;  %v576_v51 = vpop.f32.mrb[6].mxu0  ;;  %649 = vadd.xlane.f32.xlu0 %v648_v42  ;;  %v525_v56 = vpop.f32.mrb[7].mxu1  ;;  %v651_v61 = vadd.f32 %v643_v44, %v642_v43  ;;  %v733_v48 = vld [vmem:[%s1288_s5] sm:$0x3] }
 0x121   :  { %v624_v54 = vadd.f32 %v613_v14, %v573_v46  ;;  %v577_v55 = vadd.f32 %v576_v51, %v523_v52  ;;  %v578_v57 = vpop.f32.mrb[7].mxu0  ;;  %v722_v51 = vrot.slane %v713_v45, %v1245_v12 }
 0x122   :  { %v625_v59 = vadd.f32 %v617_v17, %v575_v50  ;;  %v579_v60 = vadd.f32 %v578_v57, %v525_v56  ;;  %v718_v50 = vrot.slane %v713_v45, %v1240_v10 }
 0x123   :  { %v626_v63 = vadd.f32 %v613_v14, %v577_v55  ;;  %v644_v0 = vadd.f32 %v636_v49, %v624_v54  ;;  %v738_v54 = vrot.slane %v733_v48, %v1240_v10  ;;  %v742_v55 = vrot.slane %v733_v48, %v1245_v12 }
 0x124   :  { %v627_v1 = vadd.f32 %v617_v17, %v579_v60  ;;  %652 = vadd.xlane.f32.xlu0 %v651_v61  ;;  %v645_v2 = vadd.f32 %v637_v53, %v625_v59 }
 0x125   :  { %v646_v4 = vadd.f32 %v638_v58, %v626_v63 }
 0x126   :  { %v654_v3 = vadd.f32 %v645_v2, %v644_v0  ;;  %v647_v5 = vadd.f32 %v639_v62, %v627_v1 }
 0x128   :  { %655 = vadd.xlane.f32.xlu1 %v654_v3  ;;  %v657_v6 = vadd.f32 %v647_v5, %v646_v4 }
 0x12c   :  { %658 = vadd.xlane.f32.xlu1 %v657_v6 }
 0x1ad   :  { %v650_v7 = vpop.xlane.xlu0 %649 }
 0x1ae   :  { %v661_v8 = vmul.f32 0.00390625, %v650_v7 }
 0x1b0   :  { %v665_v9 = vsub.f32 %v640_v36, %v661_v8  ;;  %v666_v11 = vsub.f32 %v641_v38, %v661_v8 }
 0x1b1   :  { %v653_v13 = vpop.xlane.xlu0 %652 }
 0x1b2   :  { %v662_v15 = vmul.f32 0.00390625, %v653_v13  ;;  %v673_v16 = vmul.f32 %v665_v9, %v665_v9  ;;  %v674_v18 = vmul.f32 %v666_v11, %v666_v11 }
 0x1b4   :  { %v667_v19 = vsub.f32 %v642_v43, %v662_v15  ;;  %v668_v14 = vsub.f32 %v643_v44, %v662_v15  ;;  %v681_v20 = vadd.f32 %v674_v18, %v673_v16 }
 0x1b5   :  { %v656_v17 = vpop.xlane.xlu1 %655 }
 0x1b6   :  { %v663_v21 = vmul.f32 0.00390625, %v656_v17  ;;  %682 = vadd.xlane.f32.xlu0 %v681_v20  ;;  %v675_v22 = vmul.f32 %v667_v19, %v667_v19  ;;  %v676_v23 = vmul.f32 %v668_v14, %v668_v14 }
 0x1b8   :  { %v669_v24 = vsub.f32 %v644_v0, %v663_v21  ;;  %v670_v25 = vsub.f32 %v645_v2, %v663_v21  ;;  %v684_v26 = vadd.f32 %v676_v23, %v675_v22 }
 0x1b9   :  { %v659_v27 = vpop.xlane.xlu1 %658 }
 0x1ba   :  { %v664_v28 = vmul.f32 0.00390625, %v659_v27  ;;  %685 = vadd.xlane.f32.xlu1 %v684_v26  ;;  %v677_v29 = vmul.f32 %v669_v24, %v669_v24  ;;  %v678_v30 = vmul.f32 %v670_v25, %v670_v25 }
 0x1bc   :  { %v671_v31 = vsub.f32 %v646_v4, %v664_v28  ;;  %v672_v32 = vsub.f32 %v647_v5, %v664_v28  ;;  %v687_v33 = vadd.f32 %v678_v30, %v677_v29 }
 0x1be   :  { %688 = vadd.xlane.f32.xlu0 %v687_v33  ;;  %v679_v34 = vmul.f32 %v671_v31, %v671_v31  ;;  %v680_v35 = vmul.f32 %v672_v32, %v672_v32 }
 0x1c0   :  { %v690_v36 = vadd.f32 %v680_v35, %v679_v34 }
 0x1c2   :  { %691 = vadd.xlane.f32.xlu1 %v690_v36 }
 0x243   :  { %v683_v37 = vpop.xlane.xlu0 %682 }
 0x244   :  { %v693_v38 = vmul.f32 0.00390625, %v683_v37 }
 0x246   :  { %v697_v39 = vadd.f32 1e-12, %v693_v38 }
 0x247   :  { %v686_v40 = vpop.xlane.xlu1 %685 }
 0x248   :  { %981 = vrsqrt.f32 %v697_v39  ;;  %v694_v41 = vmul.f32 0.00390625, %v686_v40 }
 0x24a   :  { %v698_v42 = vadd.f32 1e-12, %v694_v41 }
 0x24b   :  { %v689_v43 = vpop.xlane.xlu0 %688 }
 0x24c   :  { %983 = vrsqrt.f32 %v698_v42  ;;  %v695_v44 = vmul.f32 0.00390625, %v689_v43 }
 0x24e   :  { %v699_v46 = vadd.f32 1e-12, %v695_v44 }
 0x24f   :  { %v692_v47 = vpop.xlane.xlu1 %691 }
 0x250   :  { %985 = vrsqrt.f32 %v699_v46  ;;  %v696_v49 = vmul.f32 0.00390625, %v692_v47 }
 0x252   :  { %v982_v52 = vpop.eup %981  ;;  %v700_v53 = vadd.f32 1e-12, %v696_v49 }
 0x253   :  { %v705_v56 = vmul.f32 %v982_v52, %v665_v9  ;;  %v706_v57 = vmul.f32 %v982_v52, %v666_v11 }
 0x254   :  { %987 = vrsqrt.f32 %v700_v53 }
 0x255   :  { %v725_v58 = vmul.f32 %v718_v50, %v705_v56  ;;  %v726_v59 = vmul.f32 %v722_v51, %v706_v57 }
 0x256   :  { %v984_v60 = vpop.eup %983 }
 0x257   :  { %v745_v61 = vadd.f32 %v738_v54, %v725_v58  ;;  %v746_v62 = vadd.f32 %v742_v55, %v726_v59  ;;  %v707_v63 = vmul.f32 %v984_v60, %v667_v19  ;;  %v708_v0 = vmul.f32 %v984_v60, %v668_v14 }
 0x259   :  { %v861_v1 = vpack.c.bf16 %v746_v62, %v745_v61  ;;  %v727_v2 = vmul.f32 %v718_v50, %v707_v63  ;;  %v728_v3 = vmul.f32 %v722_v51, %v708_v0 }
 0x25a   :  { %v986_v4 = vpop.eup %985 }
 0x25b   :  { %777 = vst [vmem:[%s1289_s6] sm:$0xff] %v861_v1  ;;  %v747_v10 = vadd.f32 %v738_v54, %v727_v2  ;;  %v748_v12 = vadd.f32 %v742_v55, %v728_v3  ;;  %v709_v5 = vmul.f32 %v986_v4, %v669_v24  ;;  %v710_v6 = vmul.f32 %v986_v4, %v670_v25 }
 0x25d   :  { %v862_v7 = vpack.c.bf16 %v748_v12, %v747_v10  ;;  %v729_v8 = vmul.f32 %v718_v50, %v709_v5  ;;  %v730_v9 = vmul.f32 %v722_v51, %v710_v6 }
 0x25e   :  { %v988_v11 = vpop.eup %987 }
 0x25f   :  { %778 = vst [vmem:[%s1289_s6 + $0x8] sm:$0xff] %v862_v7  ;;  %v749_v13 = vadd.f32 %v738_v54, %v729_v8  ;;  %v750_v15 = vadd.f32 %v742_v55, %v730_v9  ;;  %v711_v16 = vmul.f32 %v988_v11, %v671_v31  ;;  %v712_v18 = vmul.f32 %v988_v11, %v672_v32 }
 0x261   :  { %v863_v19 = vpack.c.bf16 %v750_v15, %v749_v13  ;;  %v731_v14 = vmul.f32 %v718_v50, %v711_v16  ;;  %v732_v20 = vmul.f32 %v722_v51, %v712_v18 }
 0x263   :  { %779 = vst [vmem:[%s1289_s6 + $0x10] sm:$0xff] %v863_v19  ;;  %v751_v17 = vadd.f32 %v738_v54, %v731_v14  ;;  %v752_v21 = vadd.f32 %v742_v55, %v732_v20 }
 0x265   :  { %v864_v22 = vpack.c.bf16 %v752_v21, %v751_v17 }
 0x267   :  { %780 = vst [vmem:[%s1289_s6 + $0x18] sm:$0xff] %v864_v22 }

// kernel: bert_classifier_forward.23
= control target key start
LH: loop header
LB: loop body
LE: loop exit
PB: predicated region body
PF: predicated region fallthrough
CT: control target
= control target key end

     0   :  { %v57_v9 = vlaneseq  ;;  %v654_v10 = vmov 1966171168   ;;  %s860_s0 = inlined_call_operand.vmem [shape: bf16[2,256], index: 0, kind: input, shape index: {}]   ;;  %s861_s1 = inlined_call_operand.vmem [shape: bf16[256,256], index: 1, kind: input, shape index: {}]   ;;  %s862_s2 = inlined_call_operand.vmem [shape: f32[1,256], index: 2, kind: input, shape index: {}]   ;;  %s863_s3 = inlined_call_operand.vmem [shape: bf16[256,2], index: 3, kind: input, shape index: {}]   ;;  %s864_s4 = inlined_call_operand.vmem [shape: f32[1,2], index: 4, kind: input, shape index: {}]   ;;  %s865_s5 = inlined_call_operand.hbm [shape: f32[2,2], index: 5, kind: output, shape index: {}]  }
   0x1   :  { %v562_v0 = vld [vmem:[%s861_s1 + $0x4] ss:$8 sps:$4 sm:$0xff]   ;;  %v564_v1 = vld [vmem:[%s861_s1] ss:$8 sps:$4 sm:$0xff]   ;;  %v565_v2 = vld [vmem:[%s861_s1 + $0x14] ss:$8 sps:$4 sm:$0xff]   ;;  %v77_v11 = vunpack.c.l.s4 %v654_v10 }
   0x2   :  { %252 = vmatprep.subr.bf16.mxu0 %v562_v0  ;;  %v567_v3 = vld [vmem:[%s861_s1 + $0x10] ss:$8 sps:$4 sm:$0xff]   ;;  %v568_v4 = vld [vmem:[%s861_s1 + $0x24] ss:$8 sps:$4 sm:$0xff]   ;;  %v570_v5 = vld [vmem:[%s861_s1 + $0x20] ss:$8 sps:$4 sm:$0xff]  }
   0x3   :  { %253 = vmatpush1.bf16.msra.mxu0 %v564_v1  ;;  %v571_v6 = vld [vmem:[%s861_s1 + $0x34] ss:$8 sps:$4 sm:$0xff]   ;;  %v573_v7 = vld [vmem:[%s861_s1 + $0x30] ss:$8 sps:$4 sm:$0xff]   ;;  %v574_v8 = vld [vmem:[%s861_s1 + $0x44] ss:$8 sps:$4 sm:$0xff]   ;;  %v78_v15 = vunpack.c.0.s8 %v77_v11 }
   0x4   :  { %254 = vmatprep.subr.bf16.mxu0 %v565_v2  ;;  %v576_v12 = vld [vmem:[%s861_s1 + $0x40] ss:$8 sps:$4 sm:$0xff]   ;;  %v577_v13 = vld [vmem:[%s861_s1 + $0x54] ss:$8 sps:$4 sm:$0xff]   ;;  %v719_v14 = vshrl.u32 %v57_v9, 7 }
   0x5   :  { %v579_v16 = vld [vmem:[%s861_s1 + $0x50] ss:$8 sps:$4 sm:$0xff]   ;;  %v580_v17 = vld [vmem:[%s861_s1 + $0x64] ss:$8 sps:$4 sm:$0xff]   ;;  %v582_v19 = vld [vmem:[%s861_s1 + $0x60] ss:$8 sps:$4 sm:$0xff]  }
   0x6   :  { %v728_v18 = vsub.s32 %v78_v15, %v719_v14  ;;  %v488_v20 = vld.sshfl [vmem:[%s860_s0] sm:$0x11 pattern:$0x75316420]  ;;  %v583_v21 = vld [vmem:[%s861_s1 + $0x74] ss:$8 sps:$4 sm:$0xff]  }
   0x7   :  { %255 = vmatpush1.bf16.msra.mxu0 %v567_v3  ;;  %v75_v22 = vcombine.high %v488_v20, %v488_v20  ;;  %v610_v23 = vld [vmem:[%s863_s3 + $0x40] sm:$0xff]   ;;  %v612_v26 = vld [vmem:[%s863_s3 + $0x48] sm:$0xff]   ;;  %v614_v28 = vld [vmem:[%s863_s3 + $0x50] sm:$0xff]  }
   0x8   :  { %256 = vmatprep.subr.bf16.mxu0 %v568_v4  ;;  %v611_v24 = vld [vmem:[%s863_s3] sm:$0xff]   ;;  %538 = vmatprep.subr.bf16.mxu1 %v610_v23  ;;  %v613_v27 = vld [vmem:[%s863_s3 + $0x8] sm:$0xff]   ;;  %v585_v29 = vld [vmem:[%s861_s1 + $0x70] ss:$8 sps:$4 sm:$0xff]  }
   0x9   :  { %v89_v25 = vrot.slane %v75_v22, %v728_v18  ;;  %539 = vmatpush3.bf16.msra.mxu1 %v611_v24  ;;  %v586_v30 = vld [vmem:[%s861_s1 + $0x84] ss:$8 sps:$4 sm:$0xff]   ;;  %v588_v31 = vld [vmem:[%s861_s1 + $0x80] ss:$8 sps:$4 sm:$0xff]   ;;  %v615_v32 = vld [vmem:[%s863_s3 + $0x10] sm:$0xff]  }
   0xa   :  { %540 = vmatprep.subr.bf16.mxu1 %v612_v26  ;;  %v589_v33 = vld [vmem:[%s861_s1 + $0x94] ss:$8 sps:$4 sm:$0xff]   ;;  %v591_v36 = vld [vmem:[%s861_s1 + $0x90] ss:$8 sps:$4 sm:$0xff]  }
   0xb   :  { %257 = vmatpush1.bf16.msra.mxu0 %v570_v5  ;;  %284 = vmatprep.mubr.bf16.mxu0 %v89_v25  ;;  %v616_v34 = vld [vmem:[%s863_s3 + $0x58] sm:$0xff]  }
   0xc   :  { %258 = vmatprep.subr.bf16.mxu0 %v571_v6  ;;  %v617_v35 = vld [vmem:[%s863_s3 + $0x18] sm:$0xff]  }
   0xd   :  { %541 = vmatpush3.bf16.msra.mxu1 %v613_v27 }
   0xe   :  { %542 = vmatprep.subr.bf16.mxu1 %v614_v28 }
   0xf   :  { %259 = vmatpush1.bf16.msra.mxu0 %v573_v7 }
  0x10   :  { %260 = vmatprep.subr.bf16.mxu0 %v574_v8 }
  0x11   :  { %543 = vmatpush3.bf16.msra.mxu1 %v615_v32 }
  0x12   :  { %544 = vmatprep.subr.bf16.mxu1 %v616_v34 }
  0x13   :  { %261 = vmatpush1.bf16.msra.mxu0 %v576_v12 }
  0x14   :  { %262 = vmatprep.subr.bf16.mxu0 %v577_v13 }
  0x17   :  { %263 = vmatpush1.bf16.msra.mxu0 %v579_v16 }
  0x18   :  { %264 = vmatprep.subr.bf16.mxu0 %v580_v17 }
  0x1b   :  { %265 = vmatpush1.bf16.msra.mxu0 %v582_v19 }
  0x1c   :  { %266 = vmatprep.subr.bf16.mxu0 %v583_v21 }
  0x1f   :  { %267 = vmatpush1.bf16.msra.mxu0 %v585_v29 }
  0x20   :  { %268 = vmatprep.subr.bf16.mxu0 %v586_v30 }
  0x23   :  { %269 = vmatpush1.bf16.msra.mxu0 %v588_v31 }
  0x24   :  { %10 = vsyncpa [#allocation3], 0  ;;  %270 = vmatprep.subr.bf16.mxu0 %v589_v33  ;;  %v592_v37 = vld [vmem:[%s861_s1 + $0xa4] ss:$8 sps:$4 sm:$0xff]   ;;  %545 = vmatpush3.bf16.msra.mxu1 %v617_v35  ;;  %v594_v38 = vld [vmem:[%s861_s1 + $0xa0] ss:$8 sps:$4 sm:$0xff]   ;;  %v82_v49 = vrot.slane %v488_v20, %v728_v18 }
  0x25   :  { %v595_v39 = vld [vmem:[%s861_s1 + $0xb4] ss:$8 sps:$4 sm:$0xff]   ;;  %v597_v40 = vld [vmem:[%s861_s1 + $0xb0] ss:$8 sps:$4 sm:$0xff]   ;;  %v598_v41 = vld [vmem:[%s861_s1 + $0xc4] ss:$8 sps:$4 sm:$0xff]  }
  0x26   :  { %v600_v42 = vld [vmem:[%s861_s1 + $0xc0] ss:$8 sps:$4 sm:$0xff]   ;;  %v601_v43 = vld [vmem:[%s861_s1 + $0xd4] ss:$8 sps:$4 sm:$0xff]   ;;  %v603_v44 = vld [vmem:[%s861_s1 + $0xd0] ss:$8 sps:$4 sm:$0xff]  }
  0x27   :  { %271 = vmatpush1.bf16.msra.mxu0 %v591_v36  ;;  %v604_v45 = vld [vmem:[%s861_s1 + $0xe4] ss:$8 sps:$4 sm:$0xff]   ;;  %v606_v46 = vld [vmem:[%s861_s1 + $0xe0] ss:$8 sps:$4 sm:$0xff]   ;;  %v607_v47 = vld [vmem:[%s861_s1 + $0xf4] ss:$8 sps:$4 sm:$0xff]  }
  0x28   :  { %272 = vmatprep.subr.bf16.mxu0 %v592_v37  ;;  %v609_v48 = vld [vmem:[%s861_s1 + $0xf0] ss:$8 sps:$4 sm:$0xff]   ;;  %v618_v50 = vld [vmem:[%s863_s3 + $0x60] sm:$0xff]   ;;  %v620_v52 = vld [vmem:[%s863_s3 + $0x68] sm:$0xff]   ;;  %v59_v58 = vsub.s32 0, %v719_v14  ;;  %v63_v60 = vsub.s32 1, %v719_v14 }
  0x29   :  { %v619_v51 = vld [vmem:[%s863_s3 + $0x20] sm:$0xff]   ;;  %546 = vmatprep.subr.bf16.mxu1 %v618_v50  ;;  %v621_v53 = vld [vmem:[%s863_s3 + $0x28] sm:$0xff]   ;;  %v622_v54 = vld [vmem:[%s863_s3 + $0x70] sm:$0xff]   ;;  %s655_s14 = smov [#allocation2]   ;;  %vm472_vm0 = vcmask 9216  }
  0x2a   :  { %547 = vmatpush3.bf16.msra.mxu1 %v619_v51  ;;  %v623_v55 = vld [vmem:[%s863_s3 + $0x30] sm:$0xff]   ;;  %v624_v56 = vld [vmem:[%s863_s3 + $0x78] sm:$0xff]   ;;  %v55_v59 = vld [vmem:[%s862_s2] sm:$0x3]  ;;  %s480_s15 = sshll.u32 %s655_s14, 4  ;;  %s481_s15 = int_to_ptr.vmem [resolvable:$true] %s480_s15 }
  0x2b   :  { %273 = vmatpush1.bf16.msra.mxu0 %v594_v38  ;;  %548 = vmatprep.subr.bf16.mxu1 %v620_v52  ;;  %v625_v57 = vld [vmem:[%s863_s3 + $0x38] sm:$0xff]   ;;  %v60_v61 = vrot.slane %v55_v59, %v59_v58  ;;  %v64_v62 = vrot.slane %v55_v59, %v63_v60  ;;  %v521_v10 = vld [vmem:[%s864_s4] ss:$0 sm:$0xff]  ;;  %s630_s16 = scalar_lea.vmem %s481_s15, 32  ;;  %p635_p1 = scmp.lt.s32.totalorder %s481_s15, %s481_s15 }
  0x2c   :  { %274 = vmatprep.subr.bf16.mxu0 %v595_v39  ;;  %p631_p0 = scmp.ne.s32.totalorder %s481_s15, %s630_s16  ;;  %p636_p2 = scmp.lt.s32.totalorder %s630_s16, %s630_s16 }
  0x2e   :  { %549 = vmatpush3.bf16.msra.mxu1 %v621_v53  ;;  %p637_p3 = por %p636_p2, %p635_p1 }
  0x2f   :  { %275 = vmatpush1.bf16.msra.mxu0 %v597_v40  ;;  %550 = vmatprep.subr.bf16.mxu1 %v622_v54 }
  0x30   :  { %276 = vmatprep.subr.bf16.mxu0 %v598_v41  ;;  %p638_p4 = pnand %p637_p3, %p631_p0 }
  0x32   :  { %551 = vmatpush3.bf16.msra.mxu1 %v623_v55 }
  0x33   :  { %277 = vmatpush1.bf16.msra.mxu0 %v600_v42  ;;  %552 = vmatprep.subr.bf16.mxu1 %v624_v56 }
  0x34   :  { %278 = vmatprep.subr.bf16.mxu0 %v601_v43 }
  0x36   :  { %553 = vmatpush3.bf16.msra.mxu1 %v625_v57 }
  0x37   :  { %279 = vmatpush1.bf16.msra.mxu0 %v603_v44 }
  0x38   :  { %280 = vmatprep.subr.bf16.mxu0 %v604_v45 }
  0x3b   :  { %281 = vmatpush1.bf16.msra.mxu0 %v606_v46 }
  0x3c   :  { %282 = vmatprep.subr.bf16.mxu0 %v607_v47 }
  0x3f   :  { %283 = vmatpush1.bf16.msra.mxu0 %v609_v48 }
  0x42   :  { %285 = vmatmul.mubr.bf16.vlgmr.msra.gmra.mrb[0].mxu0 %v82_v49 }
 0x115   :  { %v286_v63 = vpop.f32.mrb[0].mxu0 }
 0x116   :  { %v287_v0 = vadd.f32 %v286_v63, %v60_v61  ;;  %v288_v1 = vpop.f32.mrb[1].mxu0 }
 0x117   :  { %v289_v2 = vadd.f32 %v288_v1, %v64_v62  ;;  %v290_v3 = vpop.f32.mrb[2].mxu0 }
 0x118   :  { %626 = vtanh.f32 %v287_v0  ;;  %v291_v4 = vpop.f32.mrb[3].mxu0 }
 0x119   :  { %628 = vtanh.f32 %v289_v2 }
 0x122   :  { %v627_v5 = vpop.eup %626 }
 0x123   :  { %v629_v6 = vpop.eup %628  ;;  %v295_v8 = vpack.c.bf16 %v627_v5, %v627_v5 }
 0x124   :  { %v296_v7 = vpack.c.bf16 %v629_v6, %v629_v6 }
 0x126   :  { %464 = vmatprep.mubr.bf16.mxu1 %v296_v7 }
 0x127   :  { %465 = vmatmul.mubr.bf16.vlgmr.msra.gmra.mrb[0].mxu1 %v295_v8 }
 0x1fa   :  { %v554_v9 = vpop.f32.mrb[0].mxu1 }
 0x1fb   :  { %v555_v11 = vpop.f32.mrb[1].mxu1 }
 0x1fc   :  { %v556_v12 = vadd.f32 %v555_v11, %v554_v9  ;;  %v557_v13 = vpop.f32.mrb[2].mxu1 }
 0x1fd   :  { %v558_v14 = vpop.f32.mrb[3].mxu1 }
 0x1fe   :  { %v467_v15 = vadd.f32 %v556_v12, %v521_v10 }
 0x200   :  { %473 = vst.msk [vmem:[#allocation2] sm:$0x3] %vm472_vm0, %v467_v15 }
 0x201   :  { %641 = shalt.err (!%p638_p4)
}
 0x202   :  { %s642_s4 = scalar_lea.hbm %s865_s5, 32 }
 0x203   :  { %p643_p5 = scmp.ne.s32.totalorder %s865_s5, %s642_s4  ;;  %p646_p6 = scmp.lt.u32.totalorder %s642_s4, %s865_s5 }
 0x205   :  { %p648_p7 = pnand %p646_p6, %p643_p5 }
 0x207   :  { %651 = shalt.err (!%p648_p7)
}
 0x208   :  { %483 = dma.vmem_to_hbm [thread:$0]  %s481_s15, 32, %s865_s5, [#allocation3]  }
 0x209   :  { %652 = dma.done.wait [#allocation3], 32  }
 0x20a   :  { %653 = vsyncadd [#allocation3], 4294967264 }
 0x20b   :  { %487 = vsyncpa [#allocation3], 1 }

</bundles_post_ra>
